<compile_context>
chip_gen: v7x
topology: tpu7x:2x2x1
jax: 0.10.0
libtpu: 0.0.40
codegen_flags: <defaults>
</compile_context>

<pallas_src>
import jax
import jax.numpy as jnp
from jax import lax
from jax.experimental import pallas as pl
from jax.experimental.pallas import tpu as pltpu

# Plain Python float (NOT a jnp scalar): a module-level jnp.float32 constant
# gets closed over as an array and breaks pallas tracing.
_MASK_VALUE = -1e30  # finite sentinel: avoids (-inf)-(-inf) NaNs


def encoder_kernel(lo_blk_ref, hi_blk_ref,          # scalar prefetch (SMEM)
                   scores_ref, x_ref, off_ref,      # inputs
                   out_ref,                         # output
                   m_sc, l_sc, acc_sc):             # VMEM scratch
    i = pl.program_id(0)            # word-tile index              (parallel)
    k = pl.program_id(1)            # compacted subword-tile index (reduction)
    nk = pl.num_programs(1)
    tile_s = x_ref.shape[0]

    @pl.when(k == 0)
    def _init():
        m_sc[...] = jnp.full_like(m_sc, _MASK_VALUE)
        l_sc[...] = jnp.zeros_like(l_sc)
        acc_sc[...] = jnp.zeros_like(acc_sc)

    # Compacted reduction: absolute subword block index for this step. Word
    # tile i only ever needs blocks in [lo_blk[i], hi_blk[i]].
    blk = lo_blk_ref[i] + k
    in_band = blk <= hi_blk_ref[i]

    @pl.when(in_band)
    def _update():
        k_lo = blk * tile_s
        x = x_ref[...]                                   # [tile_s, E]  bf16
        scores = scores_ref[...]                         # [1, tile_s]  f32

        off = off_ref[...]                               # [tile_w, 2]  i32
        # Shift the tiny start/end columns instead of the full-tile iota.
        start_rel = off[:, 0:1] - k_lo                   # [tile_w, 1]
        end_rel = off[:, 1:2] - k_lo                     # [tile_w, 1]
        idx = lax.broadcasted_iota(jnp.int32, (off.shape[0], tile_s), 1)
        # Fold the word->subword mask directly into the logits.
        logits = jnp.where((idx >= start_rel) & (idx < end_rel),
                           scores, _MASK_VALUE)          # [tile_w, tile_s]

        # Online (flash-style) softmax update across the compacted axis.
        m_prev = m_sc[...]
        m_new = jnp.maximum(m_prev, jnp.max(logits, axis=1, keepdims=True))
        alpha = jnp.exp(m_prev - m_new)
        p = jnp.exp(logits - m_new)                      # [tile_w, tile_s] f32
        l_sc[...] = alpha * l_sc[...] + jnp.sum(p, axis=1, keepdims=True)
        acc_sc[...] = alpha * acc_sc[...] + jnp.dot(
            p.astype(jnp.bfloat16), x, preferred_element_type=jnp.float32)
        m_sc[...] = m_new

    @pl.when(k == nk - 1)
    def _finalize():
        l = l_sc[...]
        # Guard empty subword ranges (reference yields NaN there; we return a
        # finite value instead -- documented behavioral difference).
        denom = jnp.where(l > 0.0, l, 1.0)
        out_ref[...] = (acc_sc[...] / denom).astype(out_ref.dtype)
        # TODO(synk): training-mode dropout would use pltpu.prng_seed /
        # pltpu.prng_random_bits; eval-mode dropout is identity.


def encoder_forward(subword_embeddings, word_to_subword_offset, attn_w, attn_b,
                    *, tile_w=256, tile_s=512):
    """subword_embeddings: [S, E] f32, word_to_subword_offset: [W, 2] i32,
    attn_w: [1, E] f32 (torch nn.Linear weight layout), attn_b: [1, 1] f32.

    attn_b is accepted for interface parity but unused: softmax is shift
    invariant, so a scalar bias added to every logit is a mathematical no-op.
    Offsets must be concrete (not traced) so the compacted reduction grid
    extent can be computed in the wrapper.
    """
    del attn_b
    S, E = subword_embeddings.shape
    W = word_to_subword_offset.shape[0]

    grid_w = pl.cdiv(W, tile_w)
    grid_s = pl.cdiv(S, tile_s)
    W_pad = grid_w * tile_w
    S_pad = grid_s * tile_s

    x_f32 = subword_embeddings.astype(jnp.float32)

    # Hoisted, word-independent score GEMV: one [S]-length product in f32.
    w_row = attn_w.reshape(1, E).astype(jnp.float32)
    scores = (x_f32 @ w_row.T).reshape(1, S)              # [1, S]
    if S_pad > S:
        scores = jnp.pad(scores, ((0, 0), (0, S_pad - S)))
        x_f32 = jnp.pad(x_f32, ((0, S_pad - S), (0, 0)))  # pad rows stay masked

    # Stream embeddings in bf16 (MXU-native, half the DMA bytes); the online
    # softmax statistics and the accumulator stay f32 in VMEM scratch.
    x_bf16 = x_f32.astype(jnp.bfloat16)

    off = word_to_subword_offset.astype(jnp.int32)
    if W_pad > W:
        off = jnp.pad(off, ((0, W_pad - W), (0, 0)), mode="edge")  # repeat last

    # Per word-tile subword block band (SMEM scalar prefetch): drives the
    # data-dependent index_maps and the in-kernel skip of out-of-band blocks.
    off_tiles = off.reshape(grid_w, tile_w, 2)
    band_lo = jnp.min(off_tiles[:, :, 0], axis=1)
    band_hi = jnp.max(off_tiles[:, :, 1], axis=1)
    lo_blk = (band_lo // tile_s).astype(jnp.int32)                 # [grid_w]
    hi_blk = jnp.maximum(jnp.maximum(band_hi - 1, 0) // tile_s,
                         lo_blk).astype(jnp.int32)                 # [grid_w]

    # Compacted reduction grid: only as many steps as the widest band needs.
    nk = int(jnp.max(hi_blk - lo_blk)) + 1
    nk = min(max(nk, 1), grid_s)

    def x_index_map(i, k, lo, hi):
        return jnp.minimum(lo[i] + k, hi[i]), 0

    def scores_index_map(i, k, lo, hi):
        return 0, jnp.minimum(lo[i] + k, hi[i])

    grid_spec = pltpu.PrefetchScalarGridSpec(
        num_scalar_prefetch=2,
        grid=(grid_w, nk),
        in_specs=[
            pl.BlockSpec((1, tile_s), scores_index_map),              # scores
            pl.BlockSpec((tile_s, E), x_index_map),                   # embeddings
            pl.BlockSpec((tile_w, 2), lambda i, k, lo, hi: (i, 0)),   # offsets
        ],
        out_specs=pl.BlockSpec((tile_w, E), lambda i, k, lo, hi: (i, 0)),
        scratch_shapes=[
            pltpu.VMEM((tile_w, 1), jnp.float32),   # running max m
            pltpu.VMEM((tile_w, 1), jnp.float32),   # running denominator l
            pltpu.VMEM((tile_w, E), jnp.float32),   # output accumulator
        ],
    )

    out = pl.pallas_call(
        encoder_kernel,
        out_shape=jax.ShapeDtypeStruct((W_pad, E), jnp.float32),
        grid_spec=grid_spec,
        compiler_params=pltpu.CompilerParams(
            dimension_semantics=("parallel", "arbitrary"),
            vmem_limit_bytes=48 * 1024 * 1024,   # safe on v7x (64 MiB physical)
        ),
    )(lo_blk, hi_blk, scores, x_bf16, off)
    return out[:W]


def encoder_reference(subword_embeddings, word_to_subword_offset, attn_w, attn_b):
    # Pure-JAX mirror of the torch forward (eval-mode dropout = identity).
    S, _ = subword_embeddings.shape
    idx = jnp.arange(S)[None, :]
    mask = ((idx >= word_to_subword_offset[:, 0:1]) &
            (idx < word_to_subword_offset[:, 1:2]))
    attn_mask = jnp.log(mask.astype(jnp.float32))
    scores = (subword_embeddings @ attn_w.T + attn_b[0, 0]).T           # [1, S]
    probs = jax.nn.softmax(attn_mask + scores, axis=1)
    return probs @ subword_embeddings


if __name__ == "__main__":
    key = jax.random.PRNGKey(0)
    k_emb, k_w, k_b = jax.random.split(key, 3)

    n_subwords = 1000      # S (not a tile multiple -> exercises padding)
    n_words = 300          # W (not a tile multiple -> exercises edge padding)
    emb_size = 128         # E (word_embedding_size; lane-dense output)

    subword_embeddings = jax.random.normal(
        k_emb, (n_subwords, emb_size), dtype=jnp.float32)

    # Contiguous word -> [start, end) subword spans covering [0, S), non-empty.
    base, rem = divmod(n_subwords, n_words)
    lengths = jnp.full((n_words,), base, dtype=jnp.int32).at[:rem].add(1)
    ends = jnp.cumsum(lengths).astype(jnp.int32)
    starts = ends - lengths
    word_to_subword_offset = jnp.stack([starts, ends], axis=1)          # [W, 2]

    # Synthetic Linear(E, 1) parameters (torch weight layout [1, E]).
    attn_w = (jax.random.normal(k_w, (1, emb_size), dtype=jnp.float32)
              / jnp.sqrt(emb_size).astype(jnp.float32))
    attn_b = jax.random.normal(k_b, (1, 1), dtype=jnp.float32) * 0.01

    out = encoder_forward(subword_embeddings, word_to_subword_offset, attn_w, attn_b)
    out = jax.block_until_ready(out)

    ref = encoder_reference(subword_embeddings, word_to_subword_offset, attn_w, attn_b)
    assert out.shape == (n_words, emb_size)
    # Tolerance reflects streaming the embeddings / attention weights through
    # the MXU in bf16 (f32 accumulation); softmax statistics stay f32 and the
    # final divide is exact.
    assert jnp.allclose(out, ref, atol=2e-2, rtol=2e-2), (
        float(jnp.max(jnp.abs(out - ref))))

    print("KERNEL_OK")
</pallas_src>

<mosaic_0001>
module attributes {stable_mosaic.version = 11 : i64} {
  func.func @encoder_kernel(%arg0: i32, %arg1: i32, %arg2: memref<2xi32, #tpu.memory_space<smem>>, %arg3: memref<2xi32, #tpu.memory_space<smem>>, %arg4: memref<1x512xf32, #tpu.memory_space<vmem>>, %arg5: memref<512x128xbf16, #tpu.memory_space<vmem>>, %arg6: memref<256x2xi32, #tpu.memory_space<vmem>>, %arg7: memref<256x128xf32, #tpu.memory_space<vmem>>, %arg8: memref<256x1xf32, #tpu.memory_space<vmem>>, %arg9: memref<256x1xf32, #tpu.memory_space<vmem>>, %arg10: memref<256x128xf32, #tpu.memory_space<vmem>>) attributes {dimension_semantics = [#tpu.dimension_semantics<parallel>, #tpu.dimension_semantics<arbitrary>], iteration_bounds = array<i64: 2, 2>, scalar_prefetch = 2 : i64, scratch_operands = 3 : i64, tpu.core_type = #tpu.core_type<tc>, window_params = [{transform_indices = @transform_0, window_bounds = array<i64: 1, 512>}, {transform_indices = @transform_1, window_bounds = array<i64: 512, 128>}, {transform_indices = @transform_2, window_bounds = array<i64: 256, 2>}, {transform_indices = @transform_3, window_bounds = array<i64: 256, 128>}]} {
    %c0_i32 = arith.constant 0 : i32
    %0 = arith.cmpi eq, %arg1, %c0_i32 : i32
    %1 = arith.extui %0 : i1 to i32
    %c0_i32_0 = arith.constant 0 : i32
    %2 = arith.cmpi ne, %1, %c0_i32_0 : i32
    scf.if %2 {
      %cst = arith.constant -1.000000e+30 : f32
      %14 = vector.broadcast %cst : f32 to vector<256x1xf32>
      %c0 = arith.constant 0 : index
      %c0_3 = arith.constant 0 : index
      %15 = vector.load %arg8[%c0, %c0_3] : memref<256x1xf32, #tpu.memory_space<vmem>>, vector<256x1xf32>
      tpu.vector_store %arg8[%c0, %c0_3], %14 {strides = array<i32>} : memref<256x1xf32, #tpu.memory_space<vmem>>, vector<256x1xf32>,
      %cst_4 = arith.constant 0.000000e+00 : f32
      %16 = vector.broadcast %cst_4 : f32 to vector<256x1xf32>
      %c0_5 = arith.constant 0 : index
      %c0_6 = arith.constant 0 : index
      %17 = vector.load %arg9[%c0_5, %c0_6] : memref<256x1xf32, #tpu.memory_space<vmem>>, vector<256x1xf32>
      tpu.vector_store %arg9[%c0_5, %c0_6], %16 {strides = array<i32>} : memref<256x1xf32, #tpu.memory_space<vmem>>, vector<256x1xf32>,
      %cst_7 = arith.constant 0.000000e+00 : f32
      %18 = vector.broadcast %cst_7 : f32 to vector<256x128xf32>
      %c0_8 = arith.constant 0 : index
      %c0_9 = arith.constant 0 : index
      %19 = vector.load %arg10[%c0_8, %c0_9] : memref<256x128xf32, #tpu.memory_space<vmem>>, vector<256x128xf32>
      tpu.vector_store %arg10[%c0_8, %c0_9], %18 {strides = array<i32>} : memref<256x128xf32, #tpu.memory_space<vmem>>, vector<256x128xf32>,
    } else {
    }
    %3 = arith.index_cast %arg0 : i32 to index
    %4 = memref.load %arg2[%3] : memref<2xi32, #tpu.memory_space<smem>>
    %5 = arith.addi %4, %arg1 : i32
    %6 = arith.index_cast %arg0 : i32 to index
    %7 = memref.load %arg3[%6] : memref<2xi32, #tpu.memory_space<smem>>
    %8 = arith.cmpi sle, %5, %7 : i32
    %9 = arith.extui %8 : i1 to i32
    %c0_i32_1 = arith.constant 0 : i32
    %10 = arith.cmpi ne, %9, %c0_i32_1 : i32
    scf.if %10 {
      %c512_i32 = arith.constant 512 : i32
      %14 = arith.muli %5, %c512_i32 : i32
      %c0 = arith.constant 0 : index
      %c0_3 = arith.constant 0 : index
      %15 = vector.load %arg5[%c0, %c0_3] : memref<512x128xbf16, #tpu.memory_space<vmem>>, vector<512x128xbf16>
      %c0_4 = arith.constant 0 : index
      %c0_5 = arith.constant 0 : index
      %16 = vector.load %arg4[%c0_4, %c0_5] : memref<1x512xf32, #tpu.memory_space<vmem>>, vector<1x512xf32>
      %c0_6 = arith.constant 0 : index
      %c0_7 = arith.constant 0 : index
      %17 = vector.load %arg6[%c0_6, %c0_7] : memref<256x2xi32, #tpu.memory_space<vmem>>, vector<256x2xi32>
      %18 = vector.extract_strided_slice %17 {offsets = [0, 0], sizes = [256, 1], strides = [1, 1]} : vector<256x2xi32> to vector<256x1xi32>
      %19 = vector.broadcast %14 : i32 to vector<256x1xi32>
      %20 = arith.subi %18, %19 : vector<256x1xi32>
      %21 = vector.extract_strided_slice %17 {offsets = [0, 1], sizes = [256, 1], strides = [1, 1]} : vector<256x2xi32> to vector<256x1xi32>
      %22 = vector.broadcast %14 : i32 to vector<256x1xi32>
      %23 = arith.subi %21, %22 : vector<256x1xi32>
      %24 = tpu.iota {dimensions = array<i32: 1>} : vector<256x512xi32>
      %25 = vector.broadcast %20 : vector<256x1xi32> to vector<256x512xi32>
      %26 = arith.cmpi sge, %24, %25 : vector<256x512xi32>
      %27 = vector.broadcast %23 : vector<256x1xi32> to vector<256x512xi32>
      %28 = arith.cmpi slt, %24, %27 : vector<256x512xi32>
      %29 = arith.andi %26, %28 : vector<256x512xi1>
      %cst = arith.constant -1.000000e+30 : f32
      %30 = vector.shape_cast %16 : vector<1x512xf32> to vector<1x512xf32>
      %31 = vector.broadcast %30 : vector<1x512xf32> to vector<256x512xf32>
      %32 = vector.broadcast %cst : f32 to vector<256x512xf32>
      %33 = arith.select %29, %31, %32 : vector<256x512xi1>, vector<256x512xf32>
      %c0_8 = arith.constant 0 : index
      %c0_9 = arith.constant 0 : index
      %34 = vector.load %arg8[%c0_8, %c0_9] : memref<256x1xf32, #tpu.memory_space<vmem>>, vector<256x1xf32>
      %cst_10 = arith.constant dense<0xFF800000> : vector<256xf32>
      %35 = vector.multi_reduction <maximumf>, %33, %cst_10 [1] : vector<256x512xf32> to vector<256xf32>
      %36 = vector.shape_cast %35 : vector<256xf32> to vector<256x1xf32>
      %37 = arith.maximumf %34, %36 : vector<256x1xf32>
      %38 = arith.subf %34, %37 : vector<256x1xf32>
      %39 = math.exp %38 : vector<256x1xf32>
      %40 = vector.broadcast %37 : vector<256x1xf32> to vector<256x512xf32>
      %41 = arith.subf %33, %40 : vector<256x512xf32>
      %42 = math.exp %41 : vector<256x512xf32>
      %c0_11 = arith.constant 0 : index
      %c0_12 = arith.constant 0 : index
      %43 = vector.load %arg9[%c0_11, %c0_12] : memref<256x1xf32, #tpu.memory_space<vmem>>, vector<256x1xf32>
      %44 = arith.mulf %39, %43 : vector<256x1xf32>
      %cst_13 = arith.constant dense<0.000000e+00> : vector<256xf32>
      %45 = vector.multi_reduction <add>, %42, %cst_13 [1] : vector<256x512xf32> to vector<256xf32>
      %46 = vector.shape_cast %45 : vector<256xf32> to vector<256x1xf32>
      %47 = arith.addf %44, %46 : vector<256x1xf32>
      %c0_14 = arith.constant 0 : index
      %c0_15 = arith.constant 0 : index
      %48 = vector.load %arg9[%c0_14, %c0_15] : memref<256x1xf32, #tpu.memory_space<vmem>>, vector<256x1xf32>
      tpu.vector_store %arg9[%c0_14, %c0_15], %47 {strides = array<i32>} : memref<256x1xf32, #tpu.memory_space<vmem>>, vector<256x1xf32>,
      %c0_16 = arith.constant 0 : index
      %c0_17 = arith.constant 0 : index
      %49 = vector.load %arg10[%c0_16, %c0_17] : memref<256x128xf32, #tpu.memory_space<vmem>>, vector<256x128xf32>
      %50 = vector.broadcast %39 : vector<256x1xf32> to vector<256x128xf32>
      %51 = arith.mulf %50, %49 : vector<256x128xf32>
      %52 = arith.truncf %42 : vector<256x512xf32> to vector<256x512xbf16>
      %cst_18 = arith.constant dense<0.000000e+00> : vector<256x128xf32>
      %53 = tpu.matmul %52, %15, %cst_18 {dimension_numbers = #tpu.dot_dimension_numbers<[1], [0], [0], [1], [0, 0, 1, 1], [], []>} : vector<256x512xbf16>, vector<512x128xbf16>, vector<256x128xf32> -> vector<256x128xf32>
      %54 = arith.addf %51, %53 : vector<256x128xf32>
      %c0_19 = arith.constant 0 : index
      %c0_20 = arith.constant 0 : index
      %55 = vector.load %arg10[%c0_19, %c0_20] : memref<256x128xf32, #tpu.memory_space<vmem>>, vector<256x128xf32>
      tpu.vector_store %arg10[%c0_19, %c0_20], %54 {strides = array<i32>} : memref<256x128xf32, #tpu.memory_space<vmem>>, vector<256x128xf32>,
      %c0_21 = arith.constant 0 : index
      %c0_22 = arith.constant 0 : index
      %56 = vector.load %arg8[%c0_21, %c0_22] : memref<256x1xf32, #tpu.memory_space<vmem>>, vector<256x1xf32>
      tpu.vector_store %arg8[%c0_21, %c0_22], %37 {strides = array<i32>} : memref<256x1xf32, #tpu.memory_space<vmem>>, vector<256x1xf32>,
    } else {
    }
    %c1_i32 = arith.constant 1 : i32
    %11 = arith.cmpi eq, %arg1, %c1_i32 : i32
    %12 = arith.extui %11 : i1 to i32
    %c0_i32_2 = arith.constant 0 : i32
    %13 = arith.cmpi ne, %12, %c0_i32_2 : i32
    scf.if %13 {
      %c0 = arith.constant 0 : index
      %c0_3 = arith.constant 0 : index
      %14 = vector.load %arg9[%c0, %c0_3] : memref<256x1xf32, #tpu.memory_space<vmem>>, vector<256x1xf32>
      %cst = arith.constant 0.000000e+00 : f32
      %15 = vector.broadcast %cst : f32 to vector<256x1xf32>
      %16 = arith.cmpf ogt, %14, %15 : vector<256x1xf32>
      %cst_4 = arith.constant 1.000000e+00 : f32
      %17 = vector.broadcast %cst_4 : f32 to vector<256x1xf32>
      %18 = arith.select %16, %14, %17 : vector<256x1xi1>, vector<256x1xf32>
      %c0_5 = arith.constant 0 : index
      %c0_6 = arith.constant 0 : index
      %19 = vector.load %arg10[%c0_5, %c0_6] : memref<256x128xf32, #tpu.memory_space<vmem>>, vector<256x128xf32>
      %20 = vector.broadcast %18 : vector<256x1xf32> to vector<256x128xf32>
      %21 = arith.divf %19, %20 : vector<256x128xf32>
      %c0_7 = arith.constant 0 : index
      %c0_8 = arith.constant 0 : index
      %22 = vector.load %arg7[%c0_7, %c0_8] : memref<256x128xf32, #tpu.memory_space<vmem>>, vector<256x128xf32>
      tpu.vector_store %arg7[%c0_7, %c0_8], %21 {strides = array<i32>} : memref<256x128xf32, #tpu.memory_space<vmem>>, vector<256x128xf32>,
    } else {
    }
    return
  }
  func.func @transform_0(%arg0: i32, %arg1: i32, %arg2: memref<2xi32, #tpu.memory_space<smem>>, %arg3: memref<2xi32, #tpu.memory_space<smem>>) -> (i32, i32) {
    %0 = arith.index_cast %arg0 : i32 to index
    %1 = memref.load %arg2[%0] : memref<2xi32, #tpu.memory_space<smem>>
    %2 = arith.addi %1, %arg1 : i32
    %3 = arith.index_cast %arg0 : i32 to index
    %4 = memref.load %arg3[%3] : memref<2xi32, #tpu.memory_space<smem>>
    %5 = arith.minsi %2, %4 : i32
    %c0_i32 = arith.constant 0 : i32
    %c0_i32_0 = arith.constant 0 : i32
    return %c0_i32, %5 : i32, i32
  }
  func.func @transform_1(%arg0: i32, %arg1: i32, %arg2: memref<2xi32, #tpu.memory_space<smem>>, %arg3: memref<2xi32, #tpu.memory_space<smem>>) -> (i32, i32) {
    %0 = arith.index_cast %arg0 : i32 to index
    %1 = memref.load %arg2[%0] : memref<2xi32, #tpu.memory_space<smem>>
    %2 = arith.addi %1, %arg1 : i32
    %3 = arith.index_cast %arg0 : i32 to index
    %4 = memref.load %arg3[%3] : memref<2xi32, #tpu.memory_space<smem>>
    %5 = arith.minsi %2, %4 : i32
    %c0_i32 = arith.constant 0 : i32
    %c0_i32_0 = arith.constant 0 : i32
    return %5, %c0_i32 : i32, i32
  }
  func.func @transform_2(%arg0: i32, %arg1: i32, %arg2: memref<2xi32, #tpu.memory_space<smem>>, %arg3: memref<2xi32, #tpu.memory_space<smem>>) -> (i32, i32) {
    %c0_i32 = arith.constant 0 : i32
    %c0_i32_0 = arith.constant 0 : i32
    return %arg0, %c0_i32 : i32, i32
  }
  func.func @transform_3(%arg0: i32, %arg1: i32, %arg2: memref<2xi32, #tpu.memory_space<smem>>, %arg3: memref<2xi32, #tpu.memory_space<smem>>) -> (i32, i32) {
    %c0_i32 = arith.constant 0 : i32
    %c0_i32_0 = arith.constant 0 : i32
    return %arg0, %c0_i32 : i32, i32
  }
}

</mosaic_0001>

<bundles_post_ra>
// kernel: tpu_custom_call.1
= control target key start
LH: loop header
LB: loop body
LE: loop exit
PB: predicated region body
PF: predicated region fallthrough
CT: control target
= control target key end

     0   :  { %s8238_s0 = inlined_call_operand.vmem [shape: s32[2], index: 0, kind: input, shape index: {}]   ;;  %s8239_s2 = inlined_call_operand.vmem [shape: f32[1,1024], index: 2, kind: input, shape index: {}]   ;;  %s8240_s3 = inlined_call_operand.vmem [shape: bf16[1024,128], index: 3, kind: input, shape index: {}]   ;;  %s8241_s4 = inlined_call_operand.vmem [shape: s32[512,2], index: 4, kind: input, shape index: {}]   ;;  %s8242_s5 = inlined_call_operand.hbm [shape: f32[512,128], index: 5, kind: output, shape index: {}]   ;;  %s8243_s1 = inlined_call_operand.vmem [shape: s32[2], index: 1, kind: input, shape index: {}]  }
   0x1   :  { %s10_s20 = sshll.u32 %s8238_s0, 4  ;;  %s14_s23 = sshll.u32 %s8243_s1, 4  ;;  %s11_s20 = int_to_ptr.vmem [resolvable:$true] %s10_s20  ;;  %s15_s23 = int_to_ptr.vmem [resolvable:$true] %s14_s23 }
   0x2   :  { %s4605_s24 = scalar_lea.vmem %s11_s20, 16  ;;  %p4610_p1 = scmp.lt.s32.totalorder %s11_s20, %s11_s20 }
   0x3   :  { %p4606_p0 = scmp.ne.s32.totalorder %s11_s20, %s4605_s24  ;;  %p4611_p2 = scmp.lt.s32.totalorder %s4605_s24, %s4605_s24 }
   0x5   :  { %p4612_p3 = por %p4611_p2, %p4610_p1 }
   0x7   :  { %p4613_p4 = pnand %p4612_p3, %p4606_p0 }
   0x9   :  { %4616 = shalt.err (!%p4613_p4)  }
   0xa   :  { %s4727_s25 = smov [#allocation6]   ;;  %s4617_s26 = scalar_lea.vmem %s15_s23, 16 }
   0xb   :  { %13 = dma.vmem_to_smem %s11_s20, 16, %s4727_s25, [#allocation5] }
   0xc   :  { %p4618_p5 = scmp.ne.s32.totalorder %s15_s23, %s4617_s26  ;;  %p4622_p6 = scmp.lt.s32.totalorder %s15_s23, %s15_s23 }
   0xd   :  { %p4623_p7 = scmp.lt.s32.totalorder %s4617_s26, %s4617_s26 }
   0xf   :  { %p4624_p8 = por %p4623_p7, %p4622_p6 }
  0x11   :  { %p4625_p9 = pnand %p4624_p8, %p4618_p5 }
  0x13   :  { %4628 = shalt.err (!%p4625_p9)  }
  0x14   :  { %s4728_s0 = smov [#allocation7]  }
  0x15   :  { %17 = dma.vmem_to_smem %s15_s23, 16, %s4728_s0, [#allocation5] }
  0x16   :  { %4689 = dma.done.wait [#allocation5], 32 }
  0x17   :  { %4690 = vsyncadd [#allocation5], 4294967264 }
  0x18   :  { %19 = sfence }
  0x19   :  { %20 = vsyncpa [#allocation9], 0 }
  0x1a   :  { %22 = vsyncpa [#allocation9 + $0x1], 0  ;;  %s4773_s1 = smov 0   ;;  %s4775_s27 = smov 0  }
  0x1b   :  { %s4777_s28 = smov 0   ;;  %s4779_s29 = smov 0  }
  0x1c   :  { %s4781_s30 = smov 0   ;;  %s4783_s6 = smov 0  }
  0x1d   :  { %s4785_s7 = smov 0   ;;  %s4787_s8 = smov 0  }
  0x1e LB: > { %s3824_s9 = sadd.s32 4294967295, %s4725_s8   ;;  %s3825_s10 = sadd.s32 4294967294, %s4725_s8   ;;  %s4725_s8 = sphi %s4787_s8, %s28_s8   ;;  %s4721_s7 = sphi %s4785_s7, %s9122_s7   ;;  %s4717_s6 = sphi %s4783_s6, %s9121_s6   ;;  %s4713_s30 = sphi %s4781_s30, %s9120_s30   ;;  %s4709_s29 = sphi %s4779_s29, %s9119_s29   ;;  %s4705_s28 = sphi %s4777_s28, %s9118_s28   ;;  %s4701_s27 = sphi %s4775_s27, %s9117_s27   ;;  %s4697_s1 = sphi %s4773_s1, %s9116_s1  }
  0x1f   : > { %s37_s11 = sadd.s32 1, %s4717_s6  ;;  %s40_s12 = sadd.s32 1, %s4721_s7 }
  0x20   : > { %p38_p10 = scmp.ge.s32.totalorder %s37_s11, 2  ;;  %p155_p11 = scmp.ne.s32.totalorder %s4705_s28, %s4701_s27 }
  0x21   : > { %p156_p12 = scmp.eq.s32.totalorder %s3824_s9, 3  ;;  %p161_p0 = scmp.ne.s32.totalorder %s4701_s27, %s4697_s1 }
  0x22   : > { %s9124_s11 = smov (%p38_p10, %s37_s11), 0  ;;  %s9126_s12 = smov (!%p38_p10, %s40_s12), %s4721_s7 }
  0x23   : > { %8435 = sst [smem:[#allocation12_spill]] %s9124_s11  ;;  %p4822_p13 = por %p156_p12, %p155_p11 }
  0x24   : > { %p42_p1 = scmp.ge.s32.totalorder %s9126_s12, 2  ;;  %p162_p2 = scmp.eq.s32.totalorder %s3825_s10, 3 }
  0x25   : > { %p3828_p3 = scmp.ge.s32.totalorder %s4725_s8, 1  ;;  %p226_p4 = scmp.lt.s32.totalorder %s4725_s8, 5 }
  0x26   : > { %s9128_s12 = smov (%p42_p1, %s9126_s12), 0  ;;  %p4832_p5 = por %p162_p2, %p161_p0 }
  0x27   : > { %8437 = sst [smem:[#allocation13_spill]] %s9128_s12  ;;  %p227_p6 = pnand %p3828_p3, %p226_p4 }
  0x28   : > { %s142_s15 = ssub.s32 %s4721_s7, %s9128_s12  ;;  %s145_s16 = sadd.s32 1, %s4705_s28 }
  0x29   : > { %p143_p7 = scmp.eq.s32.totalorder %s142_s15, 0  ;;  %230 = sbr.rel (%p227_p6) target bundleno = 1511 (0x5e7), region = 32 }
  0x2a   : > { %s8244_s18 = sand.u32 (!%p227_p6), 1, %s4701_s27   ;;  %s269_s19 = sld [smem:[#allocation6 + %s4713_s30]] (!%p227_p6) }
  0x2b   : > { %s4840_s17 = scalar_select %p143_p7, %s4705_s28, %s145_s16  }
  0x2c   : > { %s3829_s20 = sshll.u32 (!%p227_p6), %s8244_s18, 8  ;;  %s271_s21 = sld [smem:[#allocation7 + %s4713_s30]] (!%p227_p6) }
  0x2d   : > { %s284_s22 = sld [smem:[#allocation6 + %s4713_s30]] (!%p227_p6)  ;;  %s3833_s26 = sshll.u32 (!%p227_p6), %s4713_s30, 5 }
  0x2e   : > { %s286_s23 = sld [smem:[#allocation7 + %s4713_s30]] (!%p227_p6)  ;;  %p301_p11 = scmp.lt.s32.totalorder (!%p227_p6), %s3833_s26, 63 }
  0x2f   : > { %p3835_p0 = scmp.ne.s32.totalorder (!%p227_p6), %s4709_s29, 0 }
  0x30   : > { %s270_s24 = sadd.s32 %s4709_s29, %s269_s19  ;;  %s9136_s26 = smov (!%p301_p11, %s3833_s26), 63  ;;  %vm312_vm0 = vcmask (!%p3835_p0), 7168   ;;  %v4729_v0 = vmov (!%p3835_p0), -1e+30   ;;  %v4730_v1 = vmov (!%p3835_p0), 0.0  }
  0x31   : > { %s3834_s19 = sshll.u32 %s9136_s26, 3  ;;  %313 = vst.msk [vmem:[#allocation2] sm:$0xff] (!%p3835_p0), %vm312_vm0, %v4729_v0  ;;  %314 = vst.msk [vmem:[#allocation2 + $0x8] sm:$0xff] (!%p3835_p0), %vm312_vm0, %v4729_v0 }
  0x32   : > { %p272_p8 = scmp.lt.s32.totalorder %s270_s24, %s271_s21  ;;  %315 = vst.msk [vmem:[#allocation2 + $0x10] sm:$0xff] (!%p3835_p0), %vm312_vm0, %v4729_v0  ;;  %316 = vst.msk [vmem:[#allocation2 + $0x18] sm:$0xff] (!%p3835_p0), %vm312_vm0, %v4729_v0 }
  0x33   : > { %s285_s25 = sadd.s32 %s4709_s29, %s284_s22  ;;  %317 = vst.msk [vmem:[#allocation2 + $0x20] sm:$0xff] (!%p3835_p0), %vm312_vm0, %v4729_v0  ;;  %318 = vst.msk [vmem:[#allocation2 + $0x28] sm:$0xff] (!%p3835_p0), %vm312_vm0, %v4729_v0 }
  0x34   : > { %s9130_s24 = smov (!%p272_p8, %s270_s24), %s271_s21  ;;  %p287_p9 = scmp.lt.s32.totalorder %s285_s25, %s286_s23  ;;  %319 = vst.msk [vmem:[#allocation2 + $0x30] sm:$0xff] (!%p3835_p0), %vm312_vm0, %v4729_v0  ;;  %320 = vst.msk [vmem:[#allocation2 + $0x38] sm:$0xff] (!%p3835_p0), %vm312_vm0, %v4729_v0 }
  0x35   : > { %s3830_s0 = sshll.u32 %s9130_s24, 2  ;;  %s4861_s24 = scalar_lea.vmem %s8241_s4, %s3834_s19  ;;  %321 = vst.msk [vmem:[#allocation2 + $0x40] sm:$0xff] (!%p3835_p0), %vm312_vm0, %v4729_v0  ;;  %322 = vst.msk [vmem:[#allocation2 + $0x48] sm:$0xff] (!%p3835_p0), %vm312_vm0, %v4729_v0 }
  0x36   : > { %p275_p10 = scmp.lt.s32.totalorder %s3830_s0, 7  ;;  %s9132_s25 = smov (!%p287_p9, %s285_s25), %s286_s23  ;;  %323 = vst.msk [vmem:[#allocation2 + $0x50] sm:$0xff] (!%p3835_p0), %vm312_vm0, %v4729_v0  ;;  %324 = vst.msk [vmem:[#allocation2 + $0x58] sm:$0xff] (!%p3835_p0), %vm312_vm0, %v4729_v0 }
  0x37   : > { %s3831_s9 = sshll.u32 %s9132_s25, 6  ;;  %s4868_s25 = scalar_lea.vmem [#allocation8], %s3829_s20  ;;  %325 = vst.msk [vmem:[#allocation2 + $0x60] sm:$0xff] (!%p3835_p0), %vm312_vm0, %v4729_v0  ;;  %326 = vst.msk [vmem:[#allocation2 + $0x68] sm:$0xff] (!%p3835_p0), %vm312_vm0, %v4729_v0 }
  0x38   : > { %s9134_s0 = smov (!%p275_p10, %s3830_s0), 7  ;;  %p290_p12 = scmp.lt.s32.totalorder %s3831_s9, 127  ;;  %327 = vst.msk [vmem:[#allocation2 + $0x70] sm:$0xff] (!%p3835_p0), %vm312_vm0, %v4729_v0  ;;  %328 = vst.msk [vmem:[#allocation2 + $0x78] sm:$0xff] (!%p3835_p0), %vm312_vm0, %v4729_v0 }
  0x39   : > { %s277_s16 = scalar_lea.vmem %s8239_s2, %s9134_s0  ;;  %311 = sbr.rel (%p3835_p0) target bundleno = 97 (0x61), region = 36  ;;  %329 = vst.msk [vmem:[#allocation2 + $0x80] sm:$0xff] (!%p3835_p0), %vm312_vm0, %v4729_v0  ;;  %330 = vst.msk [vmem:[#allocation2 + $0x88] sm:$0xff] (!%p3835_p0), %vm312_vm0, %v4729_v0 }
  0x3a   : > { %s9138_s9 = smov (!%p290_p12, %s3831_s9), 127  ;;  %331 = vst.msk [vmem:[#allocation2 + $0x90] sm:$0xff] (!%p3835_p0), %vm312_vm0, %v4729_v0  ;;  %332 = vst.msk [vmem:[#allocation2 + $0x98] sm:$0xff] (!%p3835_p0), %vm312_vm0, %v4729_v0 }
  0x3b   : > { %s3832_s22 = sshll.u32 %s9138_s9, 2  ;;  %333 = vst.msk [vmem:[#allocation2 + $0xa0] sm:$0xff] (!%p3835_p0), %vm312_vm0, %v4729_v0  ;;  %334 = vst.msk [vmem:[#allocation2 + $0xa8] sm:$0xff] (!%p3835_p0), %vm312_vm0, %v4729_v0 }
  0x3c   : > { %s4866_s11 = scalar_lea.vmem %s8240_s3, %s3832_s22  ;;  %335 = vst.msk [vmem:[#allocation2 + $0xb0] sm:$0xff] (!%p3835_p0), %vm312_vm0, %v4729_v0  ;;  %336 = vst.msk [vmem:[#allocation2 + $0xb8] sm:$0xff] (!%p3835_p0), %vm312_vm0, %v4729_v0 }
  0x3d   : > { %337 = vst.msk [vmem:[#allocation2 + $0xc0] sm:$0xff] (!%p3835_p0), %vm312_vm0, %v4729_v0  ;;  %338 = vst.msk [vmem:[#allocation2 + $0xc8] sm:$0xff] (!%p3835_p0), %vm312_vm0, %v4729_v0 }
  0x3e   : > { %339 = vst.msk [vmem:[#allocation2 + $0xd0] sm:$0xff] (!%p3835_p0), %vm312_vm0, %v4729_v0  ;;  %340 = vst.msk [vmem:[#allocation2 + $0xd8] sm:$0xff] (!%p3835_p0), %vm312_vm0, %v4729_v0 }
  0x3f   : > { %341 = vst.msk [vmem:[#allocation2 + $0xe0] sm:$0xff] (!%p3835_p0), %vm312_vm0, %v4729_v0  ;;  %342 = vst.msk [vmem:[#allocation2 + $0xe8] sm:$0xff] (!%p3835_p0), %vm312_vm0, %v4729_v0 }
  0x40   : > { %343 = vst.msk [vmem:[#allocation2 + $0xf0] sm:$0xff] %vm312_vm0, %v4729_v0  ;;  %344 = vst.msk [vmem:[#allocation2 + $0xf8] sm:$0xff] %vm312_vm0, %v4729_v0 }
  0x41   : > { %345 = vst.msk [vmem:[#allocation3] sm:$0xff] %vm312_vm0, %v4730_v1  ;;  %346 = vst.msk [vmem:[#allocation3 + $0x8] sm:$0xff] %vm312_vm0, %v4730_v1 }
  0x42   : > { %347 = vst.msk [vmem:[#allocation3 + $0x10] sm:$0xff] %vm312_vm0, %v4730_v1  ;;  %348 = vst.msk [vmem:[#allocation3 + $0x18] sm:$0xff] %vm312_vm0, %v4730_v1 }
  0x43   : > { %349 = vst.msk [vmem:[#allocation3 + $0x20] sm:$0xff] %vm312_vm0, %v4730_v1  ;;  %350 = vst.msk [vmem:[#allocation3 + $0x28] sm:$0xff] %vm312_vm0, %v4730_v1 }
  0x44   : > { %351 = vst.msk [vmem:[#allocation3 + $0x30] sm:$0xff] %vm312_vm0, %v4730_v1  ;;  %352 = vst.msk [vmem:[#allocation3 + $0x38] sm:$0xff] %vm312_vm0, %v4730_v1 }
  0x45   : > { %353 = vst.msk [vmem:[#allocation3 + $0x40] sm:$0xff] %vm312_vm0, %v4730_v1  ;;  %354 = vst.msk [vmem:[#allocation3 + $0x48] sm:$0xff] %vm312_vm0, %v4730_v1 }
  0x46   : > { %355 = vst.msk [vmem:[#allocation3 + $0x50] sm:$0xff] %vm312_vm0, %v4730_v1  ;;  %356 = vst.msk [vmem:[#allocation3 + $0x58] sm:$0xff] %vm312_vm0, %v4730_v1 }
  0x47   : > { %357 = vst.msk [vmem:[#allocation3 + $0x60] sm:$0xff] %vm312_vm0, %v4730_v1  ;;  %358 = vst.msk [vmem:[#allocation3 + $0x68] sm:$0xff] %vm312_vm0, %v4730_v1 }
  0x48   : > { %359 = vst.msk [vmem:[#allocation3 + $0x70] sm:$0xff] %vm312_vm0, %v4730_v1  ;;  %360 = vst.msk [vmem:[#allocation3 + $0x78] sm:$0xff] %vm312_vm0, %v4730_v1 }
  0x49   : > { %361 = vst.msk [vmem:[#allocation3 + $0x80] sm:$0xff] %vm312_vm0, %v4730_v1  ;;  %362 = vst.msk [vmem:[#allocation3 + $0x88] sm:$0xff] %vm312_vm0, %v4730_v1 }
  0x4a   : > { %363 = vst.msk [vmem:[#allocation3 + $0x90] sm:$0xff] %vm312_vm0, %v4730_v1  ;;  %364 = vst.msk [vmem:[#allocation3 + $0x98] sm:$0xff] %vm312_vm0, %v4730_v1 }
  0x4b   : > { %365 = vst.msk [vmem:[#allocation3 + $0xa0] sm:$0xff] %vm312_vm0, %v4730_v1  ;;  %366 = vst.msk [vmem:[#allocation3 + $0xa8] sm:$0xff] %vm312_vm0, %v4730_v1 }
  0x4c   : > { %367 = vst.msk [vmem:[#allocation3 + $0xb0] sm:$0xff] %vm312_vm0, %v4730_v1  ;;  %368 = vst.msk [vmem:[#allocation3 + $0xb8] sm:$0xff] %vm312_vm0, %v4730_v1 }
  0x4d   : > { %369 = vst.msk [vmem:[#allocation3 + $0xc0] sm:$0xff] %vm312_vm0, %v4730_v1  ;;  %370 = vst.msk [vmem:[#allocation3 + $0xc8] sm:$0xff] %vm312_vm0, %v4730_v1 }
  0x4e   : > { %371 = vst.msk [vmem:[#allocation3 + $0xd0] sm:$0xff] %vm312_vm0, %v4730_v1  ;;  %372 = vst.msk [vmem:[#allocation3 + $0xd8] sm:$0xff] %vm312_vm0, %v4730_v1 }
  0x4f   : > { %373 = vst.msk [vmem:[#allocation3 + $0xe0] sm:$0xff] %vm312_vm0, %v4730_v1  ;;  %374 = vst.msk [vmem:[#allocation3 + $0xe8] sm:$0xff] %vm312_vm0, %v4730_v1 }
  0x50   : > { %375 = vst.msk [vmem:[#allocation3 + $0xf0] sm:$0xff] %vm312_vm0, %v4730_v1  ;;  %376 = vst.msk [vmem:[#allocation3 + $0xf8] sm:$0xff] %vm312_vm0, %v4730_v1 }
  0x51   : > { %377 = vst [vmem:[#allocation4] sm:$0xff] %v4730_v1  ;;  %378 = vst [vmem:[#allocation4 + $0x8] sm:$0xff] %v4730_v1 }
  0x52   : > { %379 = vst [vmem:[#allocation4 + $0x10] sm:$0xff] %v4730_v1  ;;  %380 = vst [vmem:[#allocation4 + $0x18] sm:$0xff] %v4730_v1 }
  0x53   : > { %381 = vst [vmem:[#allocation4 + $0x20] sm:$0xff] %v4730_v1  ;;  %382 = vst [vmem:[#allocation4 + $0x28] sm:$0xff] %v4730_v1 }
  0x54   : > { %383 = vst [vmem:[#allocation4 + $0x30] sm:$0xff] %v4730_v1  ;;  %384 = vst [vmem:[#allocation4 + $0x38] sm:$0xff] %v4730_v1 }
  0x55   : > { %385 = vst [vmem:[#allocation4 + $0x40] sm:$0xff] %v4730_v1  ;;  %386 = vst [vmem:[#allocation4 + $0x48] sm:$0xff] %v4730_v1 }
  0x56   : > { %387 = vst [vmem:[#allocation4 + $0x50] sm:$0xff] %v4730_v1  ;;  %388 = vst [vmem:[#allocation4 + $0x58] sm:$0xff] %v4730_v1 }
  0x57   : > { %389 = vst [vmem:[#allocation4 + $0x60] sm:$0xff] %v4730_v1  ;;  %390 = vst [vmem:[#allocation4 + $0x68] sm:$0xff] %v4730_v1 }
  0x58   : > { %391 = vst [vmem:[#allocation4 + $0x70] sm:$0xff] %v4730_v1  ;;  %392 = vst [vmem:[#allocation4 + $0x78] sm:$0xff] %v4730_v1 }
  0x59   : > { %393 = vst [vmem:[#allocation4 + $0x80] sm:$0xff] %v4730_v1  ;;  %394 = vst [vmem:[#allocation4 + $0x88] sm:$0xff] %v4730_v1 }
  0x5a   : > { %395 = vst [vmem:[#allocation4 + $0x90] sm:$0xff] %v4730_v1  ;;  %396 = vst [vmem:[#allocation4 + $0x98] sm:$0xff] %v4730_v1 }
  0x5b   : > { %397 = vst [vmem:[#allocation4 + $0xa0] sm:$0xff] %v4730_v1  ;;  %398 = vst [vmem:[#allocation4 + $0xa8] sm:$0xff] %v4730_v1 }
  0x5c   : > { %399 = vst [vmem:[#allocation4 + $0xb0] sm:$0xff] %v4730_v1  ;;  %400 = vst [vmem:[#allocation4 + $0xb8] sm:$0xff] %v4730_v1 }
  0x5d   : > { %401 = vst [vmem:[#allocation4 + $0xc0] sm:$0xff] %v4730_v1  ;;  %402 = vst [vmem:[#allocation4 + $0xc8] sm:$0xff] %v4730_v1 }
  0x5e   : > { %403 = vst [vmem:[#allocation4 + $0xd0] sm:$0xff] %v4730_v1  ;;  %404 = vst [vmem:[#allocation4 + $0xd8] sm:$0xff] %v4730_v1 }
  0x5f   : > { %405 = vst [vmem:[#allocation4 + $0xe0] sm:$0xff] %v4730_v1  ;;  %406 = vst [vmem:[#allocation4 + $0xe8] sm:$0xff] %v4730_v1 }
  0x60   : > { %407 = vst [vmem:[#allocation4 + $0xf0] sm:$0xff] %v4730_v1  ;;  %408 = vst [vmem:[#allocation4 + $0xf8] sm:$0xff] %v4730_v1 }
  0x61 PF: > { %s409_s12 = sld [smem:[#allocation6 + %s4713_s30]] }
  0x62   : > { %s411_s18 = sld [smem:[#allocation7 + %s4713_s30]] }
  0x67   : > { %s410_s20 = sadd.s32 %s4709_s29, %s409_s12 }
  0x68   : > { %p3836_p1 = scmp.gt.s32.totalorder %s410_s20, %s411_s18 }
  0x6a   : > { %415 = sbr.rel (%p3836_p1) target bundleno = 1278 (0x4fe), region = 40 }
  0x71   : > { %s3837_s26 = sshll.u32 %s410_s20, 9  ;;  %v484_v2 = vld [vmem:[%s4861_s24 + $0x10] sm:$0xff]  ;;  %v482_v3 = vld [vmem:[%s4861_s24] sm:$0xff]  ;;  %v8246_v4 = vmov 0   ;;  %v485_v6 = vld [vmem:[%s4861_s24 + $0x18] sm:$0xff]  ;;  %v4732_v31 = vmov 1   ;;  %v547_v57 = vlaneseq }
  0x72   : > { %4182 = vset.pattern.permute.xlu1 %v8246_v4  ;;  %4181 = vset.pattern.permute.xlu0 %v8246_v4  ;;  %v5006_v5 = vstv %s3837_s26  ;;  %v483_v7 = vld [vmem:[%s4861_s24 + $0x8] sm:$0xff]  ;;  %v486_v13 = vld [vmem:[%s4861_s24 + $0x20] sm:$0xff]  ;;  %v489_v14 = vld [vmem:[%s4861_s24 + $0x38] sm:$0xff] }
  0x73   : > { %v5011_v8 = vsub.s32 %v484_v2, %v5006_v5  ;;  %v515_v9 = vsub.s32 %v482_v3, %v5006_v5  ;;  %v518_v10 = vsub.s32 %v485_v6, %v5006_v5  ;;  %v5017_v11 = vsub.s32 %v483_v7, %v5006_v5  ;;  %v487_v12 = vld [vmem:[%s4861_s24 + $0x28] sm:$0xff]  ;;  %v488_v17 = vld [vmem:[%s4861_s24 + $0x30] sm:$0xff]  ;;  %v490_v19 = vld [vmem:[%s4861_s24 + $0x40] sm:$0xff] }
  0x74   : > { %v520_v15 = vsub.s32 %v487_v12, %v5006_v5  ;;  %v519_v16 = vsub.s32 %v486_v13, %v5006_v5  ;;  %v491_v18 = vld [vmem:[%s4861_s24 + $0x48] sm:$0xff]  ;;  %v522_v20 = vsub.s32 %v489_v14, %v5006_v5  ;;  %v521_v21 = vsub.s32 %v488_v17, %v5006_v5  ;;  %v493_v22 = vld [vmem:[%s4861_s24 + $0x58] sm:$0xff]  ;;  %v492_v23 = vld [vmem:[%s4861_s24 + $0x50] sm:$0xff] }
  0x75   : > { %559 = vperm.xlu1 %4182, %v5011_v8   ;;  %553 = vperm.xlu0 %4181, %v515_v9   ;;  %v524_v24 = vsub.s32 %v491_v18, %v5006_v5  ;;  %v523_v25 = vsub.s32 %v490_v19, %v5006_v5  ;;  %v495_v26 = vld [vmem:[%s4861_s24 + $0x68] sm:$0xff]  ;;  %v526_v27 = vsub.s32 %v493_v22, %v5006_v5  ;;  %v497_v29 = vld [vmem:[%s4861_s24 + $0x78] sm:$0xff]  ;;  %v1130_v60 = vshrl.u32 %v547_v57, 7  ;;  %v481_v1 = vld [vmem:[%s277_s16] sm:$0xf] }
  0x76   : > { %v525_v28 = vsub.s32 %v492_v23, %v5006_v5  ;;  %v5039_v30 = vsub.s32 %v495_v26, %v5006_v5  ;;  %v5043_v32 = vsub.s32 %v497_v29, %v5006_v5  ;;  %v499_v33 = vld [vmem:[%s4861_s24 + $0x88] sm:$0xff]  ;;  %v501_v35 = vld [vmem:[%s4861_s24 + $0x98] sm:$0xff]  ;;  %v5106_v61 = vand.u32 127, %v547_v57 }
  0x77   : > { %v5048_v34 = vsub.s32 %v499_v33, %v5006_v5  ;;  %v5053_v36 = vsub.s32 %v501_v35, %v5006_v5  ;;  %v503_v37 = vld [vmem:[%s4861_s24 + $0xa8] sm:$0xff]  ;;  %v505_v39 = vld [vmem:[%s4861_s24 + $0xb8] sm:$0xff]  ;;  %v1131_v0 = vsub.s32 0, %v1130_v60  ;;  %v1135_v3 = vsub.s32 1, %v1130_v60 }
  0x78   : > { %v5058_v38 = vsub.s32 %v503_v37, %v5006_v5  ;;  %v5063_v40 = vsub.s32 %v505_v39, %v5006_v5  ;;  %v507_v41 = vld [vmem:[%s4861_s24 + $0xc8] sm:$0xff]  ;;  %v509_v43 = vld [vmem:[%s4861_s24 + $0xd8] sm:$0xff]  ;;  %v5118_v2 = vadd.s32 128, %v5106_v61  ;;  %v5123_v7 = vadd.s32 256, %v5106_v61 }
  0x79   : > { %562 = vperm.xlu1 %4182, %v518_v10   ;;  %556 = vperm.xlu0 %4181, %v5017_v11   ;;  %v5068_v42 = vsub.s32 %v507_v41, %v5006_v5  ;;  %v5073_v44 = vsub.s32 %v509_v43, %v5006_v5  ;;  %v511_v45 = vld [vmem:[%s4861_s24 + $0xe8] sm:$0xff]  ;;  %v513_v47 = vld [vmem:[%s4861_s24 + $0xf8] sm:$0xff]  ;;  %v1143_v12 = vsub.s32 3, %v1130_v60  ;;  %v5138_v13 = vrot.slane %v481_v1, %v1135_v3 }
  0x7a   : > { %v5078_v46 = vsub.s32 %v511_v45, %v5006_v5  ;;  %v5083_v48 = vsub.s32 %v513_v47, %v5006_v5 }
  0x7b   : > { %v5147_v17 = vrot.slane %v481_v1, %v1143_v12 }
  0x7d   : > { %568 = vperm.xlu1 %4182, %v520_v15   ;;  %565 = vperm.xlu0 %4181, %v519_v16  }
  0x81   : > { %574 = vperm.xlu1 %4182, %v522_v20   ;;  %571 = vperm.xlu0 %4181, %v521_v21  }
  0x85   : > { %580 = vperm.xlu1 %4182, %v524_v24   ;;  %577 = vperm.xlu0 %4181, %v523_v25  }
  0x89   : > { %586 = vperm.xlu1 %4182, %v526_v27   ;;  %583 = vperm.xlu0 %4181, %v525_v28  }
  0x8d   : > { %592 = vperm.xlu1 %4182, %v5039_v30   ;;  %4183 = vset.pattern.permute.xlu0 %v4732_v31 }
  0x8e   : > { %777 = vperm.xlu0 %4183, %v515_v9  }
  0x91   : > { %598 = vperm.xlu1 %4182, %v5043_v32  }
  0x92   : > { %786 = vperm.xlu0 %4183, %v518_v10   ;;  %v5127_v10 = vadd.s32 384, %v5106_v61 }
  0x95   : > { %604 = vperm.xlu1 %4182, %v5048_v34  }
  0x96   : > { %792 = vperm.xlu0 %4183, %v520_v15  }
  0x99   : > { %610 = vperm.xlu1 %4182, %v5053_v36  }
  0x9a   : > { %798 = vperm.xlu0 %4183, %v522_v20  }
  0x9d   : > { %616 = vperm.xlu1 %4182, %v5058_v38  }
  0x9e   : > { %804 = vperm.xlu0 %4183, %v524_v24  }
  0xa1   : > { %622 = vperm.xlu1 %4182, %v5063_v40  }
  0xa2   : > { %810 = vperm.xlu0 %4183, %v526_v27  }
  0xa5   : > { %628 = vperm.xlu1 %4182, %v5068_v42  }
  0xa9   : > { %634 = vperm.xlu1 %4182, %v5073_v44  }
  0xad   : > { %640 = vperm.xlu1 %4182, %v5078_v46  }
  0xb1   : > { %646 = vperm.xlu1 %4182, %v5083_v48  }
  0xb5   : > { %4184 = vset.pattern.permute.xlu1 %v4732_v31 }
  0xb6   : > { %780 = vperm.xlu1 %4184, %v5017_v11   ;;  %v5130_v11 = vrot.slane %v481_v1, %v1131_v0 }
  0xba   : > { %783 = vperm.xlu1 %4184, %v5011_v8   ;;  %v1139_v8 = vsub.s32 2, %v1130_v60 }
  0xbc   : > { %v5142_v15 = vrot.slane %v481_v1, %v1139_v8  ;;  %v8463_v8 = vmov 0 }
  0xbe   : > { %789 = vperm.xlu1 %4184, %v519_v16  }
  0xc2   : > { %795 = vperm.xlu1 %4184, %v521_v21  }
  0xc6   : > { %801 = vperm.xlu1 %4184, %v523_v25  }
  0xca   : > { %807 = vperm.xlu1 %4184, %v525_v28  }
  0xf4   : > { %v5088_v49 = vpop.permute.xlu1 %559  ;;  %v554_v50 = vpop.permute.xlu0 %553 }
  0xf5   : > { %vm648_vm1 = vcmp.ge.s32.totalorder %v5106_v61, %v554_v50  ;;  %vm649_vm2 = vcmp.ge.s32.totalorder %v5118_v2, %v554_v50  ;;  %vm650_vm3 = vcmp.ge.s32.totalorder %v5123_v7, %v554_v50  ;;  %vm651_vm7 = vcmp.ge.s32.totalorder %v5127_v10, %v554_v50 }
  0xf8   : > { %v5090_v51 = vpop.permute.xlu1 %562  ;;  %v5092_v52 = vpop.permute.xlu0 %556 }
  0xf9   : > { %vm660_vm15 = vcmp.ge.s32.totalorder %v5106_v61, %v5090_v51 }
  0xfc   : > { %v5094_v53 = vpop.permute.xlu1 %568  ;;  %v5096_v54 = vpop.permute.xlu0 %565 }
 0x100   : > { %v5098_v55 = vpop.permute.xlu1 %574  ;;  %v5100_v56 = vpop.permute.xlu0 %571 }
 0x104   : > { %v5102_v58 = vpop.permute.xlu1 %580  ;;  %v5104_v59 = vpop.permute.xlu0 %577 }
 0x108   : > { %v5108_v62 = vpop.permute.xlu1 %586  ;;  %v5110_v63 = vpop.permute.xlu0 %583 }
 0x10c   : > { %v5120_v6 = vpop.permute.xlu1 %592 }
 0x10d   : > { %v778_v9 = vpop.permute.xlu0 %777 }
 0x10e   : > { %vm872_vm4 = vcmp.lt.s32.totalorder %v5106_v61, %v778_v9  ;;  %vm873_vm5 = vcmp.lt.s32.totalorder %v5118_v2, %v778_v9  ;;  %vm874_vm6 = vcmp.lt.s32.totalorder %v5123_v7, %v778_v9  ;;  %vm875_vm8 = vcmp.lt.s32.totalorder %v5127_v10, %v778_v9 }
 0x10f   : > { %vm1000_vm9 = vmand %vm648_vm1, %vm872_vm4  ;;  %vm661_vm1 = vcmp.ge.s32.totalorder %v5118_v2, %v5090_v51  ;;  %vm662_vm4 = vcmp.ge.s32.totalorder %v5123_v7, %v5090_v51 }
 0x110   : > { %v5140_v14 = vpop.permute.xlu1 %598  ;;  %vm1001_vm10 = vmand %vm649_vm2, %vm873_vm5  ;;  %v5145_v16 = vsel %vm1000_vm9, %v5130_v11, -1e+30 }
 0x111   : > { %8439 = vst [vmem:[#allocation14_spill] sm:$0xff] %v5145_v16  ;;  %vm1002_vm11 = vmand %vm650_vm3, %vm874_vm6  ;;  %v5150_v18 = vsel %vm1001_vm10, %v5138_v13, -1e+30  ;;  %v787_v26 = vpop.permute.xlu0 %786 }
 0x112   : > { %8440 = vst [vmem:[#allocation15_spill] sm:$0xff] %v5150_v18  ;;  %vm1003_vm12 = vmand %vm651_vm7, %vm875_vm8  ;;  %v5153_v19 = vsel %vm1002_vm11, %v5142_v15, -1e+30  ;;  %v1309_v20 = vmax.f32 %v5145_v16, %v5150_v18  ;;  %vm884_vm13 = vcmp.lt.s32.totalorder %v5106_v61, %v787_v26  ;;  %vm885_vm14 = vcmp.lt.s32.totalorder %v5118_v2, %v787_v26 }
 0x113   : > { %8441 = vst [vmem:[#allocation16_spill] sm:$0xff] %v5153_v19  ;;  %v5158_v21 = vsel %vm1003_vm12, %v5147_v17, -1e+30  ;;  %vm886_vm0 = vcmp.lt.s32.totalorder %v5123_v7, %v787_v26  ;;  %vm887_vm2 = vcmp.lt.s32.totalorder %v5127_v10, %v787_v26  ;;  %vm5184_vm3 = vmand %vm660_vm15, %vm884_vm13  ;;  %vm663_vm7 = vcmp.ge.s32.totalorder %v5127_v10, %v5090_v51 }
 0x114   : > { %8442 = vst [vmem:[#allocation17_spill] sm:$0xff] %v5158_v21  ;;  %v5160_v22 = vpop.permute.xlu1 %604  ;;  %v1310_v23 = vmax.f32 %v1309_v20, %v5153_v19  ;;  %vm5190_vm5 = vmand %vm661_vm1, %vm885_vm14  ;;  %vm668_vm11 = vcmp.ge.s32.totalorder %v5106_v61, %v5094_v53  ;;  %vm669_vm13 = vcmp.ge.s32.totalorder %v5118_v2, %v5094_v53  ;;  %v5241_v0 = vsel %vm5184_vm3, %v5130_v11, -1e+30 }
 0x115   : > { %v793_v29 = vpop.permute.xlu0 %792  ;;  %vm5199_vm8 = vmand %vm662_vm4, %vm886_vm0  ;;  %vm670_vm0 = vcmp.ge.s32.totalorder %v5123_v7, %v5094_v53  ;;  %vm671_vm4 = vcmp.ge.s32.totalorder %v5127_v10, %v5094_v53  ;;  %8457 = vst [vmem:[#allocation18_spill] sm:$0xff] %v5241_v0  ;;  %v5246_v1 = vsel %vm5190_vm5, %v5138_v13, -1e+30  ;;  %vm678_vm5 = vcmp.ge.s32.totalorder %v5123_v7, %v5098_v55 }
 0x116   : > { %v1311_v24 = vmax.f32 %v1310_v23, %v5158_v21  ;;  %vm892_vm6 = vcmp.lt.s32.totalorder %v5106_v61, %v793_v29  ;;  %vm893_vm9 = vcmp.lt.s32.totalorder %v5118_v2, %v793_v29  ;;  %vm5204_vm10 = vmand %vm663_vm7, %vm887_vm2  ;;  %vm894_vm12 = vcmp.lt.s32.totalorder %v5123_v7, %v793_v29  ;;  %8458 = vst [vmem:[#allocation19_spill] sm:$0xff] %v5246_v1 }
 0x117   : > { %vm895_vm14 = vcmp.lt.s32.totalorder %v5127_v10, %v793_v29  ;;  %vm5216_vm15 = vmand %vm668_vm11, %vm892_vm6  ;;  %vm676_vm11 = vcmp.ge.s32.totalorder %v5106_v61, %v5098_v55  ;;  %v1324_v12 = vmax.f32 %v5241_v0, %v5246_v1  ;;  %v8470_v29 = vmov 0 }
 0x118   : > { %v5164_v25 = vpop.permute.xlu1 %610  ;;  %1312 = vmax.xlane.f32.xlu1 %v1311_v24  ;;  %vm5222_vm1 = vmand %vm669_vm13, %vm893_vm9  ;;  %v5296_v20 = vsel %vm5216_vm15, %v5130_v11, -1e+30  ;;  %v8468_v24 = vmov 0  ;;  %vm684_vm13 = vcmp.ge.s32.totalorder %v5106_v61, %v5102_v58  ;;  %v5350_v39 = vsel %vm5199_vm8, %v5142_v15, -1e+30 }
 0x119   : > { %v5173_v33 = vpop.permute.xlu0 %798  ;;  %vm5232_vm7 = vmand %vm670_vm0, %vm894_vm12  ;;  %8465 = vst [vmem:[#allocation20_spill] sm:$0xff] %v5296_v20  ;;  %v5301_v23 = vsel %vm5222_vm1, %v5138_v13, -1e+30  ;;  %vm685_vm1 = vcmp.ge.s32.totalorder %v5118_v2, %v5102_v58  ;;  %v5367_v43 = vsel %vm5204_vm10, %v5147_v17, -1e+30  ;;  %v5370_v4 = vmax.f32 %v1324_v12, %v5350_v39 }
 0x11a   : > { %vm900_vm2 = vcmp.lt.s32.totalorder %v5106_v61, %v5173_v33  ;;  %vm901_vm6 = vcmp.lt.s32.totalorder %v5118_v2, %v5173_v33  ;;  %vm5248_vm9 = vmand %vm671_vm4, %vm895_vm14  ;;  %vm677_vm14 = vcmp.ge.s32.totalorder %v5118_v2, %v5098_v55  ;;  %8466 = vst [vmem:[#allocation21_spill] sm:$0xff] %v5301_v23  ;;  %v1334_v50 = vmax.f32 %v5296_v20, %v5301_v23 }
 0x11b   : > { %vm5264_vm0 = vmand %vm676_vm11, %vm900_vm2  ;;  %8476 = vst [vmem:[#allocation22_spill] sm:$0xff] %v5350_v39  ;;  %v5391_v12 = vsel %vm5232_vm7, %v5142_v15, -1e+30  ;;  %v5396_v20 = vsel %vm5248_vm9, %v5147_v17, -1e+30  ;;  %vm8488_vm8 = vcmp.ge.s32.totalorder %v5106_v61, %v5088_v49 }
 0x11c   : > { %v5166_v27 = vpop.permute.xlu1 %616  ;;  %vm5281_vm2 = vmand %vm677_vm14, %vm901_vm6  ;;  %vm8467_vm6 = vcmp.lt.s32.totalorder %v5123_v7, %v5173_v33  ;;  %8478 = vst [vmem:[#allocation23_spill] sm:$0xff] %v5367_v43  ;;  %v5438_v21 = vmax.f32 %v1334_v50, %v5391_v12 }
 0x11d   : > { %v5211_v47 = vpop.permute.xlu0 %804  ;;  %v8464_v8 = vsel %vm5281_vm2, 4294967295, %v8463_v8  ;;  %vm5306_vm14 = vmand %vm678_vm5, %vm8467_vm6  ;;  %vm8475_vm6 = vcmp.ge.s32.totalorder %v5106_v61, %v5092_v52  ;;  %8480 = vst [vmem:[#allocation24_spill] sm:$0xff] %v5391_v12  ;;  %v5464_v12 = vsel %vm5264_vm0, %v5130_v11, -1e+30  ;;  %vm8511_vm0 = vcmp.ge.s32.totalorder %v5106_v61, %v5096_v54 }
 0x11e   : > { %vm908_vm4 = vcmp.lt.s32.totalorder %v5106_v61, %v5211_v47  ;;  %v8469_v24 = vsel %vm5306_vm14, 4294967295, %v8468_v24  ;;  %vm8472_vm12 = vcmp.lt.s32.totalorder %v5118_v2, %v5211_v47  ;;  %vm8477_vm14 = vcmp.ge.s32.totalorder %v5118_v2, %v5092_v52  ;;  %8481 = vst [vmem:[#allocation25_spill] sm:$0xff] %v5396_v20  ;;  %8494 = vst [vmem:[#allocation27_spill] sm:$0xff] %v5464_v12 }
 0x11f   : > { %vm5323_vm5 = vmand %vm684_vm13, %vm908_vm4 }
 0x120   : > { %v5168_v28 = vpop.permute.xlu1 %622  ;;  %v8471_v29 = vsel %vm5323_vm5, 4294967295, %v8470_v29  ;;  %vm5337_vm2 = vmand %vm685_vm1, %vm8472_vm12 }
 0x121   : > { %v5287_v9 = vpop.permute.xlu0 %810 }
 0x122   : > { %vm916_vm1 = vcmp.lt.s32.totalorder %v5106_v61, %v5287_v9 }
 0x124   : > { %v5170_v31 = vpop.permute.xlu1 %628 }
 0x128   : > { %v5175_v35 = vpop.permute.xlu1 %634 }
 0x12c   : > { %v5195_v41 = vpop.permute.xlu1 %640 }
 0x130   : > { %v5228_v57 = vpop.permute.xlu1 %646 }
 0x135   : > { %v781_v26 = vpop.permute.xlu1 %780 }
 0x136   : > { %vm876_vm15 = vcmp.lt.s32.totalorder %v5106_v61, %v781_v26  ;;  %vm877_vm3 = vcmp.lt.s32.totalorder %v5118_v2, %v781_v26  ;;  %vm878_vm11 = vcmp.lt.s32.totalorder %v5123_v7, %v781_v26  ;;  %vm879_vm4 = vcmp.lt.s32.totalorder %v5127_v10, %v781_v26 }
 0x137   : > { %vm1004_vm5 = vmand %vm8475_vm6, %vm876_vm15  ;;  %vm903_vm6 = vcmp.lt.s32.totalorder %v5127_v10, %v5173_v33 }
 0x138   : > { %vm1005_vm13 = vmand %vm8477_vm14, %vm877_vm3  ;;  %v5362_v51 = vsel %vm1004_vm5, %v5130_v11, -1e+30  ;;  %vm917_vm3 = vcmp.lt.s32.totalorder %v5118_v2, %v5287_v9  ;;  %vm8479_vm14 = vcmp.ge.s32.totalorder %v5123_v7, %v5092_v52 }
 0x139   : > { %v784_v23 = vpop.permute.xlu1 %783  ;;  %vm1006_vm10 = vmand %vm8479_vm14, %vm878_vm11  ;;  %v5384_v45 = vsel %vm1005_vm13, %v5138_v13, -1e+30  ;;  %vm8482_vm13 = vcmp.ge.s32.totalorder %v5127_v10, %v5092_v52  ;;  %vm910_vm11 = vcmp.lt.s32.totalorder %v5123_v7, %v5211_v47 }
 0x13a   : > { %vm5407_vm14 = vmand %vm8482_vm13, %vm879_vm4  ;;  %v1314_v3 = vmax.f32 %v5362_v51, %v5384_v45  ;;  %vm880_vm7 = vcmp.lt.s32.totalorder %v5106_v61, %v784_v23  ;;  %vm881_vm9 = vcmp.lt.s32.totalorder %v5118_v2, %v784_v23  ;;  %vm8485_vm4 = vcmp.ge.s32.totalorder %v5106_v61, %v5108_v62 }
 0x13b   : > { %vm5425_vm13 = vmand %vm8485_vm4, %vm916_vm1  ;;  %v5430_v26 = vsel %vm1006_vm10, %v5142_v15, -1e+30  ;;  %vm882_vm15 = vcmp.lt.s32.totalorder %v5123_v7, %v784_v23  ;;  %vm883_vm5 = vcmp.lt.s32.totalorder %v5127_v10, %v784_v23  ;;  %vm8489_vm10 = vcmp.ge.s32.totalorder %v5118_v2, %v5108_v62 }
 0x13c   : > { %vm1008_vm12 = vmand %vm8488_vm8, %vm880_vm7  ;;  %v1315_v18 = vmax.f32 %v1314_v3, %v5430_v26  ;;  %vm8492_vm8 = vcmp.ge.s32.totalorder %v5118_v2, %v5088_v49  ;;  %v5474_v39 = vsel %vm5407_vm14, %v5147_v17, -1e+30  ;;  %vm8502_vm14 = vnez %v8469_v24 }
 0x13d   : > { %vm5448_vm4 = vmand %vm8489_vm10, %vm917_vm3  ;;  %v5457_v50 = vsel %vm1008_vm12, %v5130_v11, -1e+30  ;;  %vm8495_vm3 = vnez %v8464_v8  ;;  %v790_v3 = vpop.permute.xlu1 %789  ;;  %vm8497_vm12 = vcmp.ge.s32.totalorder %v5123_v7, %v5088_v49  ;;  %vm8499_vm10 = vcmp.ge.s32.totalorder %v5127_v10, %v5098_v55 }
 0x13e   : > { %vm1009_vm7 = vmand %vm8492_vm8, %vm881_vm9  ;;  %8493 = vst [vmem:[#allocation26_spill] sm:$0xff] %v5457_v50  ;;  %v5469_v16 = vsel %vm8495_vm3, %v5138_v13, -1e+30  ;;  %v5497_v8 = vsel %vm8502_vm14, %v5142_v15, -1e+30  ;;  %v1316_v33 = vmax.f32 %v1315_v18, %v5474_v39 }
 0x13f   : > { %8496 = vst [vmem:[#allocation28_spill] sm:$0xff] %v5469_v16  ;;  %vm1010_vm9 = vmand %vm8497_vm12, %vm882_vm15  ;;  %v5480_v1 = vsel %vm1009_vm7, %v5138_v13, -1e+30  ;;  %vm8504_vm7 = vcmp.ge.s32.totalorder %v5123_v7, %v5102_v58  ;;  %vm8507_vm12 = vcmp.ge.s32.totalorder %v5127_v10, %v5088_v49  ;;  %v1344_v0 = vmax.f32 %v5464_v12, %v5469_v16 }
 0x140   : > { %8498 = vst [vmem:[#allocation29_spill] sm:$0xff] %v5480_v1  ;;  %vm5490_vm8 = vmand %vm8499_vm10, %vm903_vm6  ;;  %v1319_v60 = vmax.f32 %v5457_v50, %v5480_v1  ;;  %v5531_v18 = vsel %vm1010_vm9, %v5142_v15, -1e+30  ;;  %vm889_vm6 = vcmp.lt.s32.totalorder %v5118_v2, %v790_v3  ;;  %1317 = vmax.xlane.f32.xlu0 %v1316_v33  ;;  %vm8512_vm9 = vcmp.ge.s32.totalorder %v5118_v2, %v5096_v54 }
 0x141   : > { %8503 = vst [vmem:[#allocation30_spill] sm:$0xff] %v5497_v8  ;;  %vm5507_vm3 = vmand %vm8504_vm7, %vm910_vm11  ;;  %vm888_vm11 = vcmp.lt.s32.totalorder %v5106_v61, %v790_v3  ;;  %v796_v33 = vpop.permute.xlu1 %795  ;;  %vm8532_vm15 = vcmp.ge.s32.totalorder %v5106_v61, %v5100_v56  ;;  %v5694_v19 = vsel %vm5490_vm8, %v5147_v17, -1e+30  ;;  %vm8554_vm8 = vcmp.ge.s32.totalorder %v5123_v7, %v5104_v59 }
 0x142   : > { %vm5519_vm10 = vmand %vm8507_vm12, %vm883_vm5  ;;  %8510 = vst [vmem:[#allocation31_spill] sm:$0xff] %v5531_v18  ;;  %vm890_vm5 = vcmp.lt.s32.totalorder %v5123_v7, %v790_v3  ;;  %vm891_vm12 = vcmp.lt.s32.totalorder %v5127_v10, %v790_v3  ;;  %v1320_v49 = vmax.f32 %v1319_v60, %v5531_v18  ;;  %v1326_v18 = vmax.f32 %v5370_v4, %v5367_v43 }
 0x143   : > { %vm1016_vm1 = vmand %vm8511_vm0, %vm888_vm11  ;;  %vm8514_vm0 = vnez %v8471_v29  ;;  %v5560_v60 = vsel %vm5519_vm10, %v5147_v17, -1e+30  ;;  %vm8520_vm10 = vcmp.ge.s32.totalorder %v5127_v10, %v5102_v58  ;;  %v8521_v29 = vmov 0  ;;  %8549 = vst [vmem:[#allocation44_spill] sm:$0xff] %v5694_v19 }
 0x144   : > { %vm1017_vm14 = vmand %vm8512_vm9, %vm889_vm6  ;;  %v5546_v23 = vsel %vm1016_vm1, %v5130_v11, -1e+30  ;;  %v5555_v1 = vsel %vm8514_vm0, %v5130_v11, -1e+30  ;;  %8516 = vst [vmem:[#allocation34_spill] sm:$0xff] %v5560_v60  ;;  %vm8517_vm1 = vcmp.ge.s32.totalorder %v5123_v7, %v5096_v54  ;;  %vm8519_vm9 = vcmp.lt.s32.totalorder %v5127_v10, %v5211_v47  ;;  %1327 = vmax.xlane.f32.xlu0 %v1326_v18 }
 0x145   : > { %8513 = vst [vmem:[#allocation32_spill] sm:$0xff] %v5546_v23  ;;  %8515 = vst [vmem:[#allocation33_spill] sm:$0xff] %v5555_v1  ;;  %v5568_v16 = vsel %vm1017_vm14, %v5138_v13, -1e+30  ;;  %v5585_v4 = vsel %vm5337_vm2, %v5138_v13, -1e+30  ;;  %v1321_v24 = vmax.f32 %v1320_v49, %v5560_v60  ;;  %vm8524_vm14 = vcmp.ge.s32.totalorder %v5127_v10, %v5096_v54 }
 0x146   : > { %vm1018_vm6 = vmand %vm8517_vm1, %vm890_vm5  ;;  %8518 = vst [vmem:[#allocation35_spill] sm:$0xff] %v5568_v16  ;;  %v1329_v58 = vmax.f32 %v5546_v23, %v5568_v16  ;;  %vm896_vm1 = vcmp.lt.s32.totalorder %v5106_v61, %v796_v33  ;;  %vm897_vm11 = vcmp.lt.s32.totalorder %v5118_v2, %v796_v33  ;;  %vm898_vm2 = vcmp.lt.s32.totalorder %v5123_v7, %v796_v33  ;;  %v802_v23 = vpop.permute.xlu1 %801 }
 0x147   : > { %vm5578_vm0 = vmand %vm8520_vm10, %vm8519_vm9  ;;  %8523 = vst [vmem:[#allocation36_spill] sm:$0xff] %v5585_v4  ;;  %vm8527_vm10 = vcmp.lt.s32.totalorder %v5123_v7, %v5287_v9  ;;  %v5615_v37 = vsel %vm1018_vm6, %v5142_v15, -1e+30  ;;  %vm899_vm7 = vcmp.lt.s32.totalorder %v5127_v10, %v796_v33  ;;  %1322 = vmax.xlane.f32.xlu1 %v1321_v24  ;;  %v1336_v49 = vmax.f32 %v5438_v21, %v5396_v20 }
 0x148   : > { %v8522_v29 = vsel %vm5578_vm0, 4294967295, %v8521_v29  ;;  %vm5593_vm5 = vmand %vm8524_vm14, %vm891_vm12  ;;  %vm8528_vm12 = vcmp.ge.s32.totalorder %v5123_v7, %v5108_v62  ;;  %8531 = vst [vmem:[#allocation37_spill] sm:$0xff] %v5615_v37  ;;  %vm689_vm0 = vcmp.ge.s32.totalorder %v5118_v2, %v5110_v63  ;;  %v1330_v3 = vmax.f32 %v1329_v58, %v5615_v37 }
 0x149   : > { %vm5610_vm14 = vmand %vm8528_vm12, %vm8527_vm10  ;;  %vm8533_vm6 = vcmp.ge.s32.totalorder %v5118_v2, %v5100_v56  ;;  %v1345_v16 = vmax.f32 %v1344_v0, %v5497_v8  ;;  %v5638_v24 = vsel %vm5593_vm5, %v5147_v17, -1e+30  ;;  %v1354_v18 = vmax.f32 %v5555_v1, %v5585_v4  ;;  %1337 = vmax.xlane.f32.xlu0 %v1336_v49 }
 0x14a   : > { %vm1024_vm9 = vmand %vm8532_vm15, %vm896_vm1  ;;  %8535 = vst [vmem:[#allocation39_spill] sm:$0xff] %v5638_v24  ;;  %vm8536_vm15 = vcmp.ge.s32.totalorder %v5123_v7, %v5100_v56  ;;  %v5651_v0 = vsel %vm5425_vm13, %v5130_v11, -1e+30  ;;  %v1331_v58 = vmax.f32 %v1330_v3, %v5638_v24  ;;  %vm8542_vm13 = vcmp.lt.s32.totalorder %v5127_v10, %v5287_v9  ;;  %v808_v49 = vpop.permute.xlu1 %807 }
 0x14b   : > { %vm1025_vm10 = vmand %vm8533_vm6, %vm897_vm11  ;;  %v5632_v12 = vsel %vm1024_vm9, %v5130_v11, -1e+30  ;;  %8538 = vst [vmem:[#allocation41_spill] sm:$0xff] %v5651_v0  ;;  %vm8539_vm11 = vcmp.ge.s32.totalorder %v5127_v10, %v5100_v56  ;;  %vm8543_vm9 = vcmp.ge.s32.totalorder %v5127_v10, %v5108_v62  ;;  %v5679_v56 = vsel %vm5448_vm4, %v5138_v13, -1e+30 }
 0x14c   : > { %8534 = vst [vmem:[#allocation38_spill] sm:$0xff] %v5632_v12  ;;  %vm1026_vm1 = vmand %vm8536_vm15, %vm898_vm2  ;;  %v5644_v21 = vsel %vm1025_vm10, %v5138_v13, -1e+30  ;;  %vm904_vm2 = vcmp.lt.s32.totalorder %v5106_v61, %v802_v23  ;;  %vm906_vm6 = vcmp.lt.s32.totalorder %v5123_v7, %v802_v23  ;;  %vm907_vm10 = vcmp.lt.s32.totalorder %v5127_v10, %v802_v23  ;;  %1332 = vmax.xlane.f32.xlu1 %v1331_v58 }
 0x14d   : > { %8537 = vst [vmem:[#allocation40_spill] sm:$0xff] %v5644_v21  ;;  %vm5659_vm5 = vmand %vm8539_vm11, %vm899_vm7  ;;  %v1339_v20 = vmax.f32 %v5632_v12, %v5644_v21  ;;  %v5682_v33 = vsel %vm1026_vm1, %v5142_v15, -1e+30  ;;  %vm905_vm7 = vcmp.lt.s32.totalorder %v5118_v2, %v802_v23  ;;  %vm8548_vm15 = vcmp.ge.s32.totalorder %v5106_v61, %v5104_v59 }
 0x14e   : > { %vm5672_vm12 = vmand %vm8543_vm9, %vm8542_vm13  ;;  %8546 = vst [vmem:[#allocation42_spill] sm:$0xff] %v5679_v56  ;;  %vm8550_vm4 = vcmp.ge.s32.totalorder %v5118_v2, %v5104_v59  ;;  %v5705_v3 = vsel %vm5507_vm3, %v5142_v15, -1e+30  ;;  %v1346_v53 = vmax.f32 %v1345_v16, %v5694_v19  ;;  %vm8556_vm3 = vcmp.ge.s32.totalorder %v5127_v10, %v5104_v59 }
 0x14f   : > { %8547 = vst [vmem:[#allocation43_spill] sm:$0xff] %v5682_v33  ;;  %vm1032_vm11 = vmand %vm8548_vm15, %vm904_vm2  ;;  %v1340_v62 = vmax.f32 %v1339_v20, %v5682_v33  ;;  %v5710_v20 = vsel %vm5659_vm5, %v5147_v17, -1e+30  ;;  %v1355_v1 = vmax.f32 %v1354_v18, %v5705_v3  ;;  %vm912_vm13 = vcmp.lt.s32.totalorder %v5106_v61, %v808_v49 }
 0x150   : > { %vm1033_vm1 = vmand %vm8550_vm4, %vm905_vm7  ;;  %v5700_v9 = vsel %vm1032_vm11, %v5130_v11, -1e+30  ;;  %8552 = vst [vmem:[#allocation46_spill] sm:$0xff] %v5705_v3  ;;  %v1364_v4 = vmax.f32 %v5651_v0, %v5679_v56  ;;  %vm913_vm9 = vcmp.lt.s32.totalorder %v5118_v2, %v808_v49  ;;  %vm914_vm7 = vcmp.lt.s32.totalorder %v5123_v7, %v808_v49  ;;  %1347 = vmax.xlane.f32.xlu0 %v1346_v53  ;;  %v498_v56 = vld [vmem:[%s4861_s24 + $0x80] sm:$0xff] }
 0x151   : > { %8551 = vst [vmem:[#allocation45_spill] sm:$0xff] %v5700_v9  ;;  %8553 = vst [vmem:[#allocation47_spill] sm:$0xff] %v5710_v20  ;;  %v5717_v58 = vsel %vm1033_vm1, %v5138_v13, -1e+30  ;;  %v1341_v55 = vmax.f32 %v1340_v62, %v5710_v20  ;;  %vm8561_vm11 = vnez %v8522_v29  ;;  %vm690_vm4 = vcmp.ge.s32.totalorder %v5123_v7, %v5110_v63 }
 0x152   : > { %vm1034_vm2 = vmand %vm8554_vm8, %vm906_vm6  ;;  %8555 = vst [vmem:[#allocation48_spill] sm:$0xff] %v5717_v58  ;;  %v1349_v16 = vmax.f32 %v5700_v9, %v5717_v58  ;;  %vm915_vm6 = vcmp.lt.s32.totalorder %v5127_v10, %v808_v49  ;;  %v5748_v23 = vsel %vm8561_vm11, %v5147_v17, -1e+30  ;;  %vm691_vm8 = vcmp.ge.s32.totalorder %v5127_v10, %v5110_v63 }
 0x153   : > { %vm5726_vm5 = vmand %vm8556_vm3, %vm907_vm10  ;;  %v5736_v18 = vsel %vm1034_vm2, %v5142_v15, -1e+30  ;;  %vm8560_vm10 = vcmp.ge.s32.totalorder %v5106_v61, %v5110_v63  ;;  %1342 = vmax.xlane.f32.xlu1 %v1341_v55  ;;  %8562 = vst [vmem:[#allocation50_spill] sm:$0xff] %v5748_v23  ;;  %v5771_v55 = vsel %vm5610_vm14, %v5142_v15, -1e+30  ;;  %v1356_v0 = vmax.f32 %v1355_v1, %v5748_v23 }
 0x154   : > { %8559 = vst [vmem:[#allocation49_spill] sm:$0xff] %v5736_v18  ;;  %vm1040_vm15 = vmand %vm8560_vm10, %vm912_vm13  ;;  %v1350_v59 = vmax.f32 %v1349_v16, %v5736_v18  ;;  %v5761_v53 = vsel %vm5726_vm5, %v5147_v17, -1e+30  ;;  %v1365_v47 = vmax.f32 %v1364_v4, %v5771_v55  ;;  %v5790_v49 = vsel %vm5672_vm12, %v5147_v17, -1e+30 }
 0x155   : > { %vm1041_vm1 = vmand %vm689_vm0, %vm913_vm9  ;;  %v5756_v62 = vsel %vm1040_vm15, %v5130_v11, -1e+30  ;;  %8564 = vst [vmem:[#allocation52_spill] sm:$0xff] %v5761_v53  ;;  %1357 = vmax.xlane.f32.xlu0 %v1356_v0  ;;  %v531_v52 = vsub.s32 %v498_v56, %v5006_v5  ;;  %vm8296_vm14 = vcmask 7168   ;;  %vm700_vm12 = vcmp.ge.s32.totalorder %v5106_v61, %v5120_v6 }
 0x156   : > { %8563 = vst [vmem:[#allocation51_spill] sm:$0xff] %v5756_v62  ;;  %vm1042_vm2 = vmand %vm690_vm4, %vm914_vm7  ;;  %v5766_v29 = vsel %vm1041_vm1, %v5138_v13, -1e+30  ;;  %v1351_v16 = vmax.f32 %v1350_v59, %v5761_v53  ;;  %v1366_v4 = vmax.f32 %v1365_v47, %v5790_v49  ;;  %vm701_vm9 = vcmp.ge.s32.totalorder %v5118_v2, %v5120_v6 }
 0x157   : > { %8565 = vst [vmem:[#allocation53_spill] sm:$0xff] %v5766_v29  ;;  %8566 = vst [vmem:[#allocation54_spill] sm:$0xff] %v5771_v55  ;;  %v1359_v63 = vmax.f32 %v5756_v62, %v5766_v29  ;;  %v5781_v3 = vsel %vm1042_vm2, %v5142_v15, -1e+30  ;;  %vm702_vm10 = vcmp.ge.s32.totalorder %v5123_v7, %v5120_v6  ;;  %vm703_vm11 = vcmp.ge.s32.totalorder %v5127_v10, %v5120_v6 }
 0x158   : > { %vm1043_vm0 = vmand %vm691_vm8, %vm915_vm6  ;;  %8567 = vst [vmem:[#allocation55_spill] sm:$0xff] %v5781_v3  ;;  %1352 = vmax.xlane.f32.xlu1 %v1351_v16  ;;  %v494_v16 = vld [vmem:[%s4861_s24 + $0x60] sm:$0xff]  ;;  %v8609_v24 = vmov 0 }
 0x159   : > { %v1360_v54 = vmax.f32 %v1359_v63, %v5781_v3  ;;  %v5785_v1 = vsel %vm1043_vm0, %v5147_v17, -1e+30  ;;  %8569 = vst [vmem:[#allocation57_spill] sm:$0xff] %v5790_v49  ;;  %1367 = vmax.xlane.f32.xlu0 %v1366_v4  ;;  %v527_v0 = vsub.s32 %v494_v16, %v5006_v5  ;;  %v496_v63 = vld [vmem:[%s4861_s24 + $0x70] sm:$0xff]  ;;  %v506_v16 = vld [vmem:[%s4861_s24 + $0xc0] sm:$0xff]  ;;  %vm708_vm0 = vcmp.ge.s32.totalorder %v5106_v61, %v5140_v14 }
 0x15a   : > { %8568 = vst [vmem:[#allocation56_spill] sm:$0xff] %v5785_v1  ;;  %v529_v55 = vsub.s32 %v496_v63, %v5006_v5  ;;  %v504_v4 = vld [vmem:[%s4861_s24 + $0xb0] sm:$0xff] }
 0x15b   : > { %v1361_v59 = vmax.f32 %v1360_v54, %v5785_v1  ;;  %v500_v54 = vld [vmem:[%s4861_s24 + $0x90] sm:$0xff] }
 0x15c   : > { %v533_v47 = vsub.s32 %v500_v54, %v5006_v5  ;;  %v512_v63 = vld [vmem:[%s4861_s24 + $0xf0] sm:$0xff]  ;;  %v8570_v54 = vmov 0  }
 0x15d   : > { %1362 = vmax.xlane.f32.xlu1 %v1361_v59  ;;  %v502_v59 = vld [vmem:[%s4861_s24 + $0xa0] sm:$0xff] }
 0x15e   : > { %v535_v56 = vsub.s32 %v502_v59, %v5006_v5 }
 0x16e   : > { %813 = vperm.xlu1 %4184, %v527_v0  }
 0x16f   : > { %816 = vperm.xlu0 %4183, %v5039_v30   ;;  %v537_v30 = vsub.s32 %v504_v4, %v5006_v5 }
 0x172   : > { %819 = vperm.xlu1 %4184, %v529_v55  }
 0x173   : > { %822 = vperm.xlu0 %4183, %v5043_v32   ;;  %v539_v32 = vsub.s32 %v506_v16, %v5006_v5  ;;  %v5856_v16 = vld [vmem:[#allocation2 + $0x20] sm:$0xff] }
 0x174   : > { %8579 = vst [vmem:[#allocation66_spill] sm:$0xff] %v5856_v16 }
 0x176   : > { %825 = vperm.xlu1 %4184, %v531_v52  }
 0x177   : > { %828 = vperm.xlu0 %4183, %v5048_v34   ;;  %v508_v34 = vld [vmem:[%s4861_s24 + $0xd0] sm:$0xff] }
 0x17a   : > { %831 = vperm.xlu1 %4184, %v533_v47  }
 0x17b   : > { %834 = vperm.xlu0 %4183, %v5053_v36   ;;  %v541_v36 = vsub.s32 %v508_v34, %v5006_v5 }
 0x17e   : > { %840 = vperm.xlu1 %4184, %v5058_v38   ;;  %v510_v38 = vld [vmem:[%s4861_s24 + $0xe0] sm:$0xff] }
 0x17f   : > { %837 = vperm.xlu0 %4183, %v535_v56  }
 0x182   : > { %846 = vperm.xlu1 %4184, %v5063_v40   ;;  %v5821_v40 = vsub.s32 %v510_v38, %v5006_v5 }
 0x183   : > { %843 = vperm.xlu0 %4183, %v537_v30  }
 0x186   : > { %852 = vperm.xlu1 %4184, %v5068_v42   ;;  %v5827_v42 = vsub.s32 %v512_v63, %v5006_v5  ;;  %v5839_v5 = vld [vmem:[#allocation2 + $0x8] sm:$0xff] }
 0x187   : > { %849 = vperm.xlu0 %4183, %v539_v32   ;;  %8573 = vst [vmem:[#allocation60_spill] sm:$0xff] %v5839_v5 }
 0x18a   : > { %858 = vperm.xlu1 %4184, %v5073_v44   ;;  %v5832_v44 = vld [vmem:[#allocation2] sm:$0xff] }
 0x18b   : > { %855 = vperm.xlu0 %4183, %v541_v36   ;;  %8571 = vst [vmem:[#allocation58_spill] sm:$0xff] %v5832_v44 }
 0x18e   : > { %864 = vperm.xlu1 %4184, %v5078_v46  }
 0x18f   : > { %861 = vperm.xlu0 %4183, %v5821_v40  }
 0x192   : > { %870 = vperm.xlu1 %4184, %v5083_v48  }
 0x193   : > { %867 = vperm.xlu0 %4183, %v5827_v42  }
 0x196   : > { %4186 = vset.pattern.permute.xlu1 %v8570_v54 }
 0x197   : > { %4185 = vset.pattern.permute.xlu0 %v8570_v54  ;;  %v5870_v54 = vld [vmem:[#allocation2 + $0x30] sm:$0xff] }
 0x198   : > { %589 = vperm.xlu0 %4185, %v527_v0   ;;  %8583 = vst [vmem:[#allocation70_spill] sm:$0xff] %v5870_v54 }
 0x19c   : > { %595 = vperm.xlu0 %4185, %v529_v55  }
 0x1a0   : > { %601 = vperm.xlu0 %4185, %v531_v52   ;;  %v5844_v52 = vld [vmem:[#allocation2 + $0x10] sm:$0xff] }
 0x1a1   : > { %8575 = vst [vmem:[#allocation62_spill] sm:$0xff] %v5844_v52 }
 0x1a4   : > { %607 = vperm.xlu0 %4185, %v533_v47   ;;  %v5846_v47 = vld [vmem:[#allocation2 + $0x18] sm:$0xff] }
 0x1a5   : > { %v1313_v46 = vpop.xlane.xlu1 %1312  ;;  %8576 = vst [vmem:[#allocation63_spill] sm:$0xff] %v5846_v47 }
 0x1a6   : > { %v5835_v48 = vmax.f32 %v5832_v44, %v1313_v46  ;;  %v5872_v46 = vld [vmem:[#allocation2 + $0x38] sm:$0xff] }
 0x1a7   : > { %8584 = vst [vmem:[#allocation71_spill] sm:$0xff] %v5872_v46 }
 0x1a8   : > { %613 = vperm.xlu0 %4185, %v535_v56   ;;  %8572 = vst [vmem:[#allocation59_spill] sm:$0xff] %v5835_v48  ;;  %3296 = vst.msk [vmem:[#allocation2] sm:$0xff] %vm8296_vm14, %v5835_v48 }
 0x1ac   : > { %619 = vperm.xlu0 %4185, %v537_v30  }
 0x1b0   : > { %625 = vperm.xlu0 %4185, %v539_v32   ;;  %v5858_v32 = vld [vmem:[#allocation2 + $0x28] sm:$0xff] }
 0x1b1   : > { %8580 = vst [vmem:[#allocation67_spill] sm:$0xff] %v5858_v32 }
 0x1b4   : > { %631 = vperm.xlu0 %4185, %v541_v36  }
 0x1cd   : > { %v1318_v0 = vpop.xlane.xlu0 %1317 }
 0x1ce   : > { %v5842_v55 = vmax.f32 %v5839_v5, %v1318_v0 }
 0x1d0   : > { %8574 = vst [vmem:[#allocation61_spill] sm:$0xff] %v5842_v55  ;;  %3297 = vst.msk [vmem:[#allocation2 + $0x8] sm:$0xff] %vm8296_vm14, %v5842_v55 }
 0x1d1   : > { %v1328_v56 = vpop.xlane.xlu0 %1327 }
 0x1d2   : > { %v5854_v30 = vmax.f32 %v5846_v47, %v1328_v56 }
 0x1d4   : > { %v1323_v59 = vpop.xlane.xlu1 %1322  ;;  %8578 = vst [vmem:[#allocation65_spill] sm:$0xff] %v5854_v30  ;;  %3299 = vst.msk [vmem:[#allocation2 + $0x18] sm:$0xff] %vm8296_vm14, %v5854_v30 }
 0x1d5   : > { %v5851_v4 = vmax.f32 %v5844_v52, %v1323_v59 }
 0x1d6   : > { %v1338_v36 = vpop.xlane.xlu0 %1337 }
 0x1d7   : > { %8577 = vst [vmem:[#allocation64_spill] sm:$0xff] %v5851_v4  ;;  %3298 = vst.msk [vmem:[#allocation2 + $0x10] sm:$0xff] %vm8296_vm14, %v5851_v4  ;;  %v5868_v63 = vmax.f32 %v5858_v32, %v1338_v36  ;;  %v5884_v36 = vld [vmem:[#allocation2 + $0x40] sm:$0xff] }
 0x1d8   : > { %8587 = vst [vmem:[#allocation74_spill] sm:$0xff] %v5884_v36 }
 0x1d9   : > { %v1333_v34 = vpop.xlane.xlu1 %1332  ;;  %8582 = vst [vmem:[#allocation69_spill] sm:$0xff] %v5868_v63  ;;  %3301 = vst.msk [vmem:[#allocation2 + $0x28] sm:$0xff] %vm8296_vm14, %v5868_v63 }
 0x1da   : > { %v5865_v38 = vmax.f32 %v5856_v16, %v1333_v34  ;;  %v5886_v16 = vld [vmem:[#allocation2 + $0x48] sm:$0xff] }
 0x1db   : > { %8588 = vst [vmem:[#allocation75_spill] sm:$0xff] %v5886_v16 }
 0x1dc   : > { %8581 = vst [vmem:[#allocation68_spill] sm:$0xff] %v5865_v38  ;;  %3300 = vst.msk [vmem:[#allocation2 + $0x20] sm:$0xff] %vm8296_vm14, %v5865_v38 }
 0x1dd   : > { %v1348_v59 = vpop.xlane.xlu0 %1347 }
 0x1de   : > { %v5882_v34 = vmax.f32 %v5872_v46, %v1348_v59  ;;  %v5898_v59 = vld [vmem:[#allocation2 + $0x50] sm:$0xff] }
 0x1df   : > { %8591 = vst [vmem:[#allocation78_spill] sm:$0xff] %v5898_v59 }
 0x1e0   : > { %v1343_v0 = vpop.xlane.xlu1 %1342  ;;  %8586 = vst [vmem:[#allocation73_spill] sm:$0xff] %v5882_v34  ;;  %3303 = vst.msk [vmem:[#allocation2 + $0x38] sm:$0xff] %vm8296_vm14, %v5882_v34 }
 0x1e1   : > { %v5879_v56 = vmax.f32 %v5870_v54, %v1343_v0  ;;  %v5900_v54 = vld [vmem:[#allocation2 + $0x58] sm:$0xff] }
 0x1e2   : > { %v1358_v47 = vpop.xlane.xlu0 %1357  ;;  %8592 = vst [vmem:[#allocation79_spill] sm:$0xff] %v5900_v54 }
 0x1e3   : > { %8585 = vst [vmem:[#allocation72_spill] sm:$0xff] %v5879_v56  ;;  %3302 = vst.msk [vmem:[#allocation2 + $0x30] sm:$0xff] %vm8296_vm14, %v5879_v56  ;;  %v5896_v0 = vmax.f32 %v5886_v16, %v1358_v47 }
 0x1e5   : > { %v1353_v44 = vpop.xlane.xlu1 %1352  ;;  %8590 = vst [vmem:[#allocation77_spill] sm:$0xff] %v5896_v0  ;;  %3305 = vst.msk [vmem:[#allocation2 + $0x48] sm:$0xff] %vm8296_vm14, %v5896_v0 }
 0x1e6   : > { %v5893_v52 = vmax.f32 %v5884_v36, %v1353_v44  ;;  %v1368_v32 = vpop.xlane.xlu0 %1367 }
 0x1e7   : > { %v5910_v44 = vmax.f32 %v5900_v54, %v1368_v32 }
 0x1e8   : > { %8589 = vst [vmem:[#allocation76_spill] sm:$0xff] %v5893_v52  ;;  %3304 = vst.msk [vmem:[#allocation2 + $0x40] sm:$0xff] %vm8296_vm14, %v5893_v52 }
 0x1e9   : > { %8594 = vst [vmem:[#allocation81_spill] sm:$0xff] %v5910_v44  ;;  %3307 = vst.msk [vmem:[#allocation2 + $0x58] sm:$0xff] %vm8296_vm14, %v5910_v44 }
 0x1ea   : > { %v1363_v46 = vpop.xlane.xlu1 %1362 }
 0x1eb   : > { %v5907_v5 = vmax.f32 %v5898_v59, %v1363_v46 }
 0x1ed   : > { %8593 = vst [vmem:[#allocation80_spill] sm:$0xff] %v5907_v5  ;;  %3306 = vst.msk [vmem:[#allocation2 + $0x50] sm:$0xff] %vm8296_vm14, %v5907_v5 }
 0x1ee   : > { %v817_v47 = vpop.permute.xlu0 %816  ;;  %v5924_v32 = vpop.permute.xlu1 %813 }
 0x1ef   : > { %vm924_vm3 = vcmp.lt.s32.totalorder %v5106_v61, %v817_v47  ;;  %vm925_vm5 = vcmp.lt.s32.totalorder %v5118_v2, %v817_v47  ;;  %vm926_vm13 = vcmp.lt.s32.totalorder %v5123_v7, %v817_v47  ;;  %vm927_vm7 = vcmp.lt.s32.totalorder %v5127_v10, %v817_v47 }
 0x1f0   : > { %vm1052_vm6 = vmand %vm700_vm12, %vm924_vm3  ;;  %vm709_vm3 = vcmp.ge.s32.totalorder %v5118_v2, %v5140_v14 }
 0x1f1   : > { %vm1053_vm15 = vmand %vm701_vm9, %vm925_vm5  ;;  %v5929_v46 = vsel %vm1052_vm6, %v5130_v11, -1e+30  ;;  %vm710_vm9 = vcmp.ge.s32.totalorder %v5123_v7, %v5140_v14 }
 0x1f2   : > { %8595 = vst [vmem:[#allocation82_spill] sm:$0xff] %v5929_v46  ;;  %v823_v59 = vpop.permute.xlu0 %822  ;;  %vm1054_vm4 = vmand %vm702_vm10, %vm926_vm13  ;;  %v5934_v36 = vsel %vm1053_vm15, %v5138_v13, -1e+30  ;;  %v5945_v53 = vpop.permute.xlu1 %819 }
 0x1f3   : > { %8596 = vst [vmem:[#allocation83_spill] sm:$0xff] %v5934_v36  ;;  %vm1055_vm1 = vmand %vm703_vm11, %vm927_vm7  ;;  %v1374_v47 = vmax.f32 %v5929_v46, %v5934_v36  ;;  %v5939_v54 = vsel %vm1054_vm4, %v5142_v15, -1e+30  ;;  %vm932_vm8 = vcmp.lt.s32.totalorder %v5106_v61, %v823_v59  ;;  %vm933_vm2 = vcmp.lt.s32.totalorder %v5118_v2, %v823_v59 }
 0x1f4   : > { %8597 = vst [vmem:[#allocation84_spill] sm:$0xff] %v5939_v54  ;;  %v5943_v23 = vsel %vm1055_vm1, %v5147_v17, -1e+30  ;;  %vm934_vm12 = vcmp.lt.s32.totalorder %v5123_v7, %v823_v59  ;;  %vm5965_vm5 = vmand %vm708_vm0, %vm932_vm8  ;;  %vm935_vm10 = vcmp.lt.s32.totalorder %v5127_v10, %v823_v59  ;;  %vm716_vm11 = vcmp.ge.s32.totalorder %v5106_v61, %v5160_v22 }
 0x1f5   : > { %v1375_v16 = vmax.f32 %v1374_v47, %v5939_v54  ;;  %8598 = vst [vmem:[#allocation85_spill] sm:$0xff] %v5943_v23  ;;  %vm5972_vm7 = vmand %vm709_vm3, %vm933_vm2  ;;  %v8603_v54 = vmov 0  ;;  %vm717_vm1 = vcmp.ge.s32.totalorder %v5118_v2, %v5160_v22  ;;  %vm711_vm0 = vcmp.ge.s32.totalorder %v5127_v10, %v5140_v14 }
 0x1f6   : > { %v829_v49 = vpop.permute.xlu0 %828  ;;  %v5948_v1 = vpop.permute.xlu1 %825  ;;  %vm5980_vm15 = vmand %vm710_vm9, %vm934_vm12  ;;  %vm724_vm9 = vcmp.ge.s32.totalorder %v5106_v61, %v5164_v25  ;;  %v6036_v19 = vsel %vm5965_vm5, %v5130_v11, -1e+30  ;;  %v6041_v8 = vsel %vm5972_vm7, %v5138_v13, -1e+30  ;;  %vm8620_vm5 = vcmp.ge.s32.totalorder %v5127_v10, %v5160_v22 }
 0x1f7   : > { %v1376_v6 = vmax.f32 %v1375_v16, %v5943_v23  ;;  %vm940_vm13 = vcmp.lt.s32.totalorder %v5106_v61, %v829_v49  ;;  %vm941_vm6 = vcmp.lt.s32.totalorder %v5118_v2, %v829_v49  ;;  %v8604_v54 = vsel %vm5980_vm15, 4294967295, %v8603_v54  ;;  %vm6005_vm14 = vmand %vm711_vm0, %vm935_vm10  ;;  %8615 = vst [vmem:[#allocation86_spill] sm:$0xff] %v6036_v19 }
 0x1f8   : > { %vm5991_vm8 = vmand %vm716_vm11, %vm940_vm13  ;;  %v8610_v24 = vsel %vm6005_vm14, 4294967295, %v8609_v24  ;;  %vm718_vm13 = vcmp.ge.s32.totalorder %v5123_v7, %v5160_v22  ;;  %vm943_vm15 = vcmp.lt.s32.totalorder %v5127_v10, %v829_v49  ;;  %vm726_vm10 = vcmp.ge.s32.totalorder %v5123_v7, %v5164_v25  ;;  %8616 = vst [vmem:[#allocation87_spill] sm:$0xff] %v6041_v8 }
 0x1f9   : > { %1377 = vmax.xlane.f32.xlu0 %v1376_v6  ;;  %vm5999_vm3 = vmand %vm717_vm1, %vm941_vm6  ;;  %vm725_vm6 = vcmp.ge.s32.totalorder %v5118_v2, %v5164_v25  ;;  %vm727_vm0 = vcmp.ge.s32.totalorder %v5127_v10, %v5164_v25  ;;  %vm732_vm11 = vcmp.ge.s32.totalorder %v5106_v61, %v5166_v27  ;;  %v6066_v6 = vsel %vm5991_vm8, %v5130_v11, -1e+30 }
 0x1fa   : > { %v835_v18 = vpop.permute.xlu0 %834  ;;  %v5954_v46 = vpop.permute.xlu1 %831  ;;  %vm6059_vm7 = vmand %vm8620_vm5, %vm943_vm15  ;;  %8623 = vst [vmem:[#allocation88_spill] sm:$0xff] %v6066_v6  ;;  %v6071_v33 = vsel %vm5999_vm3, %v5138_v13, -1e+30  ;;  %vm8636_vm5 = vnez %v8604_v54 }
 0x1fb   : > { %vm948_vm4 = vcmp.lt.s32.totalorder %v5106_v61, %v835_v18  ;;  %vm949_vm2 = vcmp.lt.s32.totalorder %v5118_v2, %v835_v18  ;;  %vm950_vm12 = vcmp.lt.s32.totalorder %v5123_v7, %v835_v18  ;;  %8624 = vst [vmem:[#allocation89_spill] sm:$0xff] %v6071_v33  ;;  %v1394_v14 = vmax.f32 %v6066_v6, %v6071_v33 }
 0x1fc   : > { %vm6016_vm1 = vmand %vm724_vm9, %vm948_vm4  ;;  %vm8617_vm4 = vcmp.lt.s32.totalorder %v5123_v7, %v829_v49  ;;  %vm951_vm9 = vcmp.lt.s32.totalorder %v5127_v10, %v835_v18  ;;  %v1384_v18 = vmax.f32 %v6036_v19, %v6041_v8  ;;  %v6279_v25 = vsel %vm6059_vm7, %v5147_v17, -1e+30 }
 0x1fd   : > { %vm6025_vm14 = vmand %vm725_vm6, %vm949_vm2  ;;  %vm733_vm6 = vcmp.ge.s32.totalorder %v5118_v2, %v5166_v27  ;;  %v6089_v3 = vsel %vm6016_vm1, %v5130_v11, -1e+30  ;;  %8659 = vst [vmem:[#allocation99_spill] sm:$0xff] %v6279_v25  ;;  %vm8703_vm7 = vcmp.lt.s32.totalorder %v5106_v61, %v5948_v1 }
 0x1fe   : > { %v5950_v58 = vpop.permute.xlu0 %837  ;;  %v5977_v23 = vpop.permute.xlu1 %840  ;;  %vm6045_vm2 = vmand %vm718_vm13, %vm8617_vm4  ;;  %vm734_vm13 = vcmp.ge.s32.totalorder %v5123_v7, %v5166_v27  ;;  %8627 = vst [vmem:[#allocation90_spill] sm:$0xff] %v6089_v3  ;;  %v6094_v49 = vsel %vm6025_vm14, %v5138_v13, -1e+30 }
 0x1ff   : > { %vm956_vm4 = vcmp.lt.s32.totalorder %v5106_v61, %v5977_v23  ;;  %vm6082_vm15 = vmand %vm726_vm10, %vm950_vm12  ;;  %8628 = vst [vmem:[#allocation91_spill] sm:$0xff] %v6094_v49  ;;  %vm957_vm3 = vcmp.lt.s32.totalorder %v5118_v2, %v5977_v23  ;;  %vm958_vm14 = vcmp.lt.s32.totalorder %v5123_v7, %v5977_v23  ;;  %v1404_v33 = vmax.f32 %v6089_v3, %v6094_v49 }
 0x200   : > { %vm6105_vm12 = vmand %vm727_vm0, %vm951_vm9  ;;  %vm959_vm0 = vcmp.lt.s32.totalorder %v5127_v10, %v5977_v23  ;;  %v6159_v3 = vsel %vm8636_vm5, %v5142_v15, -1e+30  ;;  %v6183_v54 = vsel %vm6045_vm2, %v5142_v15, -1e+30  ;;  %vm8648_vm5 = vnez %v8610_v24 }
 0x201   : > { %vm6124_vm9 = vmand %vm732_vm11, %vm956_vm4  ;;  %8637 = vst [vmem:[#allocation93_spill] sm:$0xff] %v6159_v3  ;;  %v6176_v19 = vmax.f32 %v1384_v18, %v6159_v3  ;;  %v6202_v37 = vmax.f32 %v1394_v14, %v6183_v54  ;;  %v6224_v22 = vsel %vm8648_vm5, %v5147_v17, -1e+30  ;;  %vm8660_vm2 = vcmp.lt.s32.totalorder %v5118_v2, %v5924_v32 }
 0x202   : > { %v5952_v36 = vpop.permute.xlu0 %843  ;;  %v6052_v20 = vpop.permute.xlu1 %846  ;;  %vm6144_vm11 = vmand %vm733_vm6, %vm957_vm3  ;;  %8640 = vst [vmem:[#allocation94_spill] sm:$0xff] %v6183_v54  ;;  %v6234_v54 = vsel %vm6124_vm9, %v5130_v11, -1e+30  ;;  %v6298_v16 = vsel %vm6105_vm12, %v5147_v17, -1e+30 }
 0x203   : > { %vm964_vm4 = vcmp.lt.s32.totalorder %v5106_v61, %v6052_v20  ;;  %vm6167_vm6 = vmand %vm734_vm13, %vm958_vm14  ;;  %vm965_vm3 = vcmp.lt.s32.totalorder %v5118_v2, %v6052_v20  ;;  %vm8641_vm13 = vcmp.ge.s32.totalorder %v5127_v10, %v5166_v27  ;;  %vm966_vm10 = vcmp.lt.s32.totalorder %v5123_v7, %v6052_v20  ;;  %8649 = vst [vmem:[#allocation96_spill] sm:$0xff] %v6224_v22 }
 0x204   : > { %vm6191_vm14 = vmand %vm8641_vm13, %vm959_vm0  ;;  %v6207_v27 = vsel %vm6082_vm15, %v5142_v15, -1e+30  ;;  %vm8645_vm0 = vcmp.ge.s32.totalorder %v5106_v61, %v5168_v28  ;;  %8650 = vst [vmem:[#allocation97_spill] sm:$0xff] %v6234_v54  ;;  %v6239_v3 = vsel %vm6144_vm11, %v5138_v13, -1e+30  ;;  %vm967_vm1 = vcmp.lt.s32.totalorder %v5127_v10, %v6052_v20 }
 0x205   : > { %8644 = vst [vmem:[#allocation95_spill] sm:$0xff] %v6207_v27  ;;  %vm6215_vm13 = vmand %vm8645_vm0, %vm964_vm4  ;;  %v6229_v14 = vmax.f32 %v1404_v33, %v6207_v27  ;;  %vm8652_vm4 = vcmp.ge.s32.totalorder %v5118_v2, %v5168_v28  ;;  %vm8658_vm11 = vcmp.lt.s32.totalorder %v5106_v61, %v5924_v32  ;;  %v1414_v12 = vmax.f32 %v6234_v54, %v6239_v3 }
 0x206   : > { %v5958_v47 = vpop.permute.xlu0 %849  ;;  %v6173_v8 = vpop.permute.xlu1 %852  ;;  %8651 = vst [vmem:[#allocation98_spill] sm:$0xff] %v6239_v3  ;;  %vm6247_vm5 = vmand %vm8652_vm4, %vm965_vm3  ;;  %vm8655_vm3 = vcmp.ge.s32.totalorder %v5123_v7, %v5168_v28  ;;  %v6325_v54 = vsel %vm6167_vm6, %v5142_v15, -1e+30  ;;  %v6330_v60 = vsel %vm6191_vm14, %v5147_v17, -1e+30  ;;  %vm8673_vm6 = vcmp.lt.s32.totalorder %v5127_v10, %v5924_v32 }
 0x207   : > { %vm6266_vm4 = vmand %vm8655_vm3, %vm966_vm10  ;;  %vm972_vm3 = vcmp.lt.s32.totalorder %v5106_v61, %v6173_v8  ;;  %8662 = vst [vmem:[#allocation101_spill] sm:$0xff] %v6298_v16  ;;  %vm8681_vm10 = vcmp.lt.s32.totalorder %v5106_v61, %v5945_v53  ;;  %v6397_v6 = vmax.f32 %v1414_v12, %v6325_v54  ;;  %v6402_v3 = vsel %vm6215_vm13, %v5130_v11, -1e+30 }
 0x208   : > { %8668 = vst [vmem:[#allocation103_spill] sm:$0xff] %v6325_v54  ;;  %8669 = vst [vmem:[#allocation104_spill] sm:$0xff] %v6330_v60  ;;  %v6424_v23 = vsel %vm6247_vm5, %v5138_v13, -1e+30  ;;  %vm8695_vm5 = vcmp.lt.s32.totalorder %v5127_v10, %v5945_v53 }
 0x209   : > { %8684 = vst [vmem:[#allocation107_spill] sm:$0xff] %v6402_v3  ;;  %8690 = vst [vmem:[#allocation110_spill] sm:$0xff] %v6424_v23 }
 0x20a   : > { %v5987_v9 = vpop.permute.xlu0 %855  ;;  %v6304_v43 = vpop.permute.xlu1 %858 }
 0x20e   : > { %v6031_v62 = vpop.permute.xlu0 %861 }
 0x212   : > { %v6115_v29 = vpop.permute.xlu0 %867 }
 0x213   : > { %8631 = vst [vmem:[#allocation92_spill] sm:$0xff] %v6115_v29 }
 0x217   : > { %v590_v18 = vpop.permute.xlu0 %589 }
 0x218   : > { %vm696_vm9 = vcmp.ge.s32.totalorder %v5106_v61, %v590_v18  ;;  %vm697_vm15 = vcmp.ge.s32.totalorder %v5118_v2, %v590_v18 }
 0x219   : > { %vm1048_vm8 = vmand %vm696_vm9, %vm8658_vm11 }
 0x21a   : > { %vm1049_vm0 = vmand %vm697_vm15, %vm8660_vm2  ;;  %v6289_v27 = vsel %vm1048_vm8, %v5130_v11, -1e+30  ;;  %vm8663_vm8 = vcmp.lt.s32.totalorder %v5123_v7, %v5924_v32  ;;  %vm8664_vm15 = vcmp.ge.s32.totalorder %v5123_v7, %v590_v18 }
 0x21b   : > { %8661 = vst [vmem:[#allocation100_spill] sm:$0xff] %v6289_v27  ;;  %v596_v29 = vpop.permute.xlu0 %595  ;;  %vm6311_vm9 = vmand %vm8664_vm15, %vm8663_vm8  ;;  %v6316_v59 = vsel %vm1049_vm0, %v5138_v13, -1e+30  ;;  %vm8670_vm0 = vcmp.ge.s32.totalorder %v5127_v10, %v5168_v28  ;;  %vm8674_vm15 = vcmp.ge.s32.totalorder %v5127_v10, %v590_v18 }
 0x21c   : > { %8667 = vst [vmem:[#allocation102_spill] sm:$0xff] %v6316_v59  ;;  %vm6338_vm11 = vmand %vm8670_vm0, %vm967_vm1  ;;  %v1369_v20 = vmax.f32 %v6289_v27, %v6316_v59  ;;  %vm704_vm1 = vcmp.ge.s32.totalorder %v5106_v61, %v596_v29  ;;  %vm705_vm0 = vcmp.ge.s32.totalorder %v5118_v2, %v596_v29  ;;  %v6376_v32 = vsel %vm6311_vm9, %v5142_v15, -1e+30 }
 0x21d   : > { %vm6349_vm14 = vmand %vm8674_vm15, %vm8673_vm6  ;;  %vm8677_vm6 = vcmp.ge.s32.totalorder %v5106_v61, %v5170_v31  ;;  %8680 = vst [vmem:[#allocation105_spill] sm:$0xff] %v6376_v32  ;;  %vm706_vm12 = vcmp.ge.s32.totalorder %v5123_v7, %v596_v29  ;;  %vm8682_vm9 = vcmp.lt.s32.totalorder %v5118_v2, %v5945_v53  ;;  %v1424_v27 = vmax.f32 %v6402_v3, %v6424_v23 }
 0x21e   : > { %vm6367_vm15 = vmand %vm8677_vm6, %vm972_vm3  ;;  %vm974_vm6 = vcmp.lt.s32.totalorder %v5123_v7, %v6173_v8  ;;  %v1370_v49 = vmax.f32 %v1369_v20, %v6376_v32  ;;  %v6407_v20 = vsel %vm6349_vm14, %v5147_v17, -1e+30  ;;  %vm975_vm14 = vcmp.lt.s32.totalorder %v5127_v10, %v6173_v8 }
 0x21f   : > { %vm1056_vm8 = vmand %vm704_vm1, %vm8681_vm10  ;;  %v602_v59 = vpop.permute.xlu0 %601  ;;  %8685 = vst [vmem:[#allocation108_spill] sm:$0xff] %v6407_v20  ;;  %vm8686_vm10 = vcmp.lt.s32.totalorder %v5123_v7, %v5945_v53  ;;  %vm8692_vm1 = vcmp.ge.s32.totalorder %v5118_v2, %v5170_v31  ;;  %v6617_v23 = vsel %vm6367_vm15, %v5130_v11, -1e+30  ;;  %v8762_v53 = vmax.f32 %v6229_v14, %v6298_v16 }
 0x220   : > { %vm1057_vm2 = vmand %vm705_vm0, %vm8682_vm9  ;;  %v6392_v18 = vsel %vm1056_vm8, %v5130_v11, -1e+30  ;;  %v1371_v24 = vmax.f32 %v1370_v49, %v6407_v20  ;;  %vm8696_vm9 = vcmp.ge.s32.totalorder %v5127_v10, %v596_v29  ;;  %v6469_v29 = vpop.permute.xlu1 %864  ;;  %8731 = vst [vmem:[#allocation118_spill] sm:$0xff] %v6617_v23 }
 0x221   : > { %8683 = vst [vmem:[#allocation106_spill] sm:$0xff] %v6392_v18  ;;  %vm6412_vm8 = vmand %vm706_vm12, %vm8686_vm10  ;;  %v6417_v12 = vsel %vm1057_vm2, %v5138_v13, -1e+30  ;;  %vm8691_vm12 = vcmp.lt.s32.totalorder %v5118_v2, %v6173_v8  ;;  %vm8699_vm2 = vcmp.ge.s32.totalorder %v5123_v7, %v5170_v31 }
 0x222   : > { %8689 = vst [vmem:[#allocation109_spill] sm:$0xff] %v6417_v12  ;;  %vm6434_vm0 = vmand %vm8692_vm1, %vm8691_vm12  ;;  %v1379_v54 = vmax.f32 %v6392_v18, %v6417_v12  ;;  %vm712_vm12 = vcmp.ge.s32.totalorder %v5106_v61, %v602_v59  ;;  %v6474_v49 = vsel %vm6412_vm8, %v5142_v15, -1e+30  ;;  %vm713_vm1 = vcmp.ge.s32.totalorder %v5118_v2, %v602_v59  ;;  %1372 = vmax.xlane.f32.xlu1 %v1371_v24 }
 0x223   : > { %vm6446_vm10 = vmand %vm8696_vm9, %vm8695_vm5  ;;  %8702 = vst [vmem:[#allocation111_spill] sm:$0xff] %v6474_v49  ;;  %vm8704_vm8 = vcmp.lt.s32.totalorder %v5118_v2, %v5948_v1  ;;  %v608_v20 = vpop.permute.xlu0 %607  ;;  %v6513_v18 = vsel %vm6266_vm4, %v5142_v15, -1e+30  ;;  %vm8712_vm4 = vcmp.lt.s32.totalorder %v5127_v10, %v5948_v1 }
 0x224   : > { %vm6461_vm13 = vmand %vm8699_vm2, %vm974_vm6  ;;  %vm714_vm6 = vcmp.ge.s32.totalorder %v5123_v7, %v602_v59  ;;  %v1380_v12 = vmax.f32 %v1379_v54, %v6474_v49  ;;  %v6500_v54 = vsel %vm6446_vm10, %v5147_v17, -1e+30  ;;  %8708 = vst [vmem:[#allocation114_spill] sm:$0xff] %v6513_v18  ;;  %vm8709_vm10 = vcmp.ge.s32.totalorder %v5127_v10, %v5170_v31 }
 0x225   : > { %vm1064_vm3 = vmand %vm712_vm12, %vm8703_vm7  ;;  %8705 = vst [vmem:[#allocation112_spill] sm:$0xff] %v6500_v54  ;;  %vm8706_vm12 = vcmp.lt.s32.totalorder %v5123_v7, %v5948_v1  ;;  %v8710_v49 = vmov 0  ;;  %vm723_vm9 = vcmp.ge.s32.totalorder %v5127_v10, %v608_v20  ;;  %vm8720_vm7 = vcmp.lt.s32.totalorder %v5106_v61, %v5954_v46 }
 0x226   : > { %vm1065_vm5 = vmand %vm713_vm1, %vm8704_vm8  ;;  %v6489_v32 = vsel %vm1064_vm3, %v5130_v11, -1e+30  ;;  %v1381_v33 = vmax.f32 %v1380_v12, %v6500_v54  ;;  %vm8713_vm8 = vcmp.ge.s32.totalorder %v5127_v10, %v602_v59  ;;  %vm8717_vm1 = vcmp.ge.s32.totalorder %v5106_v61, %v5175_v35 }
 0x227   : > { %vm1066_vm3 = vmand %vm714_vm6, %vm8706_vm12  ;;  %v6506_v24 = vsel %vm1065_vm5, %v5138_v13, -1e+30  ;;  %vm8716_vm5 = vcmp.lt.s32.totalorder %v5106_v61, %v6304_v43  ;;  %v8725_v12 = vmax.f32 %v6176_v19, %v6224_v22  ;;  %v614_v19 = vpop.permute.xlu0 %613  ;;  %v8784_v59 = vmax.f32 %v6397_v6, %v6330_v60 }
 0x228   : > { %8707 = vst [vmem:[#allocation113_spill] sm:$0xff] %v6506_v24  ;;  %vm6523_vm6 = vmand %vm8709_vm10, %vm975_vm14  ;;  %v1389_v31 = vmax.f32 %v6489_v32, %v6506_v24  ;;  %vm720_vm14 = vcmp.ge.s32.totalorder %v5106_v61, %v608_v20  ;;  %v6557_v1 = vsel %vm1066_vm3, %v5142_v15, -1e+30  ;;  %vm722_vm10 = vcmp.ge.s32.totalorder %v5123_v7, %v608_v20  ;;  %1382 = vmax.xlane.f32.xlu0 %v1381_v33 }
 0x229   : > { %v8711_v49 = vsel %vm6523_vm6, 4294967295, %v8710_v49  ;;  %vm6535_vm12 = vmand %vm8713_vm8, %vm8712_vm4  ;;  %vm721_vm8 = vcmp.ge.s32.totalorder %v5118_v2, %v608_v20  ;;  %vm8722_vm3 = vcmp.ge.s32.totalorder %v5118_v2, %v5175_v35  ;;  %1387 = vmax.xlane.f32.xlu1 %v8725_v12  ;;  %v6590_v24 = vsel %vm6338_vm11, %v5147_v17, -1e+30 }
 0x22a   : > { %vm6550_vm2 = vmand %vm8717_vm1, %vm8716_vm5  ;;  %vm8721_vm5 = vcmp.lt.s32.totalorder %v5118_v2, %v6304_v43  ;;  %v1390_v54 = vmax.f32 %v1389_v31, %v6557_v1  ;;  %8728 = vst [vmem:[#allocation116_spill] sm:$0xff] %v6590_v24  ;;  %v6599_v33 = vsel %vm6535_vm12, %v5147_v17, -1e+30  ;;  %v6610_v31 = vmax.f32 %v1424_v27, %v6513_v18 }
 0x22b   : > { %vm1072_vm6 = vmand %vm720_vm14, %vm8720_vm7  ;;  %vm8726_vm7 = vcmp.lt.s32.totalorder %v5118_v2, %v5954_v46  ;;  %vm728_vm15 = vcmp.ge.s32.totalorder %v5106_v61, %v614_v19  ;;  %vm8735_vm12 = vcmp.lt.s32.totalorder %v5106_v61, %v6469_v29  ;;  %vm729_vm11 = vcmp.ge.s32.totalorder %v5118_v2, %v614_v19 }
 0x22c   : > { %vm6573_vm4 = vmand %vm8722_vm3, %vm8721_vm5  ;;  %v6585_v3 = vsel %vm1072_vm6, %v5130_v11, -1e+30  ;;  %vm8729_vm6 = vcmp.lt.s32.totalorder %v5123_v7, %v5954_v46  ;;  %v1391_v12 = vmax.f32 %v1390_v54, %v6599_v33  ;;  %vm731_vm5 = vcmp.ge.s32.totalorder %v5127_v10, %v614_v19 }
 0x22d   : > { %vm1073_vm14 = vmand %vm721_vm8, %vm8726_vm7  ;;  %8727 = vst [vmem:[#allocation115_spill] sm:$0xff] %v6585_v3  ;;  %vm8732_vm7 = vcmp.lt.s32.totalorder %v5127_v10, %v5954_v46  ;;  %vm8740_vm1 = vcmp.lt.s32.totalorder %v5106_v61, %v5950_v58  ;;  %v6684_v18 = vsel %vm6434_vm0, %v5138_v13, -1e+30  ;;  %vm8761_vm3 = vcmp.lt.s32.totalorder %v5106_v61, %v5952_v36 }
 0x22e   : > { %vm1074_vm8 = vmand %vm722_vm10, %vm8729_vm6  ;;  %v6607_v50 = vsel %vm1073_vm14, %v5138_v13, -1e+30  ;;  %vm730_vm6 = vcmp.ge.s32.totalorder %v5123_v7, %v614_v19  ;;  %1392 = vmax.xlane.f32.xlu0 %v1391_v12  ;;  %8748 = vst [vmem:[#allocation121_spill] sm:$0xff] %v6684_v18  ;;  %v1426_v12 = vmax.f32 %v6610_v31, %v6590_v24 }
 0x22f   : > { %8730 = vst [vmem:[#allocation117_spill] sm:$0xff] %v6607_v50  ;;  %vm6629_vm14 = vmand %vm723_vm9, %vm8732_vm7  ;;  %v1399_v28 = vmax.f32 %v6585_v3, %v6607_v50  ;;  %vm8736_vm9 = vcmp.ge.s32.totalorder %v5106_v61, %v5195_v41  ;;  %v6651_v20 = vsel %vm1074_vm8, %v5142_v15, -1e+30  ;;  %vm8742_vm8 = vcmp.ge.s32.totalorder %v5118_v2, %v5195_v41 }
 0x230   : > { %vm6646_vm7 = vmand %vm8736_vm9, %vm8735_vm12  ;;  %8739 = vst [vmem:[#allocation119_spill] sm:$0xff] %v6651_v20  ;;  %vm8741_vm12 = vcmp.lt.s32.totalorder %v5118_v2, %v6469_v29  ;;  %v8745_v50 = vmax.f32 %v6202_v37, %v6279_v25  ;;  %v620_v37 = vpop.permute.xlu0 %619  ;;  %v8913_v25 = vld [vmem:[#allocation48_spill] sm:$0xff] }
 0x231   : > { %vm1080_vm10 = vmand %vm728_vm15, %vm8740_vm1  ;;  %v1400_v3 = vmax.f32 %v1399_v28, %v6651_v20  ;;  %vm8746_vm1 = vcmp.lt.s32.totalorder %v5118_v2, %v5950_v58  ;;  %v6708_v28 = vsel %vm6461_vm13, %v5142_v15, -1e+30  ;;  %vm736_vm13 = vcmp.ge.s32.totalorder %v5106_v61, %v620_v37 }
 0x232   : > { %vm6667_vm9 = vmand %vm8742_vm8, %vm8741_vm12  ;;  %1397 = vmax.xlane.f32.xlu1 %v8745_v50  ;;  %v6679_v22 = vsel %vm1080_vm10, %v5130_v11, -1e+30  ;;  %v6693_v50 = vsel %vm6629_vm14, %v5147_v17, -1e+30  ;;  %8752 = vst [vmem:[#allocation124_spill] sm:$0xff] %v6708_v28  ;;  %vm8753_vm14 = vcmp.lt.s32.totalorder %v5127_v10, %v5950_v58  ;;  %vm738_vm0 = vcmp.ge.s32.totalorder %v5123_v7, %v620_v37 }
 0x233   : > { %vm1081_vm15 = vmand %vm729_vm11, %vm8746_vm1  ;;  %8747 = vst [vmem:[#allocation120_spill] sm:$0xff] %v6679_v22  ;;  %vm8750_vm11 = vcmp.lt.s32.totalorder %v5123_v7, %v5950_v58  ;;  %v1401_v27 = vmax.f32 %v1400_v3, %v6693_v50  ;;  %vm8756_vm1 = vcmp.lt.s32.totalorder %v5123_v7, %v6304_v43  ;;  %vm739_vm12 = vcmp.ge.s32.totalorder %v5127_v10, %v620_v37 }
 0x234   : > { %8749 = vst [vmem:[#allocation122_spill] sm:$0xff] %v6693_v50  ;;  %vm1082_vm10 = vmand %vm730_vm6, %vm8750_vm11  ;;  %v6701_v21 = vsel %vm1081_vm15, %v5138_v13, -1e+30  ;;  %vm8757_vm15 = vcmp.ge.s32.totalorder %v5123_v7, %v5175_v35  ;;  %v1434_v50 = vmax.f32 %v6617_v23, %v6684_v18  ;;  %v626_v14 = vpop.permute.xlu0 %625  ;;  %v6875_v46 = vsel %vm6667_vm9, %v5138_v13, -1e+30 }
 0x235   : > { %8751 = vst [vmem:[#allocation123_spill] sm:$0xff] %v6701_v21  ;;  %vm6718_vm6 = vmand %vm731_vm5, %vm8753_vm14  ;;  %v1409_v31 = vmax.f32 %v6679_v22, %v6701_v21  ;;  %vm990_vm5 = vcmp.lt.s32.totalorder %v5123_v7, %v6469_v29  ;;  %v6738_v58 = vsel %vm1082_vm10, %v5142_v15, -1e+30  ;;  %vm737_vm14 = vcmp.ge.s32.totalorder %v5118_v2, %v620_v37  ;;  %1402 = vmax.xlane.f32.xlu0 %v1401_v27 }
 0x236   : > { %vm6731_vm11 = vmand %vm8757_vm15, %vm8756_vm1  ;;  %8760 = vst [vmem:[#allocation125_spill] sm:$0xff] %v6738_v58  ;;  %1407 = vmax.xlane.f32.xlu1 %v8762_v53  ;;  %vm8763_vm10 = vcmp.lt.s32.totalorder %v5118_v2, %v5952_v36  ;;  %vm8765_vm15 = vnez %v8711_v49  ;;  %v6766_v27 = vsel %vm6718_vm6, %v5147_v17, -1e+30  ;;  %v6777_v49 = vsel %vm6550_vm2, %v5130_v11, -1e+30 }
 0x237   : > { %vm1088_vm8 = vmand %vm736_vm13, %vm8761_vm3  ;;  %v1410_v19 = vmax.f32 %v1409_v31, %v6738_v58  ;;  %v6759_v21 = vsel %vm8765_vm15, %v5147_v17, -1e+30  ;;  %8767 = vst [vmem:[#allocation128_spill] sm:$0xff] %v6766_v27  ;;  %vm8768_vm3 = vcmp.lt.s32.totalorder %v5123_v7, %v5952_v36  ;;  %vm8771_vm6 = vcmp.lt.s32.totalorder %v5127_v10, %v5952_v36 }
 0x238   : > { %vm1089_vm1 = vmand %vm737_vm14, %vm8763_vm10  ;;  %v6754_v22 = vsel %vm1088_vm8, %v5130_v11, -1e+30  ;;  %8766 = vst [vmem:[#allocation127_spill] sm:$0xff] %v6759_v21  ;;  %vm976_vm8 = vcmp.lt.s32.totalorder %v5106_v61, %v5987_v9  ;;  %vm744_vm2 = vcmp.ge.s32.totalorder %v5106_v61, %v626_v14  ;;  %vm8775_vm10 = vcmp.ge.s32.totalorder %v5127_v10, %v5175_v35 }
 0x239   : > { %8764 = vst [vmem:[#allocation126_spill] sm:$0xff] %v6754_v22  ;;  %vm1090_vm13 = vmand %vm738_vm0, %vm8768_vm3  ;;  %v6772_v31 = vsel %vm1089_vm1, %v5138_v13, -1e+30  ;;  %v1411_v53 = vmax.f32 %v1410_v19, %v6766_v27  ;;  %vm8774_vm0 = vcmp.lt.s32.totalorder %v5127_v10, %v6304_v43  ;;  %v6807_v36 = vsel %vm6573_vm4, %v5138_v13, -1e+30  ;;  %1417 = vmax.xlane.f32.xlu0 %v8784_v59 }
 0x23a   : > { %8769 = vst [vmem:[#allocation129_spill] sm:$0xff] %v6772_v31  ;;  %8770 = vst [vmem:[#allocation130_spill] sm:$0xff] %v6777_v49  ;;  %v1419_v58 = vmax.f32 %v6754_v22, %v6772_v31  ;;  %v6820_v35 = vsel %vm1090_vm13, %v5142_v15, -1e+30  ;;  %vm745_vm3 = vcmp.ge.s32.totalorder %v5118_v2, %v626_v14  ;;  %vm747_vm4 = vcmp.ge.s32.totalorder %v5127_v10, %v626_v14  ;;  %v632_v31 = vpop.permute.xlu0 %631 }
 0x23b   : > { %vm6787_vm14 = vmand %vm739_vm12, %vm8771_vm6  ;;  %8778 = vst [vmem:[#allocation131_spill] sm:$0xff] %v6807_v36  ;;  %vm8779_vm12 = vcmp.ge.s32.totalorder %v5123_v7, %v5195_v41  ;;  %vm746_vm6 = vcmp.ge.s32.totalorder %v5123_v7, %v626_v14  ;;  %1412 = vmax.xlane.f32.xlu1 %v1411_v53  ;;  %v1435_v19 = vmax.f32 %v1434_v50, %v6708_v28  ;;  %v6857_v53 = vsel %vm6646_vm7, %v5130_v11, -1e+30 }
 0x23c   : > { %vm6800_vm1 = vmand %vm8775_vm10, %vm8774_vm0  ;;  %8782 = vst [vmem:[#allocation132_spill] sm:$0xff] %v6820_v35  ;;  %vm8783_vm0 = vcmp.lt.s32.totalorder %v5106_v61, %v5958_v47  ;;  %v1420_v37 = vmax.f32 %v1419_v58, %v6820_v35  ;;  %v6844_v6 = vsel %vm6787_vm14, %v5147_v17, -1e+30  ;;  %v1444_v58 = vmax.f32 %v6777_v49, %v6807_v36 }
 0x23d   : > { %vm6815_vm15 = vmand %vm8779_vm12, %vm990_vm5  ;;  %vm8785_vm5 = vcmp.lt.s32.totalorder %v5118_v2, %v5958_v47  ;;  %vm977_vm12 = vcmp.lt.s32.totalorder %v5118_v2, %v5987_v9  ;;  %8787 = vst [vmem:[#allocation134_spill] sm:$0xff] %v6844_v6  ;;  %vm8791_vm14 = vcmp.lt.s32.totalorder %v5127_v10, %v5958_v47  ;;  %vm753_vm7 = vcmp.ge.s32.totalorder %v5118_v2, %v632_v31 }
 0x23e   : > { %vm1096_vm10 = vmand %vm744_vm2, %vm8783_vm0  ;;  %vm8788_vm2 = vcmp.lt.s32.totalorder %v5123_v7, %v5958_v47  ;;  %8790 = vst [vmem:[#allocation136_spill] sm:$0xff] %v6857_v53  ;;  %v1421_v59 = vmax.f32 %v1420_v37, %v6844_v6  ;;  %vm978_vm9 = vcmp.lt.s32.totalorder %v5123_v7, %v5987_v9  ;;  %v1436_v14 = vmax.f32 %v1435_v19, %v6759_v21 }
 0x23f   : > { %vm1097_vm13 = vmand %vm745_vm3, %vm8785_vm5  ;;  %v6837_v22 = vsel %vm1096_vm10, %v5130_v11, -1e+30  ;;  %8794 = vst [vmem:[#allocation137_spill] sm:$0xff] %v6875_v46  ;;  %vm755_vm10 = vcmp.ge.s32.totalorder %v5127_v10, %v632_v31  ;;  %1427 = vmax.xlane.f32.xlu1 %v1426_v12  ;;  %v1454_v20 = vmax.f32 %v6857_v53, %v6875_v46  ;;  %v8883_v46 = vld [vmem:[#allocation47_spill] sm:$0xff] }
 0x240   : > { %8786 = vst [vmem:[#allocation133_spill] sm:$0xff] %v6837_v22  ;;  %vm1098_vm0 = vmand %vm746_vm6, %vm8788_vm2  ;;  %v6850_v50 = vsel %vm1097_vm13, %v5138_v13, -1e+30  ;;  %vm752_vm6 = vcmp.ge.s32.totalorder %v5106_v61, %v632_v31  ;;  %1422 = vmax.xlane.f32.xlu0 %v1421_v59  ;;  %vm979_vm13 = vcmp.lt.s32.totalorder %v5127_v10, %v5987_v9 }
 0x241   : > { %8789 = vst [vmem:[#allocation135_spill] sm:$0xff] %v6850_v50  ;;  %vm6865_vm3 = vmand %vm747_vm4, %vm8791_vm14  ;;  %v1429_v35 = vmax.f32 %v6837_v22, %v6850_v50  ;;  %v6878_v37 = vsel %vm1098_vm0, %v5142_v15, -1e+30  ;;  %vm754_vm4 = vcmp.ge.s32.totalorder %v5123_v7, %v632_v31  ;;  %v6928_v31 = vsel %vm6800_vm1, %v5147_v17, -1e+30  ;;  %v8872_v50 = vld [vmem:[#allocation14_spill] sm:$0xff] }
 0x242   : > { %8795 = vst [vmem:[#allocation138_spill] sm:$0xff] %v6878_v37  ;;  %vm1104_vm5 = vmand %vm752_vm6, %vm976_vm8  ;;  %v6901_v12 = vsel %vm6865_vm3, %v5147_v17, -1e+30  ;;  %vm767_vm0 = vcmp.ge.s32.totalorder %v5127_v10, %v5195_v41  ;;  %vm772_vm3 = vcmp.ge.s32.totalorder %v5106_v61, %v5228_v57  ;;  %vm773_vm6 = vcmp.ge.s32.totalorder %v5118_v2, %v5228_v57 }
 0x243   : > { %v1430_v47 = vmax.f32 %v1429_v35, %v6878_v37  ;;  %vm1105_vm2 = vmand %vm753_vm7, %vm977_vm12  ;;  %v6895_v54 = vsel %vm1104_vm5, %v5130_v11, -1e+30  ;;  %8797 = vst [vmem:[#allocation140_spill] sm:$0xff] %v6901_v12  ;;  %v6906_v35 = vsel %vm6731_vm11, %v5142_v15, -1e+30  ;;  %vm991_vm11 = vcmp.lt.s32.totalorder %v5127_v10, %v6469_v29  ;;  %1437 = vmax.xlane.f32.xlu1 %v1436_v14 }
 0x244   : > { %8796 = vst [vmem:[#allocation139_spill] sm:$0xff] %v6895_v54  ;;  %8798 = vst [vmem:[#allocation141_spill] sm:$0xff] %v6906_v35  ;;  %v6909_v59 = vsel %vm1105_vm2, %v5138_v13, -1e+30  ;;  %v1445_v37 = vmax.f32 %v1444_v58, %v6906_v35  ;;  %v6938_v29 = vsel %vm6815_vm15, %v5142_v15, -1e+30  ;;  %vm774_vm5 = vcmp.ge.s32.totalorder %v5123_v7, %v5228_v57 }
 0x245   : > { %vm1106_vm8 = vmand %vm754_vm4, %vm978_vm9  ;;  %8799 = vst [vmem:[#allocation142_spill] sm:$0xff] %v6909_v59  ;;  %v1431_v9 = vmax.f32 %v1430_v47, %v6901_v12  ;;  %v1439_v19 = vmax.f32 %v6895_v54, %v6909_v59  ;;  %vm775_vm2 = vcmp.ge.s32.totalorder %v5127_v10, %v5228_v57 }
 0x246   : > { %vm1107_vm12 = vmand %vm755_vm10, %vm979_vm13  ;;  %v6920_v3 = vsel %vm1106_vm8, %v5142_v15, -1e+30  ;;  %8801 = vst [vmem:[#allocation144_spill] sm:$0xff] %v6928_v31  ;;  %v1446_v14 = vmax.f32 %v1445_v37, %v6928_v31  ;;  %v4187_v37 = vld [vmem:[%s4866_s11 + $0x40] sm:$0xff]   ;;  %vm8809_vm8 = vcmask 7168  }
 0x247   : > { %8800 = vst [vmem:[#allocation143_spill] sm:$0xff] %v6920_v3  ;;  %1432 = vmax.xlane.f32.xlu0 %v1431_v9  ;;  %v1440_v58 = vmax.f32 %v1439_v19, %v6920_v3  ;;  %v6931_v47 = vsel %vm1107_vm12, %v5147_v17, -1e+30  ;;  %8803 = vst [vmem:[#allocation146_spill] sm:$0xff] %v6938_v29  ;;  %v1455_v9 = vmax.f32 %v1454_v20, %v6938_v29  ;;  %v4188_v19 = vld [vmem:[%s4866_s11 + $0xc0] sm:$0xff]   ;;  %3877 = vmatprep.subr.bf16.mxu0 %v4187_v37  ;;  %v4196_v37 = vld [vmem:[%s4866_s11 + $0xd0] sm:$0xff]  }
 0x248   : > { %8802 = vst [vmem:[#allocation145_spill] sm:$0xff] %v6931_v47  ;;  %vm1119_vm14 = vmand %vm767_vm0, %vm991_vm11  ;;  %1447 = vmax.xlane.f32.xlu1 %v1446_v14  ;;  %v4190_v20 = vld [vmem:[%s4866_s11 + $0x80] sm:$0xff]   ;;  %3989 = vmatprep.subr.bf16.mxu1 %v4188_v19  ;;  %v4191_v14 = vld [vmem:[%s4866_s11 + $0x48] sm:$0xff]  }
 0x249   : > { %v1441_v8 = vmax.f32 %v1440_v58, %v6931_v47  ;;  %v6944_v41 = vsel %vm1119_vm14, %v5147_v17, -1e+30  ;;  %v4189_v58 = vld [vmem:[%s4866_s11] sm:$0xff]   ;;  %3990 = vmatpush3.bf16.msra.mxu1 %v4190_v20  ;;  %v4197_v19 = vld [vmem:[%s4866_s11 + $0x10] sm:$0xff]   ;;  %v4200_v20 = vld [vmem:[%s4866_s11 + $0xd8] sm:$0xff]  }
 0x24a   : > { %8804 = vst [vmem:[#allocation147_spill] sm:$0xff] %v6944_v41  ;;  %v1456_v43 = vmax.f32 %v1455_v9, %v6944_v41  ;;  %3878 = vmatpush3.bf16.msra.mxu0 %v4189_v58  ;;  %v4193_v9 = vld [vmem:[%s4866_s11 + $0x8] sm:$0xff]   ;;  %v4198_v58 = vld [vmem:[%s4866_s11 + $0x90] sm:$0xff]   ;;  %vm8815_vm11 = vmmov %vm8809_vm8 }
 0x24b   : > { %1442 = vmax.xlane.f32.xlu0 %v1441_v8  ;;  %v4192_v8 = vld [vmem:[%s4866_s11 + $0xc8] sm:$0xff]   ;;  %3879 = vmatprep.subr.bf16.mxu0 %v4191_v14  ;;  %v4201_v14 = vld [vmem:[%s4866_s11 + $0x18] sm:$0xff]   ;;  %vm8819_vm0 = vmmov %vm8809_vm8 }
 0x24c   : > { %1457 = vmax.xlane.f32.xlu1 %v1456_v43  ;;  %v4194_v43 = vld [vmem:[%s4866_s11 + $0x88] sm:$0xff]   ;;  %3991 = vmatprep.subr.bf16.mxu1 %v4192_v8  ;;  %v4202_v8 = vld [vmem:[%s4866_s11 + $0x98] sm:$0xff]   ;;  %vm8820_vm14 = vmmov %vm8819_vm0 }
 0x24d   : > { %3992 = vmatpush3.bf16.msra.mxu1 %v4194_v43  ;;  %v4204_v43 = vld [vmem:[%s4866_s11 + $0xe0] sm:$0xff]   ;;  %v7107_v3 = vld [vmem:[#allocation2 + $0xc8] sm:$0xff] }
 0x24e   : > { %3880 = vmatpush3.bf16.msra.mxu0 %v4193_v9  ;;  %3993 = vmatprep.subr.bf16.mxu1 %v4196_v37  ;;  %v4203_v9 = vld [vmem:[%s4866_s11 + $0x60] sm:$0xff]   ;;  %8841 = vst [vmem:[#allocation174_spill] sm:$0xff] %v7107_v3  ;;  %v8862_v47 = vld [vmem:[#allocation31_spill] sm:$0xff] }
 0x24f   : > { %v4206_v37 = vld [vmem:[%s4866_s11 + $0xa0] sm:$0xff]   ;;  %v8873_v41 = vld [vmem:[#allocation15_spill] sm:$0xff] }
 0x251   : > { %3994 = vmatpush3.bf16.msra.mxu1 %v4198_v58  ;;  %v4208_v58 = vld [vmem:[%s4866_s11 + $0xe8] sm:$0xff]  }
 0x252   : > { %3995 = vmatprep.subr.bf16.mxu1 %v4200_v20  ;;  %v4210_v20 = vld [vmem:[%s4866_s11 + $0xa8] sm:$0xff]  }
 0x255   : > { %3996 = vmatpush3.bf16.msra.mxu1 %v4202_v8  ;;  %v4212_v8 = vld [vmem:[%s4866_s11 + $0xf0] sm:$0xff]  }
 0x256   : > { %3997 = vmatprep.subr.bf16.mxu1 %v4204_v43  ;;  %v4214_v43 = vld [vmem:[%s4866_s11 + $0xb0] sm:$0xff]  }
 0x259   : > { %3998 = vmatpush3.bf16.msra.mxu1 %v4206_v37  ;;  %v4215_v37 = vld [vmem:[%s4866_s11 + $0x78] sm:$0xff]  }
 0x25a   : > { %3999 = vmatprep.subr.bf16.mxu1 %v4208_v58  ;;  %v4218_v58 = vld [vmem:[%s4866_s11 + $0xb8] sm:$0xff]  }
 0x25d   : > { %1604 = vperm.xlu1 %4186, %v5842_v55   ;;  %4000 = vmatpush3.bf16.msra.mxu1 %v4210_v20 }
 0x25e   : > { %4001 = vmatprep.subr.bf16.mxu1 %v4212_v8 }
 0x261   : > { %637 = vperm.xlu0 %4185, %v5821_v40   ;;  %1609 = vperm.xlu1 %4186, %v5851_v4   ;;  %v4195_v40 = vld [vmem:[%s4866_s11 + $0x50] sm:$0xff]  }
 0x262   : > { %3881 = vmatprep.subr.bf16.mxu0 %v4195_v40  ;;  %v4205_v40 = vld [vmem:[%s4866_s11 + $0x20] sm:$0xff]   ;;  %4002 = vmatpush3.bf16.msra.mxu1 %v4214_v43 }
 0x263   : > { %3882 = vmatpush3.bf16.msra.mxu0 %v4197_v19  ;;  %v4207_v19 = vld [vmem:[%s4866_s11 + $0x68] sm:$0xff]  }
 0x265   : > { %643 = vperm.xlu0 %4185, %v5827_v42   ;;  %1614 = vperm.xlu1 %4186, %v5854_v30   ;;  %v4199_v42 = vld [vmem:[%s4866_s11 + $0x58] sm:$0xff]  }
 0x266   : > { %3883 = vmatprep.subr.bf16.mxu0 %v4199_v42  ;;  %v4209_v42 = vld [vmem:[%s4866_s11 + $0x28] sm:$0xff]  }
 0x267   : > { %3884 = vmatpush3.bf16.msra.mxu0 %v4201_v14  ;;  %v4211_v14 = vld [vmem:[%s4866_s11 + $0x70] sm:$0xff]  }
 0x268   : > { %3885 = vmatprep.subr.bf16.mxu0 %v4203_v9  ;;  %v4213_v9 = vld [vmem:[%s4866_s11 + $0x30] sm:$0xff]  }
 0x269   : > { %1599 = vperm.xlu0 %4185, %v5835_v48   ;;  %1629 = vperm.xlu1 %4186, %v5879_v56   ;;  %v7035_v56 = vld [vmem:[#allocation2 + $0x70] sm:$0xff] }
 0x26a   : > { %8814 = vst [vmem:[#allocation156_spill] sm:$0xff] %v7035_v56 }
 0x26b   : > { %3886 = vmatpush3.bf16.msra.mxu0 %v4205_v40  ;;  %v871_v40 = vpop.permute.xlu1 %870 }
 0x26c   : > { %3887 = vmatprep.subr.bf16.mxu0 %v4207_v19  ;;  %vm996_vm1 = vcmp.lt.s32.totalorder %v5106_v61, %v871_v40  ;;  %vm997_vm15 = vcmp.lt.s32.totalorder %v5118_v2, %v871_v40  ;;  %v4217_v19 = vld [vmem:[%s4866_s11 + $0x38] sm:$0xff]   ;;  %vm998_vm10 = vcmp.lt.s32.totalorder %v5123_v7, %v871_v40  ;;  %vm999_vm13 = vcmp.lt.s32.totalorder %v5127_v10, %v871_v40 }
 0x26d   : > { %1619 = vperm.xlu0 %4185, %v5865_v38   ;;  %1634 = vperm.xlu1 %4186, %v5882_v34   ;;  %vm1124_vm7 = vmand %vm772_vm3, %vm996_vm1 }
 0x26e   : > { %vm1125_vm4 = vmand %vm773_vm6, %vm997_vm15 }
 0x26f   : > { %3888 = vmatpush3.bf16.msra.mxu0 %v4209_v42  ;;  %v7001_v42 = vsel %vm1124_vm7, %v5130_v11, -1e+30  ;;  %v7004_v20 = vsel %vm1125_vm4, %v5138_v13, -1e+30  ;;  %vm1126_vm9 = vmand %vm774_vm5, %vm998_vm10 }
 0x270   : > { %3889 = vmatprep.subr.bf16.mxu0 %v4211_v14  ;;  %8805 = vst [vmem:[#allocation148_spill] sm:$0xff] %v7001_v42  ;;  %8806 = vst [vmem:[#allocation149_spill] sm:$0xff] %v7004_v20  ;;  %v7008_v14 = vld [vmem:[#allocation2 + $0x68] sm:$0xff]  ;;  %v7019_v43 = vsel %vm1126_vm9, %v5142_v15, -1e+30 }
 0x271   : > { %1624 = vperm.xlu0 %4185, %v5868_v63   ;;  %1649 = vperm.xlu1 %4186, %v5907_v5   ;;  %v4216_v5 = vld [vmem:[%s4866_s11 + $0xf8] sm:$0xff]   ;;  %8807 = vst [vmem:[#allocation150_spill] sm:$0xff] %v7008_v14  ;;  %8808 = vst [vmem:[#allocation151_spill] sm:$0xff] %v7019_v43  ;;  %v7109_v63 = vld [vmem:[#allocation2 + $0xc0] sm:$0xff] }
 0x272   : > { %4003 = vmatprep.subr.bf16.mxu1 %v4216_v5  ;;  %v1464_v5 = vmax.f32 %v7001_v42, %v7004_v20  ;;  %vm1127_vm12 = vmand %vm775_vm2, %vm999_vm13  ;;  %8842 = vst [vmem:[#allocation175_spill] sm:$0xff] %v7109_v63  ;;  %v8870_v20 = vld [vmem:[#allocation22_spill] sm:$0xff]  ;;  %v8871_v42 = vld [vmem:[#allocation23_spill] sm:$0xff] }
 0x273   : > { %3890 = vmatpush3.bf16.msra.mxu0 %v4213_v9  ;;  %4004 = vmatpush3.bf16.msra.mxu1 %v4218_v58  ;;  %v7028_v58 = vld [vmem:[#allocation2 + $0x60] sm:$0xff]  ;;  %vm8825_vm1 = vmmov %vm8819_vm0 }
 0x274   : > { %3891 = vmatprep.subr.bf16.mxu0 %v4215_v37  ;;  %v1465_v37 = vmax.f32 %v1464_v5, %v7019_v43  ;;  %8811 = vst [vmem:[#allocation153_spill] sm:$0xff] %v7028_v58  ;;  %vm8826_vm15 = vmmov %vm8819_vm0 }
 0x275   : > { %1639 = vperm.xlu0 %4185, %v5893_v52   ;;  %1654 = vperm.xlu1 %4186, %v5910_v44   ;;  %v7033_v52 = vld [vmem:[#allocation2 + $0x78] sm:$0xff]  ;;  %v7076_v44 = vld [vmem:[#allocation2 + $0xa0] sm:$0xff]  ;;  %vm8831_vm3 = vmmov %vm8819_vm0 }
 0x276   : > { %8813 = vst [vmem:[#allocation155_spill] sm:$0xff] %v7033_v52  ;;  %8829 = vst [vmem:[#allocation166_spill] sm:$0xff] %v7076_v44 }
 0x277   : > { %3892 = vmatpush3.bf16.msra.mxu0 %v4217_v19  ;;  %v7025_v19 = vsel %vm1127_vm12, %v5147_v17, -1e+30  ;;  %vm8832_vm6 = vmmov %vm8819_vm0 }
 0x278   : > { %8810 = vst [vmem:[#allocation152_spill] sm:$0xff] %v7025_v19  ;;  %v1466_v40 = vmax.f32 %v1465_v37, %v7025_v19  ;;  %vm8837_vm7 = vmmov %vm8819_vm0  ;;  %v7126_v19 = vld [vmem:[#allocation2 + $0xd0] sm:$0xff] }
 0x279   : > { %1644 = vperm.xlu0 %4185, %v5896_v0   ;;  %v7078_v0 = vld [vmem:[#allocation2 + $0xa8] sm:$0xff]  ;;  %vm8838_vm4 = vmmov %vm8819_vm0  ;;  %8848 = vst [vmem:[#allocation179_spill] sm:$0xff] %v7126_v19 }
 0x27a   : > { %8830 = vst [vmem:[#allocation167_spill] sm:$0xff] %v7078_v0  ;;  %vm8843_vm10 = vmmov %vm8819_vm0 }
 0x27b   : > { %vm8844_vm5 = vmmov %vm8819_vm0 }
 0x27c   : > { %vm8849_vm9 = vmmov %vm8819_vm0 }
 0x27d   : > { %vm8850_vm13 = vmmov %vm8819_vm0 }
 0x27e   : > { %vm8854_vm2 = vmmov %vm8819_vm0 }
 0x27f   : > { %vm8857_vm12 = vmmov %vm8819_vm0 }
 0x286   : > { %v1378_v8 = vpop.xlane.xlu0 %1377 }
 0x287   : > { %v7014_v9 = vmax.f32 %v7008_v14, %v1378_v8  ;;  %v7047_v14 = vld [vmem:[#allocation2 + $0x80] sm:$0xff] }
 0x288   : > { %8818 = vst [vmem:[#allocation159_spill] sm:$0xff] %v7047_v14 }
 0x289   : > { %3309 = vst.msk [vmem:[#allocation2 + $0x68] sm:$0xff] %vm8809_vm8, %v7014_v9  ;;  %vm8855_vm8 = vmmov %vm8819_vm0 }
 0x299   : > { %1467 = vmax.xlane.f32.xlu1 %v1466_v40  ;;  %v7045_v40 = vld [vmem:[#allocation2 + $0x88] sm:$0xff] }
 0x29a   : > { %8817 = vst [vmem:[#allocation158_spill] sm:$0xff] %v7045_v40 }
 0x2af   : > { %v1373_v8 = vpop.xlane.xlu1 %1372 }
 0x2b0   : > { %v7031_v57 = vmax.f32 %v7028_v58, %v1373_v8 }
 0x2b2   : > { %8812 = vst [vmem:[#allocation154_spill] sm:$0xff] %v7031_v57  ;;  %3308 = vst.msk [vmem:[#allocation2 + $0x60] sm:$0xff] %vm8815_vm11, %v7031_v57 }
 0x2b5   : > { %v1383_v38 = vpop.xlane.xlu0 %1382 }
 0x2b6   : > { %v1388_v5 = vpop.xlane.xlu1 %1387  ;;  %v7043_v37 = vmax.f32 %v7035_v56, %v1383_v38  ;;  %v7059_v38 = vld [vmem:[#allocation2 + $0x98] sm:$0xff]  ;;  %v7061_v56 = vld [vmem:[#allocation2 + $0x90] sm:$0xff] }
 0x2b7   : > { %v7040_v48 = vmax.f32 %v7033_v52, %v1388_v5  ;;  %8823 = vst [vmem:[#allocation162_spill] sm:$0xff] %v7059_v38  ;;  %8824 = vst [vmem:[#allocation163_spill] sm:$0xff] %v7061_v56 }
 0x2b8   : > { %8816 = vst [vmem:[#allocation157_spill] sm:$0xff] %v7043_v37  ;;  %3310 = vst.msk [vmem:[#allocation2 + $0x70] sm:$0xff] %vm8820_vm14, %v7043_v37  ;;  %vm985_vm14 = vcmp.lt.s32.totalorder %v5118_v2, %v6031_v62 }
 0x2b9   : > { %3311 = vst.msk [vmem:[#allocation2 + $0x78] sm:$0xff] %vm8819_vm0, %v7040_v48  ;;  %vm984_vm0 = vcmp.lt.s32.totalorder %v5106_v61, %v6031_v62 }
 0x2bb   : > { %v1393_v58 = vpop.xlane.xlu0 %1392 }
 0x2bc   : > { %v7057_v5 = vmax.f32 %v7047_v14, %v1393_v58 }
 0x2be   : > { %8822 = vst [vmem:[#allocation161_spill] sm:$0xff] %v7057_v5  ;;  %3312 = vst.msk [vmem:[#allocation2 + $0x80] sm:$0xff] %vm8826_vm15, %v7057_v5  ;;  %1679 = vperm.xlu1 %4186, %v7057_v5  }
 0x2bf   : > { %v1398_v8 = vpop.xlane.xlu1 %1397 }
 0x2c0   : > { %v7054_v30 = vmax.f32 %v7045_v40, %v1398_v8 }
 0x2c2   : > { %8821 = vst [vmem:[#allocation160_spill] sm:$0xff] %v7054_v30  ;;  %3313 = vst.msk [vmem:[#allocation2 + $0x88] sm:$0xff] %vm8825_vm1, %v7054_v30  ;;  %v1403_v40 = vpop.xlane.xlu0 %1402  ;;  %vm986_vm1 = vcmp.lt.s32.totalorder %v5123_v7, %v6031_v62 }
 0x2c3   : > { %v1408_v8 = vpop.xlane.xlu1 %1407  ;;  %v7074_v4 = vmax.f32 %v7061_v56, %v1403_v40  ;;  %v7090_v40 = vld [vmem:[#allocation2 + $0xb8] sm:$0xff]  ;;  %v7092_v56 = vld [vmem:[#allocation2 + $0xb0] sm:$0xff] }
 0x2c4   : > { %v7071_v58 = vmax.f32 %v7059_v38, %v1408_v8  ;;  %8835 = vst [vmem:[#allocation170_spill] sm:$0xff] %v7090_v40  ;;  %8836 = vst [vmem:[#allocation171_spill] sm:$0xff] %v7092_v56 }
 0x2c5   : > { %8828 = vst [vmem:[#allocation165_spill] sm:$0xff] %v7074_v4  ;;  %3314 = vst.msk [vmem:[#allocation2 + $0x90] sm:$0xff] %vm8832_vm6, %v7074_v4 }
 0x2c6   : > { %8827 = vst [vmem:[#allocation164_spill] sm:$0xff] %v7071_v58  ;;  %3315 = vst.msk [vmem:[#allocation2 + $0x98] sm:$0xff] %vm8831_vm3, %v7071_v58  ;;  %v1418_v5 = vpop.xlane.xlu0 %1417 }
 0x2c7   : > { %v7088_v8 = vmax.f32 %v7078_v0, %v1418_v5  ;;  %v7124_v0 = vld [vmem:[#allocation2 + $0xd8] sm:$0xff] }
 0x2c8   : > { %v1413_v52 = vpop.xlane.xlu1 %1412  ;;  %8847 = vst [vmem:[#allocation178_spill] sm:$0xff] %v7124_v0 }
 0x2c9   : > { %v7085_v14 = vmax.f32 %v7076_v44, %v1413_v52  ;;  %8834 = vst [vmem:[#allocation169_spill] sm:$0xff] %v7088_v8  ;;  %3317 = vst.msk [vmem:[#allocation2 + $0xa8] sm:$0xff] %vm8838_vm4, %v7088_v8  ;;  %1704 = vperm.xlu1 %4186, %v7088_v8  }
 0x2cb   : > { %8833 = vst [vmem:[#allocation168_spill] sm:$0xff] %v7085_v14  ;;  %3316 = vst.msk [vmem:[#allocation2 + $0xa0] sm:$0xff] %vm8837_vm7, %v7085_v14  ;;  %vm987_vm7 = vcmp.lt.s32.totalorder %v5127_v10, %v6031_v62  ;;  %v8882_v62 = vld [vmem:[#allocation43_spill] sm:$0xff] }
 0x2cc   : > { %v1428_v52 = vpop.xlane.xlu1 %1427 }
 0x2cd   : > { %v1423_v44 = vpop.xlane.xlu0 %1422  ;;  %v7102_v5 = vmax.f32 %v7090_v40, %v1428_v52  ;;  %v7141_v40 = vld [vmem:[#allocation2 + $0xe8] sm:$0xff] }
 0x2ce   : > { %v7105_v34 = vmax.f32 %v7092_v56, %v1423_v44  ;;  %8853 = vst [vmem:[#allocation182_spill] sm:$0xff] %v7141_v40 }
 0x2cf   : > { %8839 = vst [vmem:[#allocation172_spill] sm:$0xff] %v7102_v5  ;;  %3319 = vst.msk [vmem:[#allocation2 + $0xb8] sm:$0xff] %vm8843_vm10, %v7102_v5  ;;  %1714 = vperm.xlu1 %4186, %v7102_v5  }
 0x2d0   : > { %8840 = vst [vmem:[#allocation173_spill] sm:$0xff] %v7105_v34  ;;  %3318 = vst.msk [vmem:[#allocation2 + $0xb0] sm:$0xff] %vm8844_vm5, %v7105_v34  ;;  %v1438_v52 = vpop.xlane.xlu1 %1437 }
 0x2d1   : > { %v7119_v44 = vmax.f32 %v7107_v3, %v1438_v52 }
 0x2d3   : > { %8845 = vst [vmem:[#allocation176_spill] sm:$0xff] %v7119_v44  ;;  %3321 = vst.msk [vmem:[#allocation2 + $0xc8] sm:$0xff] %vm8849_vm9, %v7119_v44  ;;  %1724 = vperm.xlu1 %4186, %v7119_v44  }
 0x2d4   : > { %v1433_v8 = vpop.xlane.xlu0 %1432 }
 0x2d5   : > { %v7122_v56 = vmax.f32 %v7109_v63, %v1433_v8  ;;  %v1448_v52 = vpop.xlane.xlu1 %1447 }
 0x2d6   : > { %v7136_v8 = vmax.f32 %v7124_v0, %v1448_v52 }
 0x2d7   : > { %8846 = vst [vmem:[#allocation177_spill] sm:$0xff] %v7122_v56  ;;  %3320 = vst.msk [vmem:[#allocation2 + $0xc0] sm:$0xff] %vm8850_vm13, %v7122_v56 }
 0x2d8   : > { %v1443_v5 = vpop.xlane.xlu0 %1442  ;;  %8851 = vst [vmem:[#allocation180_spill] sm:$0xff] %v7136_v8  ;;  %3323 = vst.msk [vmem:[#allocation2 + $0xd8] sm:$0xff] %vm8854_vm2, %v7136_v8  ;;  %1734 = vperm.xlu1 %4186, %v7136_v8  }
 0x2d9   : > { %v7139_v63 = vmax.f32 %v7126_v19, %v1443_v5  ;;  %v1458_v44 = vpop.xlane.xlu1 %1457 }
 0x2da   : > { %v7151_v52 = vmax.f32 %v7141_v40, %v1458_v44 }
 0x2db   : > { %8852 = vst [vmem:[#allocation181_spill] sm:$0xff] %v7139_v63  ;;  %3322 = vst.msk [vmem:[#allocation2 + $0xd0] sm:$0xff] %vm8855_vm8, %v7139_v63 }
 0x2dc   : > { %8856 = vst [vmem:[#allocation183_spill] sm:$0xff] %v7151_v52  ;;  %3325 = vst.msk [vmem:[#allocation2 + $0xe8] sm:$0xff] %vm8857_vm12, %v7151_v52  ;;  %1744 = vperm.xlu1 %4186, %v7151_v52  }
 0x2dd   : > { %v1605_v38 = vpop.permute.xlu1 %1604 }
 0x2de   : > { %v1761_v0 = vsub.f32 %v5362_v51, %v1605_v38  ;;  %v1762_v3 = vsub.f32 %v5384_v45, %v1605_v38  ;;  %v1763_v8 = vsub.f32 %v5430_v26, %v1605_v38  ;;  %v1764_v44 = vsub.f32 %v5474_v39, %v1605_v38  ;;  %v8861_v38 = vld [vmem:[#allocation29_spill] sm:$0xff] }
 0x2e0   : > { %v7158_v19 = vpop.permute.xlu0 %637  ;;  %v1893_v5 = vmul.f32 1.442695, %v1761_v0  ;;  %v1895_v40 = vmul.f32 1.442695, %v1762_v3  ;;  %v1897_v52 = vmul.f32 1.442695, %v1763_v8 }
 0x2e1   : > { %vm760_vm11 = vcmp.ge.s32.totalorder %v5106_v61, %v7158_v19  ;;  %v1899_v51 = vmul.f32 1.442695, %v1764_v44  ;;  %vm761_vm15 = vcmp.ge.s32.totalorder %v5118_v2, %v7158_v19  ;;  %v1610_v39 = vpop.permute.xlu1 %1609  ;;  %v8860_v0 = vld [vmem:[#allocation26_spill] sm:$0xff]  ;;  %vm762_vm6 = vcmp.ge.s32.totalorder %v5123_v7, %v7158_v19 }
 0x2e2   : > { %4219 = vpow2.f32 %v1893_v5  ;;  %vm7176_vm3 = vmand %vm760_vm11, %vm984_vm0  ;;  %v1765_v3 = vsub.f32 %v8860_v0, %v1610_v39  ;;  %v1766_v8 = vsub.f32 %v8861_v38, %v1610_v39  ;;  %v1767_v54 = vsub.f32 %v8862_v47, %v1610_v39  ;;  %v8863_v44 = vld [vmem:[#allocation34_spill] sm:$0xff]  ;;  %v8867_v0 = vld [vmem:[#allocation92_spill] sm:$0xff] }
 0x2e3   : > { %4221 = vpow2.f32 %v1895_v40  ;;  %v1768_v59 = vsub.f32 %v8863_v44, %v1610_v39  ;;  %vm763_vm4 = vcmp.ge.s32.totalorder %v5127_v10, %v7158_v19  ;;  %vm7196_vm10 = vmand %vm761_vm15, %vm985_vm14  ;;  %vm992_vm9 = vcmp.lt.s32.totalorder %v5106_v61, %v8867_v0  ;;  %v8868_v38 = vld [vmem:[#allocation18_spill] sm:$0xff]  ;;  %v8869_v44 = vld [vmem:[#allocation19_spill] sm:$0xff] }
 0x2e4   : > { %v7174_v45 = vpop.permute.xlu0 %643  ;;  %4223 = vpow2.f32 %v1897_v52  ;;  %v1901_v5 = vmul.f32 1.442695, %v1765_v3  ;;  %v1903_v43 = vmul.f32 1.442695, %v1766_v8  ;;  %v1905_v40 = vmul.f32 1.442695, %v1767_v54  ;;  %vm1114_vm2 = vmand %vm762_vm6, %vm986_vm1 }
 0x2e5   : > { %4225 = vpow2.f32 %v1899_v51  ;;  %vm768_vm5 = vcmp.ge.s32.totalorder %v5106_v61, %v7174_v45  ;;  %v1615_v52 = vpop.permute.xlu1 %1614  ;;  %v7205_v51 = vsel %vm7176_vm3, %v5130_v11, -1e+30  ;;  %v1907_v3 = vmul.f32 1.442695, %v1768_v59  ;;  %vm7249_vm0 = vmand %vm763_vm4, %vm987_vm7 }
 0x2e6   : > { %8866 = vst [vmem:[#allocation26_spill] sm:$0xff] %v7205_v51  ;;  %v1769_v8 = vsub.f32 %v8868_v38, %v1615_v52  ;;  %v1770_v22 = vsub.f32 %v8869_v44, %v1615_v52  ;;  %v1771_v54 = vsub.f32 %v8870_v20, %v1615_v52  ;;  %vm993_vm13 = vcmp.lt.s32.totalorder %v5118_v2, %v8867_v0  ;;  %vm7274_vm14 = vmand %vm768_vm5, %vm992_vm9 }
 0x2e7   : > { %4227 = vpow2.f32 %v1901_v5  ;;  %v1772_v12 = vsub.f32 %v8871_v42, %v1615_v52  ;;  %v7226_v59 = vsel %vm7196_vm10, %v5138_v13, -1e+30  ;;  %vm994_vm8 = vcmp.lt.s32.totalorder %v5123_v7, %v8867_v0 }
 0x2e8   : > { %v1600_v39 = vpop.permute.xlu0 %1599  ;;  %4229 = vpow2.f32 %v1903_v43  ;;  %v1909_v55 = vmul.f32 1.442695, %v1769_v8  ;;  %v1911_v29 = vmul.f32 1.442695, %v1770_v22  ;;  %8874 = vst [vmem:[#allocation29_spill] sm:$0xff] %v7226_v59  ;;  %v8876_v22 = vld [vmem:[#allocation17_spill] sm:$0xff]  ;;  %vm769_vm12 = vcmp.ge.s32.totalorder %v5118_v2, %v7174_v45 }
 0x2e9   : > { %v1757_v26 = vsub.f32 %v8872_v50, %v1600_v39  ;;  %v1758_v6 = vsub.f32 %v8873_v41, %v1600_v39  ;;  %4231 = vpow2.f32 %v1905_v40  ;;  %v1913_v50 = vmul.f32 1.442695, %v1771_v54  ;;  %v8875_v41 = vld [vmem:[#allocation16_spill] sm:$0xff]  ;;  %v1630_v43 = vpop.permute.xlu1 %1629  ;;  %vm7291_vm1 = vmand %vm769_vm12, %vm993_vm13 }
 0x2ea   : > { %v1759_v42 = vsub.f32 %v8875_v41, %v1600_v39  ;;  %v1760_v20 = vsub.f32 %v8876_v22, %v1600_v39  ;;  %4233 = vpow2.f32 %v1907_v3  ;;  %vm770_vm11 = vcmp.ge.s32.totalorder %v5123_v7, %v7174_v45  ;;  %v8881_v3 = vld [vmem:[#allocation40_spill] sm:$0xff] }
 0x2eb   : > { %v1915_v5 = vmul.f32 1.442695, %v1772_v12  ;;  %4235 = vpow2.f32 %v1909_v55  ;;  %v1885_v47 = vmul.f32 1.442695, %v1757_v26  ;;  %v1887_v52 = vmul.f32 1.442695, %v1758_v6  ;;  %vm7312_vm6 = vmand %vm770_vm11, %vm994_vm8 }
 0x2ec   : > { %v7237_v38 = vsel %vm1114_vm2, %v5142_v15, -1e+30  ;;  %v7239_v40 = vpop.permute.xlu0 %1619  ;;  %v7241_v8 = vpop.eup %4219  ;;  %4237 = vpow2.f32 %v1911_v29  ;;  %v1449_v55 = vmax.f32 %v7205_v51, %v7226_v59  ;;  %v8880_v6 = vld [vmem:[#allocation38_spill] sm:$0xff]  ;;  %v1782_v44 = vsub.f32 %v8881_v3, %v1630_v43  ;;  %v8884_v59 = vld [vmem:[#allocation32_spill] sm:$0xff] }
 0x2ed   : > { %8877 = vst [vmem:[#allocation31_spill] sm:$0xff] %v7237_v38  ;;  %v1781_v12 = vsub.f32 %v8880_v6, %v1630_v43  ;;  %v7257_v54 = vpop.eup %4221  ;;  %4239 = vpow2.f32 %v1913_v50  ;;  %v1889_v29 = vmul.f32 1.442695, %v1759_v42  ;;  %v1891_v26 = vmul.f32 1.442695, %v1760_v20  ;;  %v1635_v2 = vpop.permute.xlu1 %1634 }
 0x2ee   : > { %v1783_v41 = vsub.f32 %v8882_v62, %v1630_v43  ;;  %v7260_v22 = vpop.eup %4223  ;;  %4241 = vpow2.f32 %v1915_v5  ;;  %v1450_v19 = vmax.f32 %v1449_v55, %v7237_v38  ;;  %v1784_v27 = vsub.f32 %v8883_v46, %v1630_v43 }
 0x2ef   : > { %v1773_v51 = vsub.f32 %v8884_v59, %v7239_v40  ;;  %v7266_v6 = vpop.eup %4225  ;;  %4243 = vpow2.f32 %v1885_v47  ;;  %v7281_v46 = vsel %vm7249_vm0, %v5147_v17, -1e+30  ;;  %v1933_v42 = vmul.f32 1.442695, %v1781_v12  ;;  %v8888_v59 = vld [vmem:[#allocation35_spill] sm:$0xff]  ;;  %v8891_v47 = vld [vmem:[#allocation37_spill] sm:$0xff] }
 0x2f0   : > { %8887 = vst [vmem:[#allocation34_spill] sm:$0xff] %v7281_v46  ;;  %v1774_v20 = vsub.f32 %v8888_v59, %v7239_v40  ;;  %4245 = vpow2.f32 %v1887_v52  ;;  %v1451_v43 = vmax.f32 %v1450_v19, %v7281_v46  ;;  %v1935_v5 = vmul.f32 1.442695, %v1782_v44  ;;  %v1625_v7 = vpop.permute.xlu0 %1624  ;;  %v8899_v59 = vld [vmem:[#allocation28_spill] sm:$0xff]  ;;  %v8907_v46 = vld [vmem:[#allocation25_spill] sm:$0xff] }
 0x2f1   : > { %v1775_v39 = vsub.f32 %v8891_v47, %v7239_v40  ;;  %v7298_v55 = vpop.eup %4227  ;;  %4247 = vpow2.f32 %v1889_v29  ;;  %v1937_v12 = vmul.f32 1.442695, %v1783_v41  ;;  %vm771_vm15 = vcmp.ge.s32.totalorder %v5127_v10, %v7174_v45  ;;  %v8905_v29 = vld [vmem:[#allocation21_spill] sm:$0xff] }
 0x2f2   : > { %vm995_vm3 = vcmp.lt.s32.totalorder %v5127_v10, %v8867_v0  ;;  %v7304_v3 = vpop.eup %4229  ;;  %4249 = vpow2.f32 %v1891_v26  ;;  %1452 = vmax.xlane.f32.xlu0 %v1451_v43  ;;  %v1939_v52 = vmul.f32 1.442695, %v1784_v27  ;;  %v1917_v44 = vmul.f32 1.442695, %v1773_v51  ;;  %v8901_v10 = vld [vmem:[#allocation30_spill] sm:$0xff]  ;;  %v8902_v43 = vld [vmem:[#allocation44_spill] sm:$0xff] }
 0x2f3   : > { %v7319_v62 = vsel %vm7274_vm14, %v5130_v11, -1e+30  ;;  %v7321_v41 = vpop.eup %4231  ;;  %4251 = vpow2.f32 %v1933_v42  ;;  %v1919_v27 = vmul.f32 1.442695, %v1774_v20  ;;  %v1921_v51 = vmul.f32 1.442695, %v1775_v39  ;;  %vm7336_vm7 = vmand %vm771_vm15, %vm995_vm3 }
 0x2f4   : > { %8894 = vst [vmem:[#allocation92_spill] sm:$0xff] %v7319_v62  ;;  %v7326_v26 = vsel %vm7291_vm1, %v5138_v13, -1e+30  ;;  %v7328_v19 = vpop.eup %4233  ;;  %4253 = vpow2.f32 %v1935_v5  ;;  %v8898_v42 = vld [vmem:[#allocation27_spill] sm:$0xff]  ;;  %v1786_v20 = vsub.f32 %v8899_v59, %v1635_v2  ;;  %v7349_v0 = vsel %vm7312_vm6, %v5142_v15, -1e+30 }
 0x2f5   : > { %8895 = vst [vmem:[#allocation18_spill] sm:$0xff] %v7326_v26  ;;  %v1459_v50 = vmax.f32 %v7319_v62, %v7326_v26  ;;  %v1785_v13 = vsub.f32 %v8898_v42, %v1635_v2  ;;  %v7344_v61 = vpop.eup %4235  ;;  %4255 = vpow2.f32 %v1937_v12  ;;  %8900 = vst [vmem:[#allocation19_spill] sm:$0xff] %v7349_v0  ;;  %v1787_v45 = vsub.f32 %v8901_v10, %v1635_v2  ;;  %v8903_v26 = vld [vmem:[#allocation20_spill] sm:$0xff] }
 0x2f6   : > { %v1788_v5 = vsub.f32 %v8902_v43, %v1635_v2  ;;  %v7353_v47 = vpop.eup %4237  ;;  %4257 = vpow2.f32 %v1939_v52  ;;  %v1777_v59 = vsub.f32 %v8903_v26, %v1625_v7  ;;  %v7362_v15 = vsel %vm7336_vm7, %v5147_v17, -1e+30  ;;  %v1650_v2 = vpop.permute.xlu1 %1649 }
 0x2f7   : > { %v1460_v39 = vmax.f32 %v1459_v50, %v7349_v0  ;;  %v1941_v42 = vmul.f32 1.442695, %v1785_v13  ;;  %v7357_v62 = vpop.eup %4239  ;;  %4259 = vpow2.f32 %v1917_v44  ;;  %8904 = vst [vmem:[#allocation22_spill] sm:$0xff] %v7362_v15  ;;  %v1943_v12 = vmul.f32 1.442695, %v1786_v20  ;;  %v8906_v13 = vld [vmem:[#allocation24_spill] sm:$0xff] }
 0x2f8   : > { %v1778_v10 = vsub.f32 %v8905_v29, %v1625_v7  ;;  %v7365_v43 = vpop.eup %4241  ;;  %4261 = vpow2.f32 %v1919_v27  ;;  %v1945_v50 = vmul.f32 1.442695, %v1787_v45  ;;  %v1779_v26 = vsub.f32 %v8906_v13, %v1625_v7  ;;  %v8908_v29 = vld [vmem:[#allocation51_spill] sm:$0xff]  ;;  %v8909_v45 = vld [vmem:[#allocation53_spill] sm:$0xff]  ;;  %v1640_v13 = vpop.permute.xlu0 %1639 }
 0x2f9   : > { %v1461_v52 = vmax.f32 %v1460_v39, %v7362_v15  ;;  %v7369_v0 = vpop.eup %4243  ;;  %4263 = vpow2.f32 %v1921_v51  ;;  %v1947_v44 = vmul.f32 1.442695, %v1788_v5  ;;  %v1780_v11 = vsub.f32 %v8907_v46, %v1625_v7  ;;  %v8910_v51 = vld [vmem:[#allocation39_spill] sm:$0xff] }
 0x2fa   : > { %v7372_v17 = vpop.eup %4245  ;;  %4265 = vpow2.f32 %v1941_v42  ;;  %v1925_v20 = vmul.f32 1.442695, %v1777_v59  ;;  %v1797_v38 = vsub.f32 %v8908_v29, %v1650_v2  ;;  %v1927_v27 = vmul.f32 1.442695, %v1778_v10  ;;  %v8911_v59 = vld [vmem:[#allocation55_spill] sm:$0xff]  ;;  %v8912_v10 = vld [vmem:[#allocation45_spill] sm:$0xff] }
 0x2fb   : > { %1462 = vmax.xlane.f32.xlu0 %v1461_v52  ;;  %v7375_v53 = vpop.eup %4247  ;;  %4267 = vpow2.f32 %v1943_v12  ;;  %v1798_v39 = vsub.f32 %v8909_v45, %v1650_v2  ;;  %v1776_v5 = vsub.f32 %v8910_v51, %v7239_v40  ;;  %v1929_v46 = vmul.f32 1.442695, %v1779_v26 }
 0x2fc   : > { %v7378_v15 = vpop.eup %4249  ;;  %4269 = vpow2.f32 %v1945_v50  ;;  %v1931_v42 = vmul.f32 1.442695, %v1780_v11  ;;  %v1799_v52 = vsub.f32 %v8911_v59, %v1650_v2  ;;  %v1965_v12 = vmul.f32 1.442695, %v1797_v38 }
 0x2fd   : > { %v7382_v7 = vpop.eup %4251  ;;  %4271 = vpow2.f32 %v1947_v44  ;;  %v1789_v45 = vsub.f32 %v8912_v10, %v1640_v13  ;;  %v1967_v31 = vmul.f32 1.442695, %v1798_v39  ;;  %v1790_v40 = vsub.f32 %v8913_v25, %v1640_v13  ;;  %v8914_v44 = vld [vmem:[#allocation56_spill] sm:$0xff] }
 0x2fe   : > { %v7385_v29 = vpop.eup %4253  ;;  %4273 = vpow2.f32 %v1925_v20  ;;  %v1923_v26 = vmul.f32 1.442695, %v1776_v5  ;;  %v1800_v11 = vsub.f32 %v8914_v44, %v1650_v2  ;;  %v1969_v59 = vmul.f32 1.442695, %v1799_v52  ;;  %v8915_v20 = vld [vmem:[#allocation49_spill] sm:$0xff]  ;;  %v8916_v25 = vld [vmem:[#allocation52_spill] sm:$0xff] }
 0x2ff   : > { %v7388_v16 = vpop.eup %4255  ;;  %4275 = vpow2.f32 %v1927_v27  ;;  %v1791_v38 = vsub.f32 %v8915_v20, %v1640_v13  ;;  %v1949_v10 = vmul.f32 1.442695, %v1789_v45  ;;  %v1792_v39 = vsub.f32 %v8916_v25, %v1640_v13  ;;  %v8917_v20 = vld [vmem:[#allocation36_spill] sm:$0xff] }
 0x300   : > { %v7391_v50 = vpop.eup %4257  ;;  %4277 = vpow2.f32 %v1929_v46  ;;  %v1951_v36 = vmul.f32 1.442695, %v1790_v40  ;;  %v1971_v2 = vmul.f32 1.442695, %v1800_v11  ;;  %v7404_v46 = vpop.permute.xlu0 %1644  ;;  %v2657_v52 = vpack.c.bf16 %v7266_v6, %v7378_v15 }
 0x301   : > { %v7394_v51 = vpop.eup %4259  ;;  %4279 = vpow2.f32 %v1931_v42  ;;  %v2655_v42 = vpack.c.bf16 %v7257_v54, %v7372_v17  ;;  %v1953_v45 = vmul.f32 1.442695, %v1791_v38  ;;  %v7416_v40 = vpop.permute.xlu1 %1654  ;;  %v2659_v44 = vpack.c.bf16 %v7353_v47, %v7304_v3 }
 0x302   : > { %v7397_v35 = vpop.eup %4261  ;;  %4281 = vpow2.f32 %v1965_v12  ;;  %3103 = vmatprep.mubr.bf16.mxu1 %v2657_v52  ;;  %v1794_v38 = vsub.f32 %v8917_v20, %v7404_v46  ;;  %vm8927_vm4 = vcmask 7168  }
 0x303   : > { %v7399_v27 = vpop.eup %4263  ;;  %4283 = vpow2.f32 %v1967_v31  ;;  %v2654_v31 = vpack.c.bf16 %v7241_v8, %v7369_v0  ;;  %2942 = vmatprep.mubr.bf16.mxu0 %v2655_v42  ;;  %v8918_v42 = vld [vmem:[#allocation50_spill] sm:$0xff]  ;;  %vm8937_vm10 = vmmov %vm8927_vm4 }
 0x304   : > { %v7402_v5 = vpop.eup %4265  ;;  %4285 = vpow2.f32 %v1923_v26  ;;  %v2656_v26 = vpack.c.bf16 %v7260_v22, %v7375_v53  ;;  %v1796_v52 = vsub.f32 %v8918_v42, %v7404_v46  ;;  %v2205_v42 = vadd.f32 %v7372_v17, %v7369_v0  ;;  %vm8947_vm5 = vmmov %vm8927_vm4 }
 0x305   : > { %v7410_v12 = vpop.eup %4267  ;;  %4287 = vpow2.f32 %v1969_v59  ;;  %v1955_v59 = vmul.f32 1.442695, %v1792_v39  ;;  %2943 = vmatmul.mubr.bf16.vlgmr.msra.gmra.mrb[0].mxu0 %v2654_v31  ;;  %v2210_v31 = vadd.f32 %v7257_v54, %v7241_v8  ;;  %v2660_v0 = vpack.c.bf16 %v7357_v62, %v7321_v41  ;;  %vm9015_vm9 = vmmov %vm8927_vm4 }
 0x306   : > { %v7414_v13 = vpop.eup %4269  ;;  %4289 = vpow2.f32 %v1949_v10  ;;  %v2661_v10 = vpack.c.bf16 %v7365_v43, %v7328_v19  ;;  %3104 = vmatmul.mubr.bf16.vlgmr.msra.gmra.mrb[0].mxu1 %v2656_v26  ;;  %2950 = vmatprep.mubr.bf16.mxu0 %v2659_v44  ;;  %v2240_v20 = vadd.f32 %v7410_v12, %v7402_v5  ;;  %v8921_v26 = vld [vmem:[#allocation33_spill] sm:$0xff]  ;;  %v1963_v23 = vmul.f32 1.442695, %v1796_v52  ;;  %vm9018_vm13 = vmmov %vm8927_vm4 }
 0x307   : > { %v7422_v11 = vpop.eup %4271  ;;  %4291 = vpow2.f32 %v1951_v36  ;;  %v8919_v36 = vld [vmem:[#allocation42_spill] sm:$0xff]  ;;  %v1793_v44 = vsub.f32 %v8921_v26, %v7404_v46  ;;  %v2211_v8 = vadd.f32 %v7260_v22, %v2210_v31  ;;  %v2206_v24 = vadd.f32 %v7375_v53, %v2205_v42  ;;  %vm9019_vm2 = vmmov %vm8927_vm4 }
 0x308   : > { %v7428_v25 = vpop.eup %4273  ;;  %4293 = vpow2.f32 %v1971_v2  ;;  %v1802_v39 = vsub.f32 %v8919_v36, %v7416_v40  ;;  %3111 = vmatprep.mubr.bf16.mxu1 %v2661_v10  ;;  %v8920_v2 = vld [vmem:[#allocation57_spill] sm:$0xff]  ;;  %v1959_v36 = vmul.f32 1.442695, %v1794_v38  ;;  %v2241_v54 = vadd.f32 %v7414_v13, %v2240_v20  ;;  %vm9020_vm8 = vmmov %vm9019_vm2 }
 0x309   : > { %v4276_v49 = vpop.eup %4275  ;;  %4295 = vpow2.f32 %v1953_v45  ;;  %v1804_v28 = vsub.f32 %v8920_v2, %v7416_v40  ;;  %v2658_v2 = vpack.c.bf16 %v7344_v61, %v7298_v55  ;;  %v7460_v17 = vadd.f32 %v7266_v6, %v2211_v8  ;;  %vm9021_vm12 = vmmov %vm9019_vm2 }
 0x30a   : > { %v7438_v21 = vpop.eup %4277  ;;  %v2230_v45 = vadd.f32 %v4276_v49, %v7428_v25  ;;  %4297 = vpow2.f32 %v1955_v59  ;;  %v7463_v22 = vadd.f32 %v7422_v11, %v2241_v54  ;;  %v2215_v59 = vadd.f32 %v7304_v3, %v7298_v55  ;;  %vm9066_vm11 = vmmov %vm9019_vm2 }
 0x30b   : > { %v4280_v10 = vpop.eup %4279  ;;  %v2663_v52 = vpack.c.bf16 %v4276_v49, %v7397_v35  ;;  %v7471_v53 = vadd.f32 %v7378_v15, %v2206_v24  ;;  %v2220_v20 = vadd.f32 %v7353_v47, %v7344_v61  ;;  %v2225_v55 = vadd.f32 %v7397_v35, %v7394_v51  ;;  %v8922_v24 = vld [vmem:[#allocation46_spill] sm:$0xff]  ;;  %vm9069_vm0 = vmmov %vm9019_vm2 }
 0x30c   : > { %v7449_v18 = vpop.eup %4281  ;;  %v2231_v26 = vadd.f32 %v7438_v21, %v2230_v45  ;;  %v2216_v42 = vadd.f32 %v7321_v41, %v2215_v59  ;;  %v2235_v49 = vadd.f32 %v7385_v29, %v7382_v7  ;;  %v1795_v15 = vsub.f32 %v8922_v24, %v7404_v46  ;;  %vm9070_vm14 = vmmov %vm9069_vm0 }
 0x30d   : > { %v7455_v60 = vpop.eup %4283  ;;  %2951 = vmatmul.mubr.bf16.gmra.mrb[4].mxu0 %v2658_v2  ;;  %v2221_v61 = vadd.f32 %v7357_v62, %v2220_v20  ;;  %4299 = vpow2.f32 %v1959_v36  ;;  %v1957_v59 = vmul.f32 1.442695, %v1793_v44  ;;  %v2667_v44 = vpack.c.bf16 %v7410_v12, %v7385_v29  ;;  %vm9071_vm1 = vmmov %vm9069_vm0 }
 0x30e   : > { %v4286_v38 = vpop.eup %4285  ;;  %v7468_v31 = vadd.f32 %v4280_v10, %v2231_v26  ;;  %3112 = vmatmul.mubr.bf16.gmra.mrb[4].mxu1 %v2660_v0  ;;  %v2255_v47 = vadd.f32 %v7455_v60, %v7449_v18  ;;  %2958 = vmatprep.mubr.bf16.mxu0 %v2663_v52  ;;  %v7491_v35 = vadd.f32 %v7328_v19, %v2216_v42  ;;  %4301 = vpow2.f32 %v1963_v23  ;;  %vm9077_vm15 = vmmov %vm9069_vm0 }
 0x30f   : > { %v7475_v45 = vpop.eup %4287  ;;  %v2665_v6 = vpack.c.bf16 %v4280_v10, %v4286_v38  ;;  %v2226_v10 = vadd.f32 %v7399_v27, %v2225_v55  ;;  %v2236_v8 = vadd.f32 %v7388_v16, %v2235_v49  ;;  %v7498_v54 = vadd.f32 %v7365_v43, %v2221_v61  ;;  %v8923_v49 = vld [vmem:[#allocation41_spill] sm:$0xff]  ;;  %vm9078_vm3 = vmmov %vm9069_vm0 }
 0x310   : > { %v7482_v3 = vpop.eup %4289  ;;  %v2256_v2 = vadd.f32 %v7475_v45, %v2255_v47  ;;  %v1975_v26 = vmul.f32 1.442695, %v1802_v39  ;;  %v1961_v20 = vmul.f32 1.442695, %v1795_v15  ;;  %v1979_v42 = vmul.f32 1.442695, %v1804_v28  ;;  %vm9081_vm6 = vmmov %vm9069_vm0 }
 0x311   : > { %1659 = vperm.xlu0 %4185, %v7031_v57   ;;  %v4292_v41 = vpop.eup %4291  ;;  %3119 = vmatprep.mubr.bf16.mxu1 %v2665_v6  ;;  %v7502_v0 = vadd.f32 %v4286_v38, %v2226_v10  ;;  %v7505_v19 = vadd.f32 %v7391_v50, %v2236_v8  ;;  %v2662_v6 = vpack.c.bf16 %v7428_v25, %v7394_v51  ;;  %v8924_v28 = vld [vmem:[#allocation54_spill] sm:$0xff]  ;;  %vm9084_vm7 = vmmov %vm9069_vm0 }
 0x312   : > { %v7495_v46 = vpop.eup %4293  ;;  %v2245_v62 = vadd.f32 %v4292_v41, %v7482_v3  ;;  %v2664_v39 = vpack.c.bf16 %v7438_v21, %v7399_v27  ;;  %4303 = vpow2.f32 %v1975_v26  ;;  %v2669_v55 = vpack.c.bf16 %v7422_v11, %v7391_v50 }
 0x313   : > { %v4296_v36 = vpop.eup %4295  ;;  %v7509_v23 = vadd.f32 %v7495_v46, %v2256_v2  ;;  %v1801_v24 = vsub.f32 %v8923_v49, %v7416_v40  ;;  %4305 = vpow2.f32 %v1957_v59  ;;  %v1803_v21 = vsub.f32 %v8924_v28, %v7416_v40 }
 0x314   : > { %v2246_v52 = vadd.f32 %v4296_v36, %v2245_v62  ;;  %v4298_v43 = vpop.eup %4297  ;;  %4307 = vpow2.f32 %v1961_v20  ;;  %v2666_v12 = vpack.c.bf16 %v7402_v5, %v7382_v7  ;;  %v2668_v11 = vpack.c.bf16 %v7414_v13, %v7388_v16  ;;  %v7533_v7 = vld [vmem:[#allocation2 + $0xf8] sm:$0xff] }
 0x315   : > { %1664 = vperm.xlu0 %4185, %v7014_v9   ;;  %2959 = vmatmul.mubr.bf16.gmra.mrb[8].mxu0 %v2662_v6  ;;  %4309 = vpow2.f32 %v1979_v42  ;;  %v1973_v29 = vmul.f32 1.442695, %v1801_v24  ;;  %v1977_v50 = vmul.f32 1.442695, %v1803_v21  ;;  %8925 = vst [vmem:[#allocation23_spill] sm:$0xff] %v7533_v7  ;;  %v8929_v24 = vld [vmem:[#allocation97_spill] sm:$0xff] }
 0x316   : > { %v7515_v38 = vadd.f32 %v4298_v43, %v2246_v52  ;;  %3120 = vmatmul.mubr.bf16.gmra.mrb[8].mxu1 %v2664_v39  ;;  %2966 = vmatprep.mubr.bf16.mxu0 %v2667_v44  ;;  %v8928_v39 = vld [vmem:[#allocation113_spill] sm:$0xff] }
 0x317   : > { %3127 = vmatprep.mubr.bf16.mxu1 %v2669_v55  ;;  %v4300_v51 = vpop.eup %4299  ;;  %4311 = vpow2.f32 %v1973_v29 }
 0x318   : > { %v4302_v27 = vpop.eup %4301  ;;  %v2671_v25 = vpack.c.bf16 %v4300_v51, %v4292_v41  ;;  %4313 = vpow2.f32 %v1977_v50  ;;  %v8932_v50 = vld [vmem:[#allocation103_spill] sm:$0xff] }
 0x319   : > { %1669 = vperm.xlu0 %4185, %v7043_v37   ;;  %v2673_v15 = vpack.c.bf16 %v4302_v27, %v4298_v43  ;;  %v8975_v37 = vld [vmem:[#allocation90_spill] sm:$0xff] }
 0x31c   : > { %v4304_v40 = vpop.eup %4303 }
 0x31d   : > { %1674 = vperm.xlu0 %4185, %v7040_v48   ;;  %2967 = vmatmul.mubr.bf16.gmra.mrb[12].mxu0 %v2666_v12  ;;  %v4306_v61 = vpop.eup %4305  ;;  %v2675_v41 = vpack.c.bf16 %v4304_v40, %v7455_v60 }
 0x31e   : > { %3128 = vmatmul.mubr.bf16.gmra.mrb[12].mxu1 %v2668_v11  ;;  %2974 = vmatprep.mubr.bf16.mxu0 %v2671_v25  ;;  %v4308_v47 = vpop.eup %4307  ;;  %v2670_v16 = vpack.c.bf16 %v4306_v61, %v7482_v3  ;;  %v2250_v26 = vadd.f32 %v4306_v61, %v4300_v51  ;;  %v8931_v51 = vld [vmem:[#allocation98_spill] sm:$0xff]  ;;  %v8933_v25 = vld [vmem:[#allocation104_spill] sm:$0xff] }
 0x31f   : > { %3135 = vmatprep.mubr.bf16.mxu1 %v2673_v15  ;;  %v4310_v10 = vpop.eup %4309  ;;  %v2672_v5 = vpack.c.bf16 %v4308_v47, %v4296_v36 }
 0x320   : > { %v2677_v8 = vpack.c.bf16 %v4310_v10, %v7495_v46  ;;  %v2251_v59 = vadd.f32 %v4308_v47, %v2250_v26 }
 0x321   : > { %1684 = vperm.xlu0 %4185, %v7054_v30   ;;  %v4312_v3 = vpop.eup %4311 }
 0x322   : > { %v4314_v60 = vpop.eup %4313  ;;  %v2674_v46 = vpack.c.bf16 %v4312_v3, %v7449_v18  ;;  %v2260_v52 = vadd.f32 %v4312_v3, %v4304_v40  ;;  %v2252_v18 = vadd.f32 %v4302_v27, %v2251_v59  ;;  %v8935_v40 = vld [vmem:[#allocation107_spill] sm:$0xff]  ;;  %v8940_v59 = vld [vmem:[#allocation118_spill] sm:$0xff] }
 0x323   : > { %v2676_v36 = vpack.c.bf16 %v4314_v60, %v7475_v45 }
 0x324   : > { %v2261_v43 = vadd.f32 %v4314_v60, %v2260_v52 }
 0x325   : > { %1689 = vperm.xlu0 %4185, %v7074_v4   ;;  %2975 = vmatmul.mubr.bf16.gmra.mrb[16].mxu0 %v2670_v16  ;;  %v8936_v16 = vld [vmem:[#allocation110_spill] sm:$0xff] }
 0x326   : > { %v1468_v13 = vpop.xlane.xlu1 %1467  ;;  %3136 = vmatmul.mubr.bf16.gmra.mrb[16].mxu1 %v2672_v5  ;;  %2982 = vmatprep.mubr.bf16.mxu0 %v2675_v41  ;;  %v2262_v45 = vadd.f32 %v4310_v10, %v2261_v43 }
 0x327   : > { %v7539_v62 = vmax.f32 %v7533_v7, %v1468_v13  ;;  %3143 = vmatprep.mubr.bf16.mxu1 %v2677_v8  ;;  %v8938_v8 = vld [vmem:[#allocation114_spill] sm:$0xff] }
 0x329   : > { %8926 = vst [vmem:[#allocation14_spill] sm:$0xff] %v7539_v62  ;;  %1694 = vperm.xlu0 %4185, %v7071_v58   ;;  %3327 = vst.msk [vmem:[#allocation2 + $0xf8] sm:$0xff] %vm8927_vm4, %v7539_v62  ;;  %1754 = vperm.xlu1 %4186, %v7539_v62  }
 0x32a   : > { %vm9085_vm4 = vmmov %vm9069_vm0 }
 0x32d   : > { %1699 = vperm.xlu0 %4185, %v7085_v14   ;;  %2983 = vmatmul.mubr.bf16.gmra.mrb[20].mxu0 %v2674_v46  ;;  %v8939_v46 = vld [vmem:[#allocation116_spill] sm:$0xff] }
 0x32e   : > { %3144 = vmatmul.mubr.bf16.gmra.mrb[20].mxu1 %v2676_v36 }
 0x331   : > { %1709 = vperm.xlu0 %4185, %v7105_v34  }
 0x335   : > { %1719 = vperm.xlu0 %4185, %v7122_v56  }
 0x339   : > { %1729 = vperm.xlu0 %4185, %v7139_v63  }
 0x33d   : > { %v1680_v20 = vpop.permute.xlu1 %1679 }
 0x33e   : > { %v1821_v42 = vsub.f32 %v6489_v32, %v1680_v20  ;;  %v1822_v44 = vsub.f32 %v8928_v39, %v1680_v20 }
 0x340   : > { %v2013_v49 = vmul.f32 1.442695, %v1821_v42  ;;  %v2015_v21 = vmul.f32 1.442695, %v1822_v44  ;;  %v8943_v42 = vld [vmem:[#allocation124_spill] sm:$0xff] }
 0x342   : > { %4315 = vpow2.f32 %v2013_v49  ;;  %v8945_v49 = vld [vmem:[#allocation127_spill] sm:$0xff] }
 0x343   : > { %4317 = vpow2.f32 %v2015_v21 }
 0x348   : > { %v1705_v6 = vpop.permute.xlu1 %1704 }
 0x349   : > { %v1841_v28 = vsub.f32 %v8929_v24, %v1705_v6  ;;  %v1842_v27 = vsub.f32 %v8931_v51, %v1705_v6  ;;  %v1843_v12 = vsub.f32 %v8932_v50, %v1705_v6  ;;  %v1844_v15 = vsub.f32 %v8933_v25, %v1705_v6  ;;  %v8946_v51 = vld [vmem:[#allocation130_spill] sm:$0xff] }
 0x34b   : > { %v2055_v10 = vmul.f32 1.442695, %v1842_v27  ;;  %v2057_v41 = vmul.f32 1.442695, %v1843_v12  ;;  %v2059_v60 = vmul.f32 1.442695, %v1844_v15 }
 0x34c   : > { %v7596_v50 = vpop.eup %4315 }
 0x34d   : > { %2213 = vadd.xlane.f32.xlu1 %v7460_v17  ;;  %v1823_v17 = vsub.f32 %v6557_v1, %v1680_v20  ;;  %v7600_v25 = vpop.eup %4317 }
 0x34e   : > { %v1715_v55 = vpop.permute.xlu1 %1714 }
 0x34f   : > { %v2017_v29 = vmul.f32 1.442695, %v1823_v17  ;;  %v1849_v61 = vsub.f32 %v8935_v40, %v1715_v55  ;;  %v1850_v5 = vsub.f32 %v8936_v16, %v1715_v55  ;;  %v1851_v3 = vsub.f32 %v8938_v8, %v1715_v55 }
 0x350   : > { %v1852_v36 = vsub.f32 %v8939_v46, %v1715_v55  ;;  %v8951_v46 = vld [vmem:[#allocation105_spill] sm:$0xff] }
 0x351   : > { %2233 = vadd.xlane.f32.xlu1 %v7468_v31  ;;  %v1824_v31 = vsub.f32 %v6599_v33, %v1680_v20  ;;  %v2053_v33 = vmul.f32 1.442695, %v1841_v28  ;;  %4319 = vpow2.f32 %v2017_v29  ;;  %v2069_v26 = vmul.f32 1.442695, %v1849_v61 }
 0x352   : > { %v1725_v47 = vpop.permute.xlu1 %1724  ;;  %v2071_v43 = vmul.f32 1.442695, %v1850_v5  ;;  %v2073_v6 = vmul.f32 1.442695, %v1851_v3  ;;  %v8950_v3 = vld [vmem:[#allocation102_spill] sm:$0xff] }
 0x353   : > { %v2019_v32 = vmul.f32 1.442695, %v1824_v31  ;;  %v1857_v52 = vsub.f32 %v8940_v59, %v1725_v47  ;;  %v1859_v39 = vsub.f32 %v8943_v42, %v1725_v47  ;;  %v2075_v31 = vmul.f32 1.442695, %v1852_v36 }
 0x354   : > { %v1860_v24 = vsub.f32 %v8945_v49, %v1725_v47  ;;  %v8953_v49 = vld [vmem:[#allocation82_spill] sm:$0xff] }
 0x355   : > { %2243 = vadd.xlane.f32.xlu1 %v7463_v22  ;;  %v7561_v22 = vld [vmem:[#allocation2 + $0xe0] sm:$0xff]  ;;  %4321 = vpow2.f32 %v2019_v32  ;;  %v2085_v28 = vmul.f32 1.442695, %v1857_v52  ;;  %v2089_v12 = vmul.f32 1.442695, %v1859_v39 }
 0x356   : > { %8930 = vst [vmem:[#allocation15_spill] sm:$0xff] %v7561_v22  ;;  %4323 = vpow2.f32 %v2053_v33  ;;  %v2091_v33 = vmul.f32 1.442695, %v1860_v24 }
 0x357   : > { %4325 = vpow2.f32 %v2055_v10  ;;  %v7583_v44 = vpop.permute.xlu1 %1734 }
 0x358   : > { %4327 = vpow2.f32 %v2057_v41  ;;  %v1865_v27 = vsub.f32 %v8946_v51, %v7583_v44  ;;  %v8949_v41 = vld [vmem:[#allocation100_spill] sm:$0xff] }
 0x359   : > { %2253 = vadd.xlane.f32.xlu1 %v2252_v18  ;;  %v7579_v18 = vld [vmem:[#allocation2 + $0xf0] sm:$0xff]  ;;  %4329 = vpow2.f32 %v2059_v60 }
 0x35a   : > { %8941 = vst [vmem:[#allocation17_spill] sm:$0xff] %v7579_v18  ;;  %4331 = vpow2.f32 %v2069_v26  ;;  %v2101_v61 = vmul.f32 1.442695, %v1865_v27  ;;  %v8952_v26 = vld [vmem:[#allocation108_spill] sm:$0xff] }
 0x35b   : > { %4333 = vpow2.f32 %v2071_v43  ;;  %v7602_v15 = vpop.eup %4319  ;;  %v8955_v51 = vld [vmem:[#allocation84_spill] sm:$0xff] }
 0x35c   : > { %4335 = vpow2.f32 %v2073_v6 }
 0x35d   : > { %2263 = vadd.xlane.f32.xlu1 %v2262_v45  ;;  %v8942_v45 = vld [vmem:[#allocation121_spill] sm:$0xff]  ;;  %4337 = vpow2.f32 %v2075_v31 }
 0x35e   : > { %v1858_v20 = vsub.f32 %v8942_v45, %v1725_v47  ;;  %4339 = vpow2.f32 %v2085_v28  ;;  %v8954_v28 = vld [vmem:[#allocation83_spill] sm:$0xff] }
 0x35f   : > { %v7604_v40 = vpop.eup %4321 }
 0x360   : > { %v2087_v21 = vmul.f32 1.442695, %v1858_v20  ;;  %v7606_v47 = vpop.eup %4323 }
 0x361   : > { %v7608_v5 = vpop.eup %4325 }
 0x362   : > { %4341 = vpow2.f32 %v2087_v21  ;;  %v7614_v52 = vpop.eup %4327 }
 0x363   : > { %4343 = vpow2.f32 %v2089_v12  ;;  %v7616_v43 = vpop.eup %4329 }
 0x364   : > { %4345 = vpow2.f32 %v2091_v33  ;;  %v7618_v42 = vpop.eup %4331 }
 0x365   : > { %4347 = vpow2.f32 %v2101_v61  ;;  %v7620_v31 = vpop.eup %4333 }
 0x366   : > { %v7625_v12 = vpop.eup %4335 }
 0x367   : > { %v7628_v33 = vpop.eup %4337 }
 0x37f   : > { %v1453_v11 = vpop.xlane.xlu0 %1452 }
 0x380   : > { %v7567_v1 = vmax.f32 %v7561_v22, %v1453_v11  ;;  %v8948_v11 = vld [vmem:[#allocation131_spill] sm:$0xff] }
 0x381   : > { %v1866_v32 = vsub.f32 %v8948_v11, %v7583_v44  ;;  %v8956_v11 = vld [vmem:[#allocation85_spill] sm:$0xff] }
 0x382   : > { %8934 = vst [vmem:[#allocation16_spill] sm:$0xff] %v7567_v1  ;;  %3324 = vst.msk [vmem:[#allocation2 + $0xe0] sm:$0xff] %vm8937_vm10, %v7567_v1  ;;  %1739 = vperm.xlu0 %4185, %v7567_v1  }
 0x383   : > { %v2103_v10 = vmul.f32 1.442695, %v1866_v32  ;;  %vm9088_vm10 = vmmov %vm9069_vm0 }
 0x385   : > { %4349 = vpow2.f32 %v2103_v10 }
 0x388   : > { %v1463_v17 = vpop.xlane.xlu0 %1462 }
 0x389   : > { %v7586_v55 = vmax.f32 %v7579_v18, %v1463_v17 }
 0x38b   : > { %8944 = vst [vmem:[#allocation38_spill] sm:$0xff] %v7586_v55  ;;  %3326 = vst.msk [vmem:[#allocation2 + $0xf0] sm:$0xff] %vm8947_vm5, %v7586_v55  ;;  %1749 = vperm.xlu0 %4185, %v7586_v55   ;;  %v8966_v55 = vld [vmem:[#allocation88_spill] sm:$0xff] }
 0x38c   : > { %vm9091_vm5 = vmmov %vm9069_vm0 }
 0x390   : > { %v1660_v16 = vpop.permute.xlu0 %1659 }
 0x391   : > { %v1805_v8 = vsub.f32 %v8949_v41, %v1660_v16  ;;  %v1806_v60 = vsub.f32 %v8950_v3, %v1660_v16  ;;  %v1807_v36 = vsub.f32 %v8951_v46, %v1660_v16  ;;  %v1808_v59 = vsub.f32 %v8952_v26, %v1660_v16  ;;  %v7630_v41 = vpop.eup %4339  ;;  %v8957_v46 = vld [vmem:[#allocation106_spill] sm:$0xff]  ;;  %v8958_v26 = vld [vmem:[#allocation109_spill] sm:$0xff] }
 0x393   : > { %v1981_v45 = vmul.f32 1.442695, %v1805_v8  ;;  %v1983_v20 = vmul.f32 1.442695, %v1806_v60  ;;  %v1985_v6 = vmul.f32 1.442695, %v1807_v36  ;;  %v7632_v60 = vpop.eup %4341 }
 0x394   : > { %v1987_v39 = vmul.f32 1.442695, %v1808_v59  ;;  %v1665_v17 = vpop.permute.xlu0 %1664 }
 0x395   : > { %4351 = vpow2.f32 %v1981_v45  ;;  %v1809_v24 = vsub.f32 %v8953_v49, %v1665_v17  ;;  %v1810_v21 = vsub.f32 %v8954_v28, %v1665_v17  ;;  %v1811_v27 = vsub.f32 %v8955_v51, %v1665_v17  ;;  %v8959_v45 = vld [vmem:[#allocation111_spill] sm:$0xff]  ;;  %v8960_v51 = vld [vmem:[#allocation112_spill] sm:$0xff] }
 0x396   : > { %4353 = vpow2.f32 %v1983_v20  ;;  %v1812_v32 = vsub.f32 %v8956_v11, %v1665_v17  ;;  %v7637_v17 = vpop.eup %4343  ;;  %v8961_v11 = vld [vmem:[#allocation86_spill] sm:$0xff] }
 0x397   : > { %4355 = vpow2.f32 %v1985_v6  ;;  %v1989_v61 = vmul.f32 1.442695, %v1809_v24  ;;  %v1991_v10 = vmul.f32 1.442695, %v1810_v21  ;;  %v1993_v16 = vmul.f32 1.442695, %v1811_v27  ;;  %v7639_v24 = vpop.eup %4345 }
 0x398   : > { %4357 = vpow2.f32 %v1987_v39  ;;  %v1995_v8 = vmul.f32 1.442695, %v1812_v32  ;;  %v1670_v3 = vpop.permute.xlu0 %1669  ;;  %v7641_v21 = vpop.eup %4347 }
 0x399   : > { %4359 = vpow2.f32 %v1989_v61  ;;  %v1813_v36 = vsub.f32 %v8957_v46, %v1670_v3  ;;  %v1814_v59 = vsub.f32 %v8958_v26, %v1670_v3  ;;  %v1815_v20 = vsub.f32 %v8959_v45, %v1670_v3  ;;  %v8962_v61 = vld [vmem:[#allocation87_spill] sm:$0xff]  ;;  %v8963_v26 = vld [vmem:[#allocation93_spill] sm:$0xff]  ;;  %v7647_v29 = vpop.eup %4349 }
 0x39a   : > { %4361 = vpow2.f32 %v1991_v10  ;;  %v1816_v27 = vsub.f32 %v8960_v51, %v1670_v3  ;;  %v8964_v10 = vld [vmem:[#allocation141_spill] sm:$0xff] }
 0x39b   : > { %4363 = vpow2.f32 %v1993_v16  ;;  %v1997_v6 = vmul.f32 1.442695, %v1813_v36  ;;  %v1999_v49 = vmul.f32 1.442695, %v1814_v59  ;;  %v2001_v39 = vmul.f32 1.442695, %v1815_v20 }
 0x39c   : > { %4365 = vpow2.f32 %v1995_v8  ;;  %v1675_v28 = vpop.permute.xlu0 %1674  ;;  %v1867_v16 = vsub.f32 %v8964_v10, %v7583_v44  ;;  %v8965_v36 = vld [vmem:[#allocation96_spill] sm:$0xff]  ;;  %v2003_v2 = vmul.f32 1.442695, %v1816_v27  ;;  %v8970_v27 = vld [vmem:[#allocation94_spill] sm:$0xff] }
 0x39d   : > { %v1817_v32 = vsub.f32 %v8961_v11, %v1675_v28  ;;  %v1818_v46 = vsub.f32 %v8962_v61, %v1675_v28  ;;  %v1819_v45 = vsub.f32 %v8963_v26, %v1675_v28  ;;  %4367 = vpow2.f32 %v1997_v6  ;;  %v8967_v6 = vld [vmem:[#allocation89_spill] sm:$0xff] }
 0x39e   : > { %v1820_v8 = vsub.f32 %v8965_v36, %v1675_v28  ;;  %4369 = vpow2.f32 %v1999_v49  ;;  %v8968_v49 = vld [vmem:[#allocation99_spill] sm:$0xff] }
 0x39f   : > { %v7652_v59 = vpop.eup %4351  ;;  %v2005_v20 = vmul.f32 1.442695, %v1817_v32  ;;  %v2007_v13 = vmul.f32 1.442695, %v1818_v46  ;;  %v2009_v3 = vmul.f32 1.442695, %v1819_v45  ;;  %4371 = vpow2.f32 %v2001_v39 }
 0x3a0   : > { %v7654_v51 = vpop.eup %4353  ;;  %v2011_v11 = vmul.f32 1.442695, %v1820_v8  ;;  %v1685_v61 = vpop.permute.xlu0 %1684  ;;  %v8969_v45 = vld [vmem:[#allocation144_spill] sm:$0xff]  ;;  %v2105_v39 = vmul.f32 1.442695, %v1867_v16 }
 0x3a1   : > { %v7656_v26 = vpop.eup %4355  ;;  %4373 = vpow2.f32 %v2005_v20  ;;  %v1825_v10 = vsub.f32 %v8966_v55, %v1685_v61  ;;  %v1826_v18 = vsub.f32 %v8967_v6, %v1685_v61  ;;  %v1828_v32 = vsub.f32 %v8968_v49, %v1685_v61 }
 0x3a2   : > { %v7660_v28 = vpop.eup %4357  ;;  %4375 = vpow2.f32 %v2007_v13  ;;  %v1868_v36 = vsub.f32 %v8969_v45, %v7583_v44  ;;  %v1827_v20 = vsub.f32 %v8970_v27, %v1685_v61  ;;  %v8971_v13 = vld [vmem:[#allocation115_spill] sm:$0xff]  ;;  %v8972_v44 = vld [vmem:[#allocation117_spill] sm:$0xff] }
 0x3a3   : > { %v4360_v46 = vpop.eup %4359  ;;  %4377 = vpow2.f32 %v2009_v3  ;;  %v2023_v8 = vmul.f32 1.442695, %v1826_v18  ;;  %v2027_v22 = vmul.f32 1.442695, %v1828_v32  ;;  %v2021_v63 = vmul.f32 1.442695, %v1825_v10  ;;  %v7679_v32 = vpop.permute.xlu1 %1744 }
 0x3a4   : > { %v4362_v1 = vpop.eup %4361  ;;  %4379 = vpow2.f32 %v2011_v11  ;;  %v7666_v55 = vpop.permute.xlu0 %1689  ;;  %v2678_v56 = vpack.c.bf16 %v4360_v46, %v7652_v59  ;;  %v2107_v3 = vmul.f32 1.442695, %v1868_v36  ;;  %v8973_v11 = vld [vmem:[#allocation122_spill] sm:$0xff]  ;;  %v2025_v45 = vmul.f32 1.442695, %v1827_v20  ;;  %v8976_v20 = vld [vmem:[#allocation101_spill] sm:$0xff] }
 0x3a5   : > { %v4364_v6 = vpop.eup %4363  ;;  %4381 = vpow2.f32 %v2003_v2  ;;  %v1829_v49 = vsub.f32 %v8971_v13, %v7666_v55  ;;  %v1830_v18 = vsub.f32 %v8972_v44, %v7666_v55  ;;  %v2679_v16 = vpack.c.bf16 %v4362_v1, %v7654_v51 }
 0x3a6   : > { %v4366_v34 = vpop.eup %4365  ;;  %4383 = vpow2.f32 %v2023_v8  ;;  %v1832_v61 = vsub.f32 %v8973_v11, %v7666_v55  ;;  %v2680_v2 = vpack.c.bf16 %v4364_v6, %v7656_v26  ;;  %v2270_v13 = vadd.f32 %v4362_v1, %v4360_v46  ;;  %v8977_v1 = vld [vmem:[#allocation136_spill] sm:$0xff] }
 0x3a7   : > { %4385 = vpow2.f32 %v2105_v39  ;;  %v7677_v10 = vpop.eup %4367  ;;  %2990 = vmatprep.mubr.bf16.mxu0 %v2679_v16  ;;  %v2681_v8 = vpack.c.bf16 %v4366_v34, %v7660_v28  ;;  %v2029_v36 = vmul.f32 1.442695, %v1829_v49  ;;  %v8974_v39 = vld [vmem:[#allocation91_spill] sm:$0xff]  ;;  %v2031_v4 = vmul.f32 1.442695, %v1830_v18 }
 0x3a8   : > { %4387 = vpow2.f32 %v2027_v22  ;;  %v1695_v27 = vpop.permute.xlu0 %1694  ;;  %v7682_v44 = vpop.eup %4369  ;;  %2991 = vmatmul.mubr.bf16.gmra.mrb[24].mxu0 %v2678_v56  ;;  %v2271_v16 = vadd.f32 %v4364_v6, %v2270_v13  ;;  %v8978_v56 = vld [vmem:[#allocation119_spill] sm:$0xff]  ;;  %v2035_v49 = vmul.f32 1.442695, %v1832_v61  ;;  %v8981_v61 = vld [vmem:[#allocation128_spill] sm:$0xff] }
 0x3a9   : > { %4389 = vpow2.f32 %v2021_v63  ;;  %v1834_v11 = vsub.f32 %v8974_v39, %v1695_v27  ;;  %v7685_v14 = vpop.eup %4371  ;;  %3151 = vmatprep.mubr.bf16.mxu1 %v2681_v8  ;;  %v1833_v57 = vsub.f32 %v8975_v37, %v1695_v27  ;;  %v1836_v22 = vsub.f32 %v8976_v20, %v1695_v27  ;;  %v8979_v18 = vld [vmem:[#allocation95_spill] sm:$0xff] }
 0x3aa   : > { %2208 = vadd.xlane.f32.xlu0 %v7471_v53  ;;  %4391 = vpow2.f32 %v2107_v3  ;;  %v1873_v63 = vsub.f32 %v8977_v1, %v7679_v32  ;;  %v1831_v46 = vsub.f32 %v8978_v56, %v7666_v55  ;;  %3152 = vmatmul.mubr.bf16.gmra.mrb[24].mxu1 %v2680_v2  ;;  %v1835_v8 = vsub.f32 %v8979_v18, %v1695_v27  ;;  %v8980_v3 = vld [vmem:[#allocation123_spill] sm:$0xff]  ;;  %v8982_v27 = vld [vmem:[#allocation137_spill] sm:$0xff]  ;;  %v8983_v18 = vld [vmem:[#allocation146_spill] sm:$0xff] }
 0x3ab   : > { %v4374_v62 = vpop.eup %4373  ;;  %4393 = vpow2.f32 %v2025_v45  ;;  %v2039_v37 = vmul.f32 1.442695, %v1834_v11  ;;  %v2272_v7 = vadd.f32 %v4366_v34, %v2271_v16  ;;  %v2043_v6 = vmul.f32 1.442695, %v1836_v22 }
 0x3ac   : > { %v4376_v39 = vpop.eup %4375  ;;  %v7695_v20 = vpop.permute.xlu0 %1699  ;;  %4395 = vpow2.f32 %v2029_v36  ;;  %v2682_v1 = vpack.c.bf16 %v4374_v62, %v7677_v10  ;;  %v2037_v55 = vmul.f32 1.442695, %v1833_v57  ;;  %v1874_v36 = vsub.f32 %v8982_v27, %v7679_v32 }
 0x3ad   : > { %v4378_v53 = vpop.eup %4377  ;;  %v1838_v13 = vsub.f32 %v8980_v3, %v7695_v20  ;;  %4397 = vpow2.f32 %v2031_v4  ;;  %2273 = vadd.xlane.f32.xlu1 %v2272_v7  ;;  %v1840_v2 = vsub.f32 %v8981_v61, %v7695_v20  ;;  %v2683_v34 = vpack.c.bf16 %v4376_v39, %v7682_v44 }
 0x3ae   : > { %v4380_v58 = vpop.eup %4379  ;;  %2218 = vadd.xlane.f32.xlu0 %v7491_v35  ;;  %4399 = vpow2.f32 %v2035_v49  ;;  %v2684_v22 = vpack.c.bf16 %v4378_v53, %v7685_v14  ;;  %v2041_v4 = vmul.f32 1.442695, %v1835_v8  ;;  %v2280_v35 = vadd.f32 %v4376_v39, %v4374_v62 }
 0x3af   : > { %v7704_v45 = vpop.eup %4381  ;;  %v2047_v11 = vmul.f32 1.442695, %v1838_v13  ;;  %4401 = vpow2.f32 %v2039_v37  ;;  %2998 = vmatprep.mubr.bf16.mxu0 %v2683_v34  ;;  %v1875_v3 = vsub.f32 %v8983_v18, %v7679_v32  ;;  %v2033_v61 = vmul.f32 1.442695, %v1831_v46  ;;  %v8984_v37 = vld [vmem:[#allocation120_spill] sm:$0xff]  ;;  %v8985_v46 = vld [vmem:[#allocation129_spill] sm:$0xff] }
 0x3b0   : > { %v4384_v16 = vpop.eup %4383  ;;  %v2685_v57 = vpack.c.bf16 %v4380_v58, %v7704_v45  ;;  %v7710_v7 = vpop.permute.xlu0 %1709  ;;  %4403 = vpow2.f32 %v2043_v6  ;;  %v2051_v49 = vmul.f32 1.442695, %v1840_v2  ;;  %2999 = vmatmul.mubr.bf16.gmra.mrb[28].mxu0 %v2682_v1  ;;  %v1837_v8 = vsub.f32 %v8984_v37, %v7695_v20  ;;  %v8986_v1 = vld [vmem:[#allocation125_spill] sm:$0xff] }
 0x3b1   : > { %v7712_v56 = vpop.eup %4385  ;;  %4405 = vpow2.f32 %v2037_v55  ;;  %v2281_v34 = vadd.f32 %v4378_v53, %v2280_v35  ;;  %v2687_v62 = vpack.c.bf16 %v4384_v16, %v7600_v25  ;;  %v2117_v27 = vmul.f32 1.442695, %v1873_v63  ;;  %v8987_v53 = vld [vmem:[#allocation61_spill] sm:$0xff]  ;;  %v8988_v35 = vld [vmem:[#allocation60_spill] sm:$0xff] }
 0x3b2   : > { %v4388_v13 = vpop.eup %4387  ;;  %3159 = vmatprep.mubr.bf16.mxu1 %v2685_v57  ;;  %2223 = vadd.xlane.f32.xlu0 %v7498_v54  ;;  %v2119_v30 = vmul.f32 1.442695, %v1874_v36  ;;  %4407 = vpow2.f32 %v2047_v11  ;;  %v1846_v6 = vsub.f32 %v8985_v46, %v7710_v7  ;;  %v1839_v55 = vsub.f32 %v8986_v1, %v7695_v20  ;;  %v8989_v36 = vld [vmem:[#allocation134_spill] sm:$0xff] }
 0x3b3   : > { %v4390_v39 = vpop.eup %4389  ;;  %3160 = vmatmul.mubr.bf16.gmra.mrb[28].mxu1 %v2684_v22  ;;  %4409 = vpow2.f32 %v2041_v4  ;;  %v2282_v2 = vadd.f32 %v4380_v58, %v2281_v34  ;;  %3006 = vmatprep.mubr.bf16.mxu0 %v2687_v62  ;;  %v2689_v57 = vpack.c.bf16 %v4388_v13, %v7604_v40  ;;  %v1502_v18 = vsub.f32 %v8988_v35, %v8987_v53  ;;  %v8990_v4 = vld [vmem:[#allocation147_spill] sm:$0xff] }
 0x3b4   : > { %v7725_v54 = vpop.eup %4391  ;;  %v2121_v63 = vmul.f32 1.442695, %v1875_v3  ;;  %4411 = vpow2.f32 %v2051_v49  ;;  %v1848_v11 = vsub.f32 %v8989_v36, %v7710_v7  ;;  %v1876_v37 = vsub.f32 %v8990_v4, %v7679_v32  ;;  %v7743_v1 = vpop.permute.xlu0 %1719 }
 0x3b5   : > { %v4394_v22 = vpop.eup %4393  ;;  %4413 = vpow2.f32 %v2033_v61  ;;  %v2045_v20 = vmul.f32 1.442695, %v1837_v8  ;;  %2283 = vadd.xlane.f32.xlu1 %v2282_v2  ;;  %3167 = vmatprep.mubr.bf16.mxu1 %v2689_v57  ;;  %v2290_v58 = vadd.f32 %v4390_v39, %v4384_v16  ;;  %v2063_v62 = vmul.f32 1.442695, %v1846_v6  ;;  %v8991_v61 = vld [vmem:[#allocation126_spill] sm:$0xff] }
 0x3b6   : > { %v7733_v34 = vpop.eup %4395  ;;  %4415 = vpow2.f32 %v2117_v27  ;;  %2228 = vadd.xlane.f32.xlu0 %v7502_v0  ;;  %v2686_v3 = vpack.c.bf16 %v4390_v39, %v7596_v50  ;;  %v2310_v49 = vadd.f32 %v7608_v5, %v7606_v47  ;;  %v2049_v32 = vmul.f32 1.442695, %v1839_v55  ;;  %v8992_v0 = vld [vmem:[#allocation132_spill] sm:$0xff]  ;;  %v7750_v55 = vpop.permute.xlu1 %1754 }
 0x3b7   : > { %v7739_v46 = vpop.eup %4397  ;;  %4417 = vpow2.f32 %v2119_v30  ;;  %v1845_v8 = vsub.f32 %v8991_v61, %v7710_v7  ;;  %v2291_v16 = vadd.f32 %v4394_v22, %v2290_v58  ;;  %v1847_v27 = vsub.f32 %v8992_v0, %v7710_v7 }
 0x3b8   : > { %v7745_v2 = vpop.eup %4399  ;;  %4419 = vpow2.f32 %v2121_v63  ;;  %v2067_v39 = vmul.f32 1.442695, %v1848_v11  ;;  %3007 = vmatmul.mubr.bf16.gmra.mrb[32].mxu0 %v2686_v3  ;;  %v2688_v6 = vpack.c.bf16 %v4394_v22, %v7602_v15  ;;  %v2123_v36 = vmul.f32 1.442695, %v1876_v37  ;;  %v8993_v63 = vld [vmem:[#allocation135_spill] sm:$0xff]  ;;  %v8994_v37 = vld [vmem:[#allocation140_spill] sm:$0xff] }
 0x3b9   : > { %v4402_v57 = vpop.eup %4401  ;;  %4421 = vpow2.f32 %v2045_v20  ;;  %v2292_v30 = vadd.f32 %v4388_v13, %v2291_v16  ;;  %v2265_v4 = vadd.f32 %v7654_v51, %v7652_v59  ;;  %v1854_v61 = vsub.f32 %v8993_v63, %v7743_v1 }
 0x3ba   : > { %v4404_v58 = vpop.eup %4403  ;;  %4423 = vpow2.f32 %v2063_v62  ;;  %2238 = vadd.xlane.f32.xlu0 %v7505_v19  ;;  %v7758_v7 = vadd.f32 %v7614_v52, %v2310_v49  ;;  %v2285_v11 = vadd.f32 %v7600_v25, %v7596_v50  ;;  %v2061_v22 = vmul.f32 1.442695, %v1845_v8  ;;  %v8995_v19 = vld [vmem:[#allocation148_spill] sm:$0xff]  ;;  %v8996_v25 = vld [vmem:[#allocation149_spill] sm:$0xff] }
 0x3bb   : > { %3168 = vmatmul.mubr.bf16.gmra.mrb[32].mxu1 %v2688_v6  ;;  %v4406_v13 = vpop.eup %4405  ;;  %4425 = vpow2.f32 %v2049_v32  ;;  %v1856_v59 = vsub.f32 %v8994_v37, %v7743_v1  ;;  %2293 = vadd.xlane.f32.xlu1 %v2292_v30  ;;  %v2320_v51 = vadd.f32 %v7620_v31, %v7618_v42  ;;  %v2065_v62 = vmul.f32 1.442695, %v1847_v27  ;;  %v8997_v6 = vld [vmem:[#allocation133_spill] sm:$0xff]  ;;  %v8998_v37 = vld [vmem:[#allocation138_spill] sm:$0xff] }
 0x3bc   : > { %v7766_v20 = vpop.eup %4407  ;;  %4427 = vpow2.f32 %v2067_v39  ;;  %v1881_v3 = vsub.f32 %v8995_v19, %v7750_v55  ;;  %v2691_v49 = vpack.c.bf16 %v4402_v57, %v7739_v46  ;;  %v1882_v32 = vsub.f32 %v8996_v25, %v7750_v55 }
 0x3bd   : > { %v4410_v50 = vpop.eup %4409  ;;  %4429 = vpow2.f32 %v2123_v36  ;;  %v2693_v8 = vpack.c.bf16 %v4404_v58, %v7745_v2  ;;  %v2266_v16 = vadd.f32 %v7656_v26, %v2265_v4  ;;  %v1853_v27 = vsub.f32 %v8997_v6, %v7743_v1  ;;  %v7785_v26 = vpop.permute.xlu0 %1729 }
 0x3be   : > { %v7775_v0 = vpop.eup %4411  ;;  %v2079_v39 = vmul.f32 1.442695, %v1854_v61  ;;  %3014 = vmatprep.mubr.bf16.mxu0 %v2691_v49  ;;  %2248 = vadd.xlane.f32.xlu0 %v7515_v38  ;;  %v2300_v30 = vadd.f32 %v4406_v13, %v4402_v57  ;;  %v2690_v63 = vpack.c.bf16 %v4406_v13, %v7733_v34  ;;  %4431 = vpow2.f32 %v2061_v22  ;;  %v8999_v22 = vld [vmem:[#allocation151_spill] sm:$0xff] }
 0x3bf   : > { %v7781_v36 = vpop.eup %4413  ;;  %v1855_v19 = vsub.f32 %v8998_v37, %v7743_v1  ;;  %v2083_v25 = vmul.f32 1.442695, %v1856_v59  ;;  %3175 = vmatprep.mubr.bf16.mxu1 %v2693_v8  ;;  %v2695_v4 = vpack.c.bf16 %v7608_v5, %v7766_v20  ;;  %4433 = vpow2.f32 %v2065_v62  ;;  %v9001_v37 = vld [vmem:[#allocation139_spill] sm:$0xff] }
 0x3c0   : > { %v7789_v61 = vpop.eup %4415  ;;  %v2133_v38 = vmul.f32 1.442695, %v1881_v3  ;;  %v2301_v57 = vadd.f32 %v4410_v50, %v2300_v30  ;;  %3015 = vmatmul.mubr.bf16.gmra.mrb[36].mxu0 %v2690_v63  ;;  %v2692_v13 = vpack.c.bf16 %v4410_v50, %v7781_v36  ;;  %v1883_v1 = vsub.f32 %v8999_v22, %v7750_v55  ;;  %v9000_v3 = vld [vmem:[#allocation142_spill] sm:$0xff] }
 0x3c1   : > { %v7792_v49 = vpop.eup %4417  ;;  %v2135_v59 = vmul.f32 1.442695, %v1882_v32  ;;  %3022 = vmatprep.mubr.bf16.mxu0 %v2695_v4  ;;  %v2697_v8 = vpack.c.bf16 %v7616_v43, %v7775_v0  ;;  %v2275_v5 = vadd.f32 %v7682_v44, %v7677_v10  ;;  %v2077_v62 = vmul.f32 1.442695, %v1853_v27  ;;  %v9002_v27 = vld [vmem:[#allocation145_spill] sm:$0xff] }
 0x3c2   : > { %v7800_v6 = vpop.eup %4419  ;;  %4435 = vpow2.f32 %v2079_v39  ;;  %v1862_v50 = vsub.f32 %v9000_v3, %v7785_v26  ;;  %v2302_v30 = vadd.f32 %v4404_v58, %v2301_v57  ;;  %2258 = vadd.xlane.f32.xlu0 %v7509_v23  ;;  %v2081_v32 = vmul.f32 1.442695, %v1855_v19 }
 0x3c3   : > { %3176 = vmatmul.mubr.bf16.gmra.mrb[36].mxu1 %v2692_v13  ;;  %v4422_v63 = vpop.eup %4421  ;;  %4437 = vpow2.f32 %v2083_v25  ;;  %v1861_v4 = vsub.f32 %v9001_v37, %v7785_v26  ;;  %v2286_v10 = vadd.f32 %v7602_v15, %v2285_v11  ;;  %v1864_v39 = vsub.f32 %v9002_v27, %v7785_v26 }
 0x3c4   : > { %3183 = vmatprep.mubr.bf16.mxu1 %v2697_v8  ;;  %v7808_v44 = vpop.eup %4423  ;;  %4439 = vpow2.f32 %v2133_v38  ;;  %2303 = vadd.xlane.f32.xlu1 %v2302_v30  ;;  %v2267_v58 = vadd.f32 %v7660_v28, %v2266_v16  ;;  %v2276_v23 = vadd.f32 %v7685_v14, %v2275_v5  ;;  %v2137_v19 = vmul.f32 1.442695, %v1883_v1  ;;  %v9003_v16 = vld [vmem:[#allocation152_spill] sm:$0xff]  ;;  %v9004_v5 = vld [vmem:[#allocation69_spill] sm:$0xff] }
 0x3c5   : > { %v7814_v57 = vpop.eup %4425  ;;  %4441 = vpow2.f32 %v2135_v59  ;;  %v2312_v25 = vadd.f32 %v7616_v43, %v7758_v7  ;;  %v2321_v15 = vadd.f32 %v7625_v12, %v2320_v51  ;;  %v2095_v38 = vmul.f32 1.442695, %v1862_v50 }
 0x3c6   : > { %v7819_v11 = vpop.eup %4427  ;;  %4443 = vpow2.f32 %v2077_v62  ;;  %2268 = vadd.xlane.f32.xlu0 %v2267_v58  ;;  %v2694_v13 = vpack.c.bf16 %v7606_v47, %v4422_v63  ;;  %v2330_v28 = vadd.f32 %v7632_v60, %v7630_v41  ;;  %v1884_v22 = vsub.f32 %v9003_v16, %v7750_v55  ;;  %v9005_v62 = vld [vmem:[#allocation67_spill] sm:$0xff] }
 0x3c7   : > { %v7824_v14 = vpop.eup %4429  ;;  %4445 = vpow2.f32 %v2081_v32  ;;  %v2093_v1 = vmul.f32 1.442695, %v1861_v4  ;;  %v2699_v43 = vpack.c.bf16 %v7620_v31, %v7808_v44  ;;  %v2099_v7 = vmul.f32 1.442695, %v1864_v39  ;;  %v9006_v55 = vld [vmem:[#allocation143_spill] sm:$0xff] }
 0x3c8   : > { %2313 = vadd.xlane.f32.xlu1 %v2312_v25  ;;  %3023 = vmatmul.mubr.bf16.gmra.mrb[40].mxu0 %v2694_v13  ;;  %v2696_v51 = vpack.c.bf16 %v7614_v52, %v7814_v57  ;;  %v2277_v47 = vadd.f32 %v7704_v45, %v2276_v23  ;;  %v2295_v59 = vadd.f32 %v7739_v46, %v7733_v34  ;;  %v4432_v8 = vpop.eup %4431  ;;  %4447 = vpow2.f32 %v2137_v19 }
 0x3c9   : > { %v1506_v3 = vsub.f32 %v9005_v62, %v9004_v5  ;;  %v1863_v50 = vsub.f32 %v9006_v55, %v7785_v26  ;;  %3030 = vmatprep.mubr.bf16.mxu0 %v2699_v43  ;;  %v2701_v31 = vpack.c.bf16 %v7628_v33, %v7819_v11  ;;  %v4434_v30 = vpop.eup %4433  ;;  %4449 = vpow2.f32 %v2095_v38 }
 0x3ca   : > { %v2322_v52 = vadd.f32 %v7628_v33, %v2321_v15  ;;  %2278 = vadd.xlane.f32.xlu0 %v2277_v47  ;;  %v2331_v45 = vadd.f32 %v7637_v17, %v2330_v28  ;;  %v2340_v34 = vadd.f32 %v7647_v29, %v7641_v21  ;;  %v1535_v46 = vmul.f32 1.442695, %v1502_v18 }
 0x3cb   : > { %3184 = vmatmul.mubr.bf16.gmra.mrb[40].mxu1 %v2696_v51  ;;  %v2139_v26 = vmul.f32 1.442695, %v1884_v22  ;;  %4451 = vpow2.f32 %v2093_v1  ;;  %v2287_v37 = vadd.f32 %v7604_v40, %v2286_v10  ;;  %v2296_v33 = vadd.f32 %v7781_v36, %v2295_v59  ;;  %v9007_v36 = vld [vmem:[#allocation73_spill] sm:$0xff] }
 0x3cc   : > { %3191 = vmatprep.mubr.bf16.mxu1 %v2701_v31  ;;  %v4436_v32 = vpop.eup %4435  ;;  %4453 = vpow2.f32 %v2099_v7  ;;  %2323 = vadd.xlane.f32.xlu1 %v2322_v52  ;;  %v2305_v4 = vadd.f32 %v4422_v63, %v7766_v20  ;;  %v1543_v39 = vmul.f32 1.442695, %v1506_v3  ;;  %v2097_v58 = vmul.f32 1.442695, %v1863_v50  ;;  %v9008_v20 = vld [vmem:[#allocation71_spill] sm:$0xff]  ;;  %v9011_v50 = vld [vmem:[#allocation81_spill] sm:$0xff] }
 0x3cd   : > { %v7851_v27 = vpop.eup %4437  ;;  %v2332_v53 = vadd.f32 %v7639_v24, %v2331_v45  ;;  %v2341_v35 = vadd.f32 %v7712_v56, %v2340_v34  ;;  %v2698_v18 = vpack.c.bf16 %v7618_v42, %v4432_v8  ;;  %v2350_v40 = vadd.f32 %v7792_v49, %v7789_v61  ;;  %v9012_v31 = vld [vmem:[#allocation79_spill] sm:$0xff] }
 0x3ce   : > { %v7853_v23 = vpop.eup %4439  ;;  %2288 = vadd.xlane.f32.xlu0 %v2287_v37  ;;  %v1508_v63 = vsub.f32 %v9008_v20, %v9007_v36  ;;  %4455 = vpow2.f32 %v2139_v26  ;;  %v2700_v19 = vpack.c.bf16 %v7625_v12, %v4434_v30  ;;  %v2703_v25 = vpack.c.bf16 %v7632_v60, %v4436_v32 }
 0x3cf   : > { %v7860_v10 = vpop.eup %4441  ;;  %4457 = vpow2.f32 %v1535_v46  ;;  %v2297_v38 = vadd.f32 %v7745_v2, %v2296_v33  ;;  %v2306_v42 = vadd.f32 %v7814_v57, %v2305_v4  ;;  %v2315_v13 = vadd.f32 %v4432_v8, %v7808_v44  ;;  %v9009_v57 = vld [vmem:[#allocation77_spill] sm:$0xff]  ;;  %v9010_v44 = vld [vmem:[#allocation75_spill] sm:$0xff] }
 0x3d0   : > { %v4444_v15 = vpop.eup %4443  ;;  %2333 = vadd.xlane.f32.xlu1 %v2332_v53  ;;  %3031 = vmatmul.mubr.bf16.gmra.mrb[44].mxu0 %v2698_v18  ;;  %4459 = vpow2.f32 %v2097_v58  ;;  %v2705_v16 = vpack.c.bf16 %v7639_v24, %v7851_v27  ;;  %v2342_v12 = vadd.f32 %v7725_v54, %v2341_v35  ;;  %v2351_v60 = vadd.f32 %v7800_v6, %v2350_v40 }
 0x3d1   : > { %v4446_v28 = vpop.eup %4445  ;;  %3038 = vmatprep.mubr.bf16.mxu0 %v2703_v25  ;;  %v2360_v22 = vadd.f32 %v7860_v10, %v7853_v23  ;;  %4461 = vpow2.f32 %v1543_v39  ;;  %v1510_v1 = vsub.f32 %v9010_v44, %v9009_v57  ;;  %v1547_v7 = vmul.f32 1.442695, %v1508_v63  ;;  %v9013_v25 = vld [vmem:[#allocation64_spill] sm:$0xff] }
 0x3d2   : > { %2298 = vadd.xlane.f32.xlu0 %v2297_v38  ;;  %v7875_v2 = vpop.eup %4447  ;;  %v2307_v24 = vadd.f32 %v7775_v0, %v2306_v42  ;;  %v2316_v51 = vadd.f32 %v4434_v30, %v2315_v13  ;;  %v2325_v47 = vadd.f32 %v4444_v15, %v4436_v32  ;;  %v2352_v5 = vadd.f32 %v7824_v14, %v2351_v60 }
 0x3d3   : > { %3192 = vmatmul.mubr.bf16.gmra.mrb[44].mxu1 %v2700_v19  ;;  %v4450_v43 = vpop.eup %4449  ;;  %v2361_v62 = vadd.f32 %v7875_v2, %v2360_v22  ;;  %v2702_v3 = vpack.c.bf16 %v7630_v41, %v4444_v15  ;;  %v1551_v55 = vmul.f32 1.442695, %v1510_v1  ;;  %v1512_v52 = vsub.f32 %v9012_v31, %v9011_v50  ;;  %v9014_v15 = vld [vmem:[#allocation62_spill] sm:$0xff] }
 0x3d4   : > { %3199 = vmatprep.mubr.bf16.mxu1 %v2705_v16  ;;  %2343 = vadd.xlane.f32.xlu1 %v2342_v12  ;;  %v2704_v45 = vpack.c.bf16 %v7637_v17, %v4446_v28  ;;  %v2707_v34 = vpack.c.bf16 %v7647_v29, %v4450_v43  ;;  %4463 = vpow2.f32 %v1547_v7  ;;  %v2317_v0 = vadd.f32 %v7819_v11, %v2316_v51  ;;  %v2142_v29 = vld [vmem:[#allocation3 + $0x8] sm:$0xff] }
 0x3d5   : > { %v4452_v59 = vpop.eup %4451  ;;  %v2326_v30 = vadd.f32 %v4446_v28, %v2325_v47  ;;  %4465 = vpow2.f32 %v1551_v55  ;;  %v1555_v39 = vmul.f32 1.442695, %v1512_v52  ;;  %v1503_v38 = vsub.f32 %v9014_v15, %v9013_v25  ;;  %v2146_v12 = vld [vmem:[#allocation3 + $0x28] sm:$0xff] }
 0x3d6   : > { %v4454_v8 = vpop.eup %4453  ;;  %2308 = vadd.xlane.f32.xlu0 %v2307_v24  ;;  %v2335_v46 = vadd.f32 %v4452_v59, %v4450_v43  ;;  %v2706_v28 = vpack.c.bf16 %v7641_v21, %v4452_v59  ;;  %v9016_v24 = vld [vmem:[#allocation65_spill] sm:$0xff]  ;;  %v9017_v51 = vld [vmem:[#allocation63_spill] sm:$0xff] }
 0x3d7   : > { %v2709_v41 = vpack.c.bf16 %v7725_v54, %v4454_v8  ;;  %v2327_v54 = vadd.f32 %v7851_v27, %v2326_v30  ;;  %4467 = vpow2.f32 %v1555_v39  ;;  %v1537_v21 = vmul.f32 1.442695, %v1503_v38 }
 0x3d8   : > { %2353 = vadd.xlane.f32.xlu1 %v2352_v5  ;;  %3039 = vmatmul.mubr.bf16.gmra.mrb[48].mxu0 %v2702_v3  ;;  %v7888_v26 = vpop.eup %4455  ;;  %v3893_v17 = vpop.f32.mrb[0].mxu0  ;;  %v1504_v47 = vsub.f32 %v9017_v51, %v9016_v24 }
 0x3d9   : > { %3046 = vmatprep.mubr.bf16.mxu0 %v2707_v34  ;;  %v7891_v32 = vpop.eup %4457  ;;  %v2362_v37 = vadd.f32 %v7888_v26, %v2361_v62  ;;  %v4005_v4 = vpop.f32.mrb[0].mxu1  ;;  %v2148_v62 = vld [vmem:[#allocation3 + $0x38] sm:$0xff]  ;;  %4469 = vpow2.f32 %v1537_v21 }
 0x3da   : > { %2318 = vadd.xlane.f32.xlu0 %v2317_v0  ;;  %v4460_v33 = vpop.eup %4459  ;;  %v3894_v11 = vpop.f32.mrb[1].mxu0  ;;  %v2174_v19 = vmul.f32 %v7891_v32, %v2142_v29  ;;  %v2150_v29 = vld [vmem:[#allocation3 + $0x48] sm:$0xff] }
 0x3db   : > { %3200 = vmatmul.mubr.bf16.gmra.mrb[48].mxu1 %v2704_v45  ;;  %v3895_v58 = vadd.f32 %v3894_v11, %v3893_v17  ;;  %v4006_v53 = vpop.f32.mrb[1].mxu1  ;;  %v3896_v35 = vpop.f32.mrb[2].mxu0  ;;  %v2336_v18 = vadd.f32 %v4460_v33, %v2335_v46  ;;  %v2708_v57 = vpack.c.bf16 %v7712_v56, %v4460_v33  ;;  %v1539_v46 = vmul.f32 1.442695, %v1504_v47 }
 0x3dc   : > { %3207 = vmatprep.mubr.bf16.mxu1 %v2709_v41  ;;  %2363 = vadd.xlane.f32.xlu1 %v2362_v37  ;;  %v7895_v40 = vpop.eup %4461  ;;  %v4007_v36 = vadd.f32 %v4006_v53, %v4005_v4  ;;  %v4008_v20 = vpop.f32.mrb[2].mxu1 }
 0x3dd   : > { %v3897_v63 = vpop.f32.mrb[3].mxu0  ;;  %v4009_v13 = vpop.f32.mrb[3].mxu1  ;;  %v2337_v44 = vadd.f32 %v4454_v8, %v2336_v18  ;;  %v2178_v43 = vmul.f32 %v7895_v40, %v2146_v12  ;;  %4471 = vpow2.f32 %v1539_v46  ;;  %v2152_v18 = vld [vmem:[#allocation3 + $0x58] sm:$0xff] }
 0x3de   : > { %v3898_v42 = vadd.f32 %v3897_v63, %v3896_v35  ;;  %2328 = vadd.xlane.f32.xlu0 %v2327_v54  ;;  %v2214_v16 = vpop.xlane.xlu1 %2213  ;;  %v7901_v60 = vadd.f32 %v4007_v36, %v3895_v58  ;;  %v4010_v27 = vadd.f32 %v4009_v13, %v4008_v20  ;;  %v7908_v7 = vpop.eup %4463 }
 0x3df   : > { %v2366_v22 = vadd.f32 %v2214_v16, %v2174_v19  ;;  %v7912_v52 = vpop.eup %4465  ;;  %v2180_v30 = vmul.f32 %v7908_v7, %v2148_v62 }
 0x3e0   : > { %3047 = vmatmul.mubr.bf16.gmra.mrb[52].mxu0 %v2706_v28  ;;  %v7904_v1 = vadd.f32 %v4010_v27, %v3898_v42  ;;  %v3899_v59 = vpop.f32.mrb[4].mxu0  ;;  %v2182_v58 = vmul.f32 %v7912_v52, %v2150_v29 }
 0x3e1   : > { %2399 = vst.msk [vmem:[#allocation3 + $0x8] sm:$0xff] %vm9015_vm9, %v2366_v22  ;;  %v4011_v3 = vpop.f32.mrb[4].mxu1  ;;  %v3900_v56 = vpop.f32.mrb[5].mxu0  ;;  %vm9092_vm9 = vmmov %vm9069_vm0 }
 0x3e2   : > { %2338 = vadd.xlane.f32.xlu0 %v2337_v44  ;;  %v2234_v5 = vpop.xlane.xlu1 %2233  ;;  %v3901_v55 = vadd.f32 %v3900_v56, %v3899_v59  ;;  %v4012_v50 = vpop.f32.mrb[5].mxu1 }
 0x3e3   : > { %3208 = vmatmul.mubr.bf16.gmra.mrb[52].mxu1 %v2708_v57  ;;  %v2370_v8 = vadd.f32 %v2234_v5, %v2178_v43  ;;  %v3902_v31 = vpop.f32.mrb[6].mxu0  ;;  %v4013_v45 = vadd.f32 %v4012_v50, %v4011_v3  ;;  %v4014_v34 = vpop.f32.mrb[6].mxu1 }
 0x3e4   : > { %v3903_v0 = vpop.f32.mrb[7].mxu0  ;;  %v4015_v37 = vpop.f32.mrb[7].mxu1 }
 0x3e5   : > { %2403 = vst.msk [vmem:[#allocation3 + $0x28] sm:$0xff] %vm9018_vm13, %v2370_v8  ;;  %v3904_v41 = vadd.f32 %v3903_v0, %v3902_v31  ;;  %v7916_v33 = vadd.f32 %v4013_v45, %v3901_v55  ;;  %v4016_v4 = vadd.f32 %v4015_v37, %v4014_v34  ;;  %v7922_v53 = vpop.eup %4467  ;;  %v9022_v55 = vld [vmem:[#allocation150_spill] sm:$0xff]  ;;  %vm9093_vm13 = vmmov %vm9069_vm0 }
 0x3e6   : > { %v2244_v17 = vpop.xlane.xlu1 %2243  ;;  %v2184_v28 = vmul.f32 %v7922_v53, %v2152_v18  ;;  %v7929_v43 = vpop.eup %4469  ;;  %v1514_v50 = vsub.f32 %v9022_v55, %v7014_v9 }
 0x3e7   : > { %v2372_v11 = vadd.f32 %v2244_v17, %v2180_v30  ;;  %v7918_v39 = vadd.f32 %v4016_v4, %v3904_v41  ;;  %v7935_v47 = vpop.eup %4471  ;;  %v9023_v30 = vld [vmem:[#allocation155_spill] sm:$0xff] }
 0x3e8   : > { %v3905_v35 = vpop.f32.mrb[8].mxu0  ;;  %v1516_v46 = vsub.f32 %v9023_v30, %v7040_v48  ;;  %v1559_v37 = vmul.f32 1.442695, %v1514_v50 }
 0x3e9   : > { %2405 = vst.msk [vmem:[#allocation3 + $0x38] sm:$0xff] %vm9019_vm2, %v2372_v11  ;;  %v4017_v36 = vpop.f32.mrb[8].mxu1  ;;  %v3906_v20 = vpop.f32.mrb[9].mxu0  ;;  %v9024_v11 = vld [vmem:[#allocation160_spill] sm:$0xff]  ;;  %vm9094_vm2 = vmmov %vm9069_vm0 }
 0x3ea   : > { %v2254_v54 = vpop.xlane.xlu1 %2253  ;;  %v3907_v19 = vadd.f32 %v3906_v20, %v3905_v35  ;;  %v4018_v25 = vpop.f32.mrb[9].mxu1  ;;  %v9026_v20 = vld [vmem:[#allocation164_spill] sm:$0xff]  ;;  %4473 = vpow2.f32 %v1559_v37 }
 0x3eb   : > { %v2374_v63 = vadd.f32 %v2254_v54, %v2182_v58  ;;  %v3908_v15 = vpop.f32.mrb[10].mxu0  ;;  %v4019_v38 = vadd.f32 %v4018_v25, %v4017_v36  ;;  %v4020_v42 = vpop.f32.mrb[10].mxu1  ;;  %v9025_v58 = vld [vmem:[#allocation158_spill] sm:$0xff]  ;;  %v1563_v36 = vmul.f32 1.442695, %v1516_v46 }
 0x3ec   : > { %v3909_v13 = vpop.f32.mrb[11].mxu0  ;;  %v4021_v12 = vpop.f32.mrb[11].mxu1  ;;  %v1518_v35 = vsub.f32 %v9025_v58, %v9024_v11 }
 0x3ed   : > { %2469 = vperm.xlu1 %4186, %v7891_v32   ;;  %2407 = vst.msk [vmem:[#allocation3 + $0x48] sm:$0xff] %vm9020_vm8, %v2374_v63  ;;  %v3910_v16 = vadd.f32 %v3909_v13, %v3908_v15  ;;  %v7927_v22 = vadd.f32 %v4019_v38, %v3907_v19  ;;  %v4022_v57 = vadd.f32 %v4021_v12, %v4020_v42  ;;  %v9027_v63 = vld [vmem:[#allocation162_spill] sm:$0xff]  ;;  %4475 = vpow2.f32 %v1563_v36  ;;  %vm9098_vm8 = vmmov %vm9069_vm0 }
 0x3ee   : > { %v2264_v27 = vpop.xlane.xlu1 %2263  ;;  %v1520_v19 = vsub.f32 %v9027_v63, %v9026_v20  ;;  %v9035_v20 = vld [vmem:[#allocation92_spill] sm:$0xff] }
 0x3ef   : > { %v2376_v44 = vadd.f32 %v2264_v27, %v2184_v28  ;;  %v7932_v21 = vadd.f32 %v4022_v57, %v3910_v16  ;;  %v1567_v28 = vmul.f32 1.442695, %v1518_v35  ;;  %v9032_v35 = vld [vmem:[#allocation167_spill] sm:$0xff] }
 0x3f0   : > { %v3911_v32 = vpop.f32.mrb[12].mxu0  ;;  %v1571_v16 = vmul.f32 1.442695, %v1520_v19  ;;  %v9036_v19 = vld [vmem:[#allocation18_spill] sm:$0xff] }
 0x3f1   : > { %2474 = vperm.xlu1 %4186, %v7929_v43   ;;  %2409 = vst.msk [vmem:[#allocation3 + $0x58] sm:$0xff] %vm9021_vm12, %v2376_v44  ;;  %v4023_v24 = vpop.f32.mrb[12].mxu1  ;;  %v3912_v51 = vpop.f32.mrb[13].mxu0  ;;  %v9028_v44 = vld [vmem:[#allocation26_spill] sm:$0xff]  ;;  %4477 = vpow2.f32 %v1567_v28  ;;  %vm9099_vm12 = vmmov %vm9069_vm0 }
 0x3f2   : > { %v3913_v59 = vadd.f32 %v3912_v51, %v3911_v32  ;;  %v4024_v5 = vpop.f32.mrb[13].mxu1  ;;  %v3914_v62 = vpop.f32.mrb[14].mxu0  ;;  %v9029_v32 = vld [vmem:[#allocation29_spill] sm:$0xff]  ;;  %v9030_v51 = vld [vmem:[#allocation31_spill] sm:$0xff]  ;;  %4479 = vpow2.f32 %v1571_v16 }
 0x3f3   : > { %v4025_v3 = vadd.f32 %v4024_v5, %v4023_v24  ;;  %v4026_v56 = vpop.f32.mrb[14].mxu1  ;;  %v3915_v8 = vpop.f32.mrb[15].mxu0  ;;  %v9031_v5 = vld [vmem:[#allocation34_spill] sm:$0xff] }
 0x3f4   : > { %v3916_v31 = vadd.f32 %v3915_v8, %v3914_v62  ;;  %v4027_v45 = vpop.f32.mrb[15].mxu1  ;;  %v7964_v58 = vpop.eup %4473 }
 0x3f5   : > { %2479 = vperm.xlu1 %4186, %v7935_v47   ;;  %v7940_v34 = vadd.f32 %v4025_v3, %v3913_v59  ;;  %v4028_v0 = vadd.f32 %v4027_v45, %v4026_v56 }
 0x3f7   : > { %v7945_v41 = vadd.f32 %v4028_v0, %v3916_v31 }
 0x3f8   : > { %v3917_v17 = vpop.f32.mrb[16].mxu0 }
 0x3f9   : > { %2489 = vperm.xlu1 %4186, %v7895_v40   ;;  %v4029_v29 = vpop.f32.mrb[16].mxu1  ;;  %v3918_v4 = vpop.f32.mrb[17].mxu0 }
 0x3fa   : > { %v3919_v9 = vadd.f32 %v3918_v4, %v3917_v17  ;;  %v4030_v54 = vpop.f32.mrb[17].mxu1  ;;  %v3920_v18 = vpop.f32.mrb[18].mxu0 }
 0x3fb   : > { %v4031_v48 = vadd.f32 %v4030_v54, %v4029_v29  ;;  %v4032_v40 = vpop.f32.mrb[18].mxu1  ;;  %v3921_v25 = vpop.f32.mrb[19].mxu0 }
 0x3fc   : > { %v3922_v15 = vadd.f32 %v3921_v25, %v3920_v18  ;;  %v4033_v38 = vpop.f32.mrb[19].mxu1 }
 0x3fd   : > { %2499 = vperm.xlu1 %4186, %v7908_v7   ;;  %v7952_v42 = vadd.f32 %v4031_v48, %v3919_v9  ;;  %v4034_v13 = vadd.f32 %v4033_v38, %v4032_v40  ;;  %v9033_v9 = vld [vmem:[#allocation169_spill] sm:$0xff]  ;;  %v9037_v40 = vld [vmem:[#allocation19_spill] sm:$0xff] }
 0x3fe   : > { %v9034_v54 = vsub.f32 %v9032_v35, %v9033_v9 }
 0x3ff   : > { %v7955_v12 = vadd.f32 %v4034_v13, %v3922_v15  ;;  %v9038_v15 = vld [vmem:[#allocation22_spill] sm:$0xff]  ;;  %v7976_v13 = vpop.eup %4475 }
 0x400   : > { %v3923_v57 = vpop.f32.mrb[20].mxu0  ;;  %v1575_v18 = vmul.f32 1.442695, %v9034_v54  ;;  %v9048_v54 = vld [vmem:[#allocation182_spill] sm:$0xff] }
 0x401   : > { %2509 = vperm.xlu1 %4186, %v7912_v52   ;;  %v1740_v27 = vpop.permute.xlu0 %1739  ;;  %v4035_v3 = vpop.f32.mrb[20].mxu1 }
 0x402   : > { %v1869_v7 = vsub.f32 %v9028_v44, %v1740_v27  ;;  %v1870_v24 = vsub.f32 %v9029_v32, %v1740_v27  ;;  %v1871_v59 = vsub.f32 %v9030_v51, %v1740_v27  ;;  %v1872_v62 = vsub.f32 %v9031_v5, %v1740_v27  ;;  %v3924_v56 = vpop.f32.mrb[21].mxu0  ;;  %v4036_v55 = vpop.f32.mrb[21].mxu1  ;;  %v9040_v32 = vld [vmem:[#allocation172_spill] sm:$0xff] }
 0x403   : > { %v3925_v8 = vadd.f32 %v3924_v56, %v3923_v57  ;;  %v3926_v50 = vpop.f32.mrb[22].mxu0  ;;  %v4037_v45 = vadd.f32 %v4036_v55, %v4035_v3  ;;  %v4038_v0 = vpop.f32.mrb[22].mxu1  ;;  %v9043_v55 = vld [vmem:[#allocation176_spill] sm:$0xff] }
 0x404   : > { %v2109_v31 = vmul.f32 1.442695, %v1869_v7  ;;  %v2111_v52 = vmul.f32 1.442695, %v1870_v24  ;;  %v3927_v30 = vpop.f32.mrb[23].mxu0  ;;  %v4039_v29 = vpop.f32.mrb[23].mxu1 }
 0x405   : > { %2519 = vperm.xlu1 %4186, %v7922_v53   ;;  %v2113_v46 = vmul.f32 1.442695, %v1871_v59  ;;  %v2115_v37 = vmul.f32 1.442695, %v1872_v62  ;;  %v3928_v17 = vadd.f32 %v3927_v30, %v3926_v50  ;;  %v7962_v4 = vadd.f32 %v4037_v45, %v3925_v8  ;;  %v7979_v44 = vpop.eup %4477  ;;  %v9039_v7 = vld [vmem:[#allocation170_spill] sm:$0xff] }
 0x406   : > { %4481 = vpow2.f32 %v2109_v31  ;;  %v4040_v11 = vadd.f32 %v4039_v29, %v4038_v0  ;;  %v9041_v24 = vsub.f32 %v9039_v7, %v9040_v32  ;;  %v7984_v59 = vpop.eup %4479  ;;  %v9042_v8 = vld [vmem:[#allocation174_spill] sm:$0xff]  ;;  %v9054_v32 = vld [vmem:[#allocation59_spill] sm:$0xff] }
 0x407   : > { %4483 = vpow2.f32 %v2111_v52  ;;  %v9044_v50 = vsub.f32 %v9042_v8, %v9043_v55  ;;  %v9058_v55 = vld [vmem:[#allocation72_spill] sm:$0xff] }
 0x408   : > { %4485 = vpow2.f32 %v2113_v46  ;;  %v7970_v53 = vadd.f32 %v4040_v11, %v3928_v17  ;;  %v1579_v51 = vmul.f32 1.442695, %v9041_v24  ;;  %v9046_v17 = vld [vmem:[#allocation180_spill] sm:$0xff]  ;;  %v9055_v24 = vld [vmem:[#allocation58_spill] sm:$0xff] }
 0x409   : > { %2529 = vperm.xlu1 %4186, %v7964_v58   ;;  %4487 = vpow2.f32 %v2115_v37  ;;  %v1583_v31 = vmul.f32 1.442695, %v9044_v50  ;;  %v9059_v50 = vld [vmem:[#allocation70_spill] sm:$0xff] }
 0x40a   : > { %v1750_v36 = vpop.permute.xlu0 %1749  ;;  %4489 = vpow2.f32 %v1575_v18  ;;  %v9049_v18 = vld [vmem:[#allocation183_spill] sm:$0xff] }
 0x40b   : > { %v1877_v63 = vsub.f32 %v9035_v20, %v1750_v36  ;;  %v1878_v48 = vsub.f32 %v9036_v19, %v1750_v36  ;;  %v1879_v25 = vsub.f32 %v9037_v40, %v1750_v36  ;;  %v1880_v38 = vsub.f32 %v9038_v15, %v1750_v36 }
 0x40c   : > { %v9050_v36 = vsub.f32 %v9048_v54, %v9049_v18  ;;  %v2143_v18 = vld [vmem:[#allocation3 + $0x10] sm:$0xff] }
 0x40d   : > { %v2125_v28 = vmul.f32 1.442695, %v1877_v63  ;;  %v2127_v16 = vmul.f32 1.442695, %v1878_v48  ;;  %v2129_v27 = vmul.f32 1.442695, %v1879_v25  ;;  %2539 = vperm.xlu1 %4186, %v7976_v13  }
 0x40e   : > { %v2131_v57 = vmul.f32 1.442695, %v1880_v38  ;;  %v1591_v20 = vmul.f32 1.442695, %v9050_v36  ;;  %v9064_v36 = vld [vmem:[#allocation154_spill] sm:$0xff] }
 0x40f   : > { %4491 = vpow2.f32 %v2125_v28 }
 0x410   : > { %4493 = vpow2.f32 %v2127_v16  ;;  %v4482_v5 = vpop.eup %4481  ;;  %v9051_v16 = vld [vmem:[#allocation23_spill] sm:$0xff] }
 0x411   : > { %4495 = vpow2.f32 %v2129_v27  ;;  %v4484_v62 = vpop.eup %4483  ;;  %2549 = vperm.xlu1 %4186, %v7979_v44   ;;  %v2710_v3 = vpack.c.bf16 %v7789_v61, %v4482_v5  ;;  %v9045_v61 = vld [vmem:[#allocation178_spill] sm:$0xff] }
 0x412   : > { %4497 = vpow2.f32 %v2131_v57  ;;  %v4486_v56 = vpop.eup %4485  ;;  %v2711_v52 = vpack.c.bf16 %v7792_v49, %v4484_v62  ;;  %v2345_v45 = vadd.f32 %v4484_v62, %v4482_v5  ;;  %v9047_v29 = vsub.f32 %v9045_v61, %v9046_v17  ;;  %v9052_v27 = vld [vmem:[#allocation14_spill] sm:$0xff]  ;;  %v9056_v5 = vld [vmem:[#allocation68_spill] sm:$0xff] }
 0x413   : > { %4499 = vpow2.f32 %v1579_v51  ;;  %v4488_v0 = vpop.eup %4487  ;;  %v2712_v30 = vpack.c.bf16 %v7800_v6, %v4486_v56  ;;  %v9053_v57 = vsub.f32 %v9051_v16, %v9052_v27  ;;  %v1501_v51 = vsub.f32 %v9055_v24, %v9054_v32  ;;  %v9057_v62 = vld [vmem:[#allocation66_spill] sm:$0xff]  ;;  %v9062_v61 = vld [vmem:[#allocation80_spill] sm:$0xff]  ;;  %v2144_v16 = vld [vmem:[#allocation3 + $0x18] sm:$0xff] }
 0x414   : > { %3054 = vmatprep.mubr.bf16.mxu0 %v2711_v52  ;;  %v2713_v46 = vpack.c.bf16 %v7824_v14, %v4488_v0  ;;  %v2346_v37 = vadd.f32 %v4486_v56, %v2345_v45  ;;  %4501 = vpow2.f32 %v1583_v31  ;;  %v1587_v11 = vmul.f32 1.442695, %v9047_v29  ;;  %v7998_v9 = vpop.eup %4489  ;;  %v9063_v17 = vld [vmem:[#allocation78_spill] sm:$0xff] }
 0x415   : > { %2559 = vperm.xlu1 %4186, %v7984_v59   ;;  %3055 = vmatmul.mubr.bf16.gmra.mrb[56].mxu0 %v2710_v3  ;;  %v1505_v3 = vsub.f32 %v9057_v62, %v9056_v5  ;;  %v1507_v31 = vsub.f32 %v9059_v50, %v9058_v55  ;;  %v1511_v29 = vsub.f32 %v9063_v17, %v9062_v61 }
 0x416   : > { %3215 = vmatprep.mubr.bf16.mxu1 %v2713_v46  ;;  %v2347_v35 = vadd.f32 %v4488_v0, %v2346_v37  ;;  %4503 = vpow2.f32 %v1587_v11  ;;  %v9060_v0 = vld [vmem:[#allocation76_spill] sm:$0xff]  ;;  %v2141_v11 = vld [vmem:[#allocation3] sm:$0xff] }
 0x417   : > { %3216 = vmatmul.mubr.bf16.gmra.mrb[56].mxu1 %v2712_v30  ;;  %4505 = vpow2.f32 %v1591_v20  ;;  %v1541_v8 = vmul.f32 1.442695, %v1505_v3  ;;  %v1545_v45 = vmul.f32 1.442695, %v1507_v31  ;;  %v9061_v30 = vld [vmem:[#allocation74_spill] sm:$0xff]  ;;  %v9065_v20 = vld [vmem:[#allocation153_spill] sm:$0xff] }
 0x418   : > { %2348 = vadd.xlane.f32.xlu0 %v2347_v35  ;;  %v1509_v46 = vsub.f32 %v9061_v30, %v9060_v0  ;;  %v2145_v3 = vld [vmem:[#allocation3 + $0x20] sm:$0xff]  ;;  %v9073_v0 = vld [vmem:[#allocation161_spill] sm:$0xff] }
 0x419   : > { %v4492_v49 = vpop.eup %4491  ;;  %2569 = vperm.xlu1 %4186, %v7998_v9  }
 0x41a   : > { %v4494_v6 = vpop.eup %4493  ;;  %v2714_v40 = vpack.c.bf16 %v7853_v23, %v4492_v49  ;;  %v1549_v35 = vmul.f32 1.442695, %v1509_v46  ;;  %v9075_v46 = vld [vmem:[#allocation165_spill] sm:$0xff] }
 0x41b   : > { %v4496_v14 = vpop.eup %4495  ;;  %v2715_v63 = vpack.c.bf16 %v7860_v10, %v4494_v6  ;;  %v2355_v19 = vadd.f32 %v4494_v6, %v4492_v49  ;;  %v1595_v10 = vmul.f32 1.442695, %v9053_v57  ;;  %v1553_v6 = vmul.f32 1.442695, %v1511_v29  ;;  %v9067_v57 = vld [vmem:[#allocation157_spill] sm:$0xff] }
 0x41c   : > { %v4498_v48 = vpop.eup %4497  ;;  %v2716_v28 = vpack.c.bf16 %v7875_v2, %v4496_v14  ;;  %v1533_v2 = vmul.f32 1.442695, %v1501_v51 }
 0x41d   : > { %v8006_v25 = vpop.eup %4499  ;;  %3062 = vmatprep.mubr.bf16.mxu0 %v2715_v63  ;;  %v2717_v15 = vpack.c.bf16 %v7888_v26, %v4498_v48  ;;  %v2356_v38 = vadd.f32 %v4496_v14, %v2355_v19  ;;  %4507 = vpow2.f32 %v1595_v10  ;;  %v2154_v14 = vld [vmem:[#allocation3 + $0x68] sm:$0xff]  ;;  %v1513_v63 = vsub.f32 %v9065_v20, %v9064_v36  ;;  %v9068_v10 = vld [vmem:[#allocation156_spill] sm:$0xff] }
 0x41e   : > { %2579 = vperm.xlu1 %4186, %v8006_v25   ;;  %3063 = vmatmul.mubr.bf16.gmra.mrb[60].mxu0 %v2714_v40  ;;  %v8014_v23 = vpop.eup %4501  ;;  %4509 = vpow2.f32 %v1533_v2  ;;  %v2186_v40 = vmul.f32 %v7964_v58, %v2154_v14  ;;  %v2176_v58 = vmul.f32 %v7935_v47, %v2144_v16 }
 0x41f   : > { %3223 = vmatprep.mubr.bf16.mxu1 %v2717_v15  ;;  %v2357_v7 = vadd.f32 %v4498_v48, %v2356_v38  ;;  %4511 = vpow2.f32 %v1541_v8  ;;  %v2175_v15 = vmul.f32 %v7929_v43, %v2143_v18  ;;  %v1557_v27 = vmul.f32 1.442695, %v1513_v63  ;;  %v2156_v43 = vld [vmem:[#allocation3 + $0x78] sm:$0xff]  ;;  %v9080_v18 = vld [vmem:[#allocation166_spill] sm:$0xff] }
 0x420   : > { %3224 = vmatmul.mubr.bf16.gmra.mrb[60].mxu1 %v2716_v28  ;;  %v8019_v26 = vpop.eup %4503  ;;  %4513 = vpow2.f32 %v1545_v45  ;;  %v2188_v55 = vmul.f32 %v7976_v13, %v2156_v43  ;;  %v9072_v45 = vld [vmem:[#allocation159_spill] sm:$0xff] }
 0x421   : > { %2358 = vadd.xlane.f32.xlu0 %v2357_v7  ;;  %v8024_v56 = vpop.eup %4505  ;;  %4515 = vpow2.f32 %v1549_v35  ;;  %v1515_v7 = vsub.f32 %v9068_v10, %v9067_v57  ;;  %v9074_v30 = vsub.f32 %v9072_v45, %v9073_v0  ;;  %v9083_v57 = vld [vmem:[#allocation171_spill] sm:$0xff] }
 0x422   : > { %2589 = vperm.xlu1 %4186, %v8014_v23   ;;  %4517 = vpow2.f32 %v1553_v6  ;;  %v2162_v0 = vld [vmem:[#allocation3 + $0xa8] sm:$0xff] }
 0x423   : > { %4519 = vpow2.f32 %v1557_v27  ;;  %v1561_v5 = vmul.f32 1.442695, %v1515_v7  ;;  %v1565_v47 = vmul.f32 1.442695, %v9074_v30  ;;  %v9082_v27 = vld [vmem:[#allocation173_spill] sm:$0xff] }
 0x424   : > { %v1523_v10 = vsub.f32 %v9083_v57, %v9082_v27 }
 0x425   : > { %4521 = vpow2.f32 %v1561_v5  ;;  %v9087_v5 = vld [vmem:[#allocation175_spill] sm:$0xff] }
 0x426   : > { %2599 = vperm.xlu1 %4186, %v8019_v26   ;;  %4523 = vpow2.f32 %v1565_v47  ;;  %v1577_v43 = vmul.f32 1.442695, %v1523_v10 }
 0x427   : > { %v8029_v52 = vpop.eup %4507 }
 0x428   : > { %v4510_v37 = vpop.eup %4509 }
 0x429   : > { %v2173_v49 = vmul.f32 %v4510_v37, %v2141_v11  ;;  %v4512_v48 = vpop.eup %4511  ;;  %v2147_v11 = vld [vmem:[#allocation3 + $0x30] sm:$0xff] }
 0x42a   : > { %2609 = vperm.xlu1 %4186, %v8024_v56   ;;  %v4514_v51 = vpop.eup %4513  ;;  %v2177_v31 = vmul.f32 %v4512_v48, %v2145_v3 }
 0x42b   : > { %v4516_v8 = vpop.eup %4515  ;;  %v2179_v13 = vmul.f32 %v4514_v51, %v2147_v11  ;;  %v2155_v11 = vld [vmem:[#allocation3 + $0x70] sm:$0xff] }
 0x42c   : > { %v4518_v35 = vpop.eup %4517 }
 0x42e   : > { %2619 = vperm.xlu1 %4186, %v8029_v52  }
 0x437   : > { %2464 = vperm.xlu0 %4185, %v4510_v37   ;;  %v2209_v54 = vpop.xlane.xlu0 %2208  ;;  %v9076_v37 = vld [vmem:[#allocation163_spill] sm:$0xff] }
 0x438   : > { %v2365_v19 = vadd.f32 %v2209_v54, %v2173_v49  ;;  %v1519_v61 = vsub.f32 %v9076_v37, %v9075_v46  ;;  %v2158_v49 = vld [vmem:[#allocation3 + $0x88] sm:$0xff]  ;;  %v9079_v54 = vld [vmem:[#allocation168_spill] sm:$0xff]  ;;  %v9089_v37 = vld [vmem:[#allocation181_spill] sm:$0xff] }
 0x439   : > { %v1521_v36 = vsub.f32 %v9080_v18, %v9079_v54  ;;  %v2190_v20 = vmul.f32 %v7979_v44, %v2158_v49 }
 0x43a   : > { %2398 = vst.msk [vmem:[#allocation3] sm:$0xff] %vm9066_vm11, %v2365_v19  ;;  %v2274_v38 = vpop.xlane.xlu1 %2273  ;;  %v1569_v14 = vmul.f32 1.442695, %v1519_v61  ;;  %v2149_v19 = vld [vmem:[#allocation3 + $0x40] sm:$0xff]  ;;  %v9090_v61 = vld [vmem:[#allocation179_spill] sm:$0xff]  ;;  %vm9103_vm11 = vmmov %vm9069_vm0 }
 0x43b   : > { %2484 = vperm.xlu0 %4185, %v4512_v48   ;;  %v2219_v28 = vpop.xlane.xlu0 %2218  ;;  %v2378_v32 = vadd.f32 %v2274_v38, %v2186_v40  ;;  %v1573_v16 = vmul.f32 1.442695, %v1521_v36 }
 0x43c   : > { %v2367_v24 = vadd.f32 %v2219_v28, %v2175_v15  ;;  %v4520_v15 = vpop.eup %4519  ;;  %v2181_v28 = vmul.f32 %v4516_v8, %v2149_v19  ;;  %4525 = vpow2.f32 %v1569_v14 }
 0x43d   : > { %2411 = vst.msk [vmem:[#allocation3 + $0x68] sm:$0xff] %vm9069_vm0, %v2378_v32  ;;  %v2151_v32 = vld [vmem:[#allocation3 + $0x50] sm:$0xff]  ;;  %4527 = vpow2.f32 %v1573_v16 }
 0x43e   : > { %2400 = vst.msk [vmem:[#allocation3 + $0x10] sm:$0xff] %vm9070_vm14, %v2367_v24  ;;  %v4522_v24 = vpop.eup %4521  ;;  %4529 = vpow2.f32 %v1577_v43  ;;  %v9096_v16 = vld [vmem:[#allocation16_spill] sm:$0xff]  ;;  %vm9104_vm14 = vmmov %vm9069_vm0 }
 0x43f   : > { %2494 = vperm.xlu0 %4185, %v4514_v51   ;;  %v2224_v2 = vpop.xlane.xlu0 %2223  ;;  %v2160_v51 = vld [vmem:[#allocation3 + $0x98] sm:$0xff]  ;;  %v2187_v54 = vmul.f32 %v4522_v24, %v2155_v11 }
 0x440   : > { %v2368_v62 = vadd.f32 %v2224_v2, %v2176_v58  ;;  %v2183_v58 = vmul.f32 %v4518_v35, %v2151_v32  ;;  %v9086_v2 = vld [vmem:[#allocation177_spill] sm:$0xff] }
 0x442   : > { %2401 = vst.msk [vmem:[#allocation3 + $0x18] sm:$0xff] %vm9071_vm1, %v2368_v62  ;;  %v2284_v50 = vpop.xlane.xlu1 %2283  ;;  %v1525_v62 = vsub.f32 %v9087_v5, %v9086_v2  ;;  %v9100_v2 = vld [vmem:[#allocation17_spill] sm:$0xff]  ;;  %v9101_v5 = vld [vmem:[#allocation38_spill] sm:$0xff]  ;;  %vm9105_vm1 = vmmov %vm9069_vm0 }
 0x443   : > { %2504 = vperm.xlu0 %4185, %v4516_v8   ;;  %v2380_v17 = vadd.f32 %v2284_v50, %v2188_v55  ;;  %v2229_v29 = vpop.xlane.xlu0 %2228  ;;  %v2153_v8 = vld [vmem:[#allocation3 + $0x60] sm:$0xff]  ;;  %v2192_v55 = vmul.f32 %v7984_v59, %v2160_v51  ;;  %v2194_v59 = vmul.f32 %v7998_v9, %v2162_v0  ;;  %v2168_v51 = vld [vmem:[#allocation3 + $0xd8] sm:$0xff]  ;;  %v2170_v0 = vld [vmem:[#allocation3 + $0xe8] sm:$0xff] }
 0x444   : > { %v2369_v6 = vadd.f32 %v2229_v29, %v2177_v31  ;;  %v4524_v31 = vpop.eup %4523  ;;  %v2185_v47 = vmul.f32 %v4520_v15, %v2153_v8  ;;  %v1581_v46 = vmul.f32 1.442695, %v1525_v62  ;;  %v9102_v62 = vsub.f32 %v9100_v2, %v9101_v5  ;;  %v2437_v2 = vld [vmem:[#allocation4 + $0x38] sm:$0xff] }
 0x445   : > { %2413 = vst.msk [vmem:[#allocation3 + $0x78] sm:$0xff] %vm9077_vm15, %v2380_v17  ;;  %v1527_v17 = vsub.f32 %v9090_v61, %v9089_v37  ;;  %v2163_v37 = vld [vmem:[#allocation3 + $0xb0] sm:$0xff]  ;;  %v2202_v61 = vmul.f32 %v8024_v56, %v2170_v0  ;;  %vm9106_vm15 = vmmov %vm9069_vm0 }
 0x446   : > { %2402 = vst.msk [vmem:[#allocation3 + $0x20] sm:$0xff] %vm9078_vm3, %v2369_v6  ;;  %v4526_v49 = vpop.eup %4525  ;;  %4531 = vpow2.f32 %v1581_v46  ;;  %vm9107_vm3 = vmmov %vm9069_vm0 }
 0x447   : > { %2514 = vperm.xlu0 %4185, %v4518_v35   ;;  %v2239_v63 = vpop.xlane.xlu0 %2238  ;;  %v1585_v18 = vmul.f32 1.442695, %v1527_v17 }
 0x448   : > { %v2294_v48 = vpop.xlane.xlu1 %2293  ;;  %v2371_v40 = vadd.f32 %v2239_v63, %v2179_v13  ;;  %v2164_v13 = vld [vmem:[#allocation3 + $0xb8] sm:$0xff] }
 0x449   : > { %v2382_v38 = vadd.f32 %v2294_v48, %v2190_v20  ;;  %v2157_v20 = vld [vmem:[#allocation3 + $0x80] sm:$0xff]  ;;  %v2196_v63 = vmul.f32 %v8006_v25, %v2164_v13  ;;  %v4528_v48 = vpop.eup %4527  ;;  %4533 = vpow2.f32 %v1585_v18 }
 0x44a   : > { %2404 = vst.msk [vmem:[#allocation3 + $0x30] sm:$0xff] %vm9081_vm6, %v2371_v40  ;;  %v2166_v40 = vld [vmem:[#allocation3 + $0xc8] sm:$0xff]  ;;  %vm9108_vm6 = vmmov %vm9069_vm0 }
 0x44b   : > { %2524 = vperm.xlu0 %4185, %v4520_v15   ;;  %2415 = vst.msk [vmem:[#allocation3 + $0x88] sm:$0xff] %vm9084_vm7, %v2382_v38  ;;  %v2249_v7 = vpop.xlane.xlu0 %2248  ;;  %v2189_v38 = vmul.f32 %v4524_v31, %v2157_v20  ;;  %v2198_v25 = vmul.f32 %v8014_v23, %v2166_v40  ;;  %v2200_v23 = vmul.f32 %v8019_v26, %v2168_v51  ;;  %v2172_v26 = vld [vmem:[#allocation3 + $0xf8] sm:$0xff]  ;;  %v2431_v20 = vld [vmem:[#allocation4 + $0x8] sm:$0xff]  ;;  %vm9109_vm7 = vmmov %vm9069_vm0 }
 0x44c   : > { %v2373_v44 = vadd.f32 %v2249_v7, %v2181_v28  ;;  %v9095_v28 = vld [vmem:[#allocation15_spill] sm:$0xff]  ;;  %v2159_v7 = vld [vmem:[#allocation3 + $0x90] sm:$0xff]  ;;  %v2204_v13 = vmul.f32 %v8029_v52, %v2172_v26 }
 0x44d   : > { %v9097_v27 = vsub.f32 %v9095_v28, %v9096_v16  ;;  %v2191_v43 = vmul.f32 %v4526_v49, %v2159_v7  ;;  %v2433_v7 = vld [vmem:[#allocation4 + $0x18] sm:$0xff] }
 0x44e   : > { %2406 = vst.msk [vmem:[#allocation3 + $0x40] sm:$0xff] %vm9085_vm4, %v2373_v44  ;;  %v4530_v44 = vpop.eup %4529  ;;  %vm9110_vm4 = vmmov %vm9069_vm0 }
 0x44f   : > { %2534 = vperm.xlu0 %4185, %v4522_v24   ;;  %v2259_v3 = vpop.xlane.xlu0 %2258  ;;  %v1589_v57 = vmul.f32 1.442695, %v9097_v27 }
 0x450   : > { %v2375_v50 = vadd.f32 %v2259_v3, %v2183_v58  ;;  %v1593_v3 = vmul.f32 1.442695, %v9102_v62 }
 0x451   : > { %v2304_v45 = vpop.xlane.xlu1 %2303  ;;  %4535 = vpow2.f32 %v1589_v57 }
 0x452   : > { %v2384_v30 = vadd.f32 %v2304_v45, %v2192_v55  ;;  %2408 = vst.msk [vmem:[#allocation3 + $0x50] sm:$0xff] %vm9088_vm10, %v2375_v50  ;;  %v2161_v55 = vld [vmem:[#allocation3 + $0xa0] sm:$0xff]  ;;  %4537 = vpow2.f32 %v1593_v3  ;;  %vm9111_vm10 = vmmov %vm9069_vm0 }
 0x453   : > { %2544 = vperm.xlu0 %4185, %v4524_v31   ;;  %v2269_v29 = vpop.xlane.xlu0 %2268  ;;  %v4532_v31 = vpop.eup %4531 }
 0x454   : > { %2417 = vst.msk [vmem:[#allocation3 + $0x98] sm:$0xff] %vm9091_vm5, %v2384_v30  ;;  %v2377_v35 = vadd.f32 %v2269_v29, %v2185_v47  ;;  %v2193_v47 = vmul.f32 %v4528_v48, %v2161_v55  ;;  %v4534_v29 = vpop.eup %4533  ;;  %vm9112_vm5 = vmmov %vm9069_vm0 }
 0x455   : > { %v2314_v6 = vpop.xlane.xlu1 %2313 }
 0x456   : > { %v2386_v14 = vadd.f32 %v2314_v6, %v2194_v59  ;;  %2410 = vst.msk [vmem:[#allocation3 + $0x60] sm:$0xff] %vm9092_vm9, %v2377_v35  ;;  %v2195_v35 = vmul.f32 %v4530_v44, %v2163_v37  ;;  %v2165_v6 = vld [vmem:[#allocation3 + $0xc0] sm:$0xff] }
 0x457   : > { %2554 = vperm.xlu0 %4185, %v4526_v49   ;;  %v2279_v36 = vpop.xlane.xlu0 %2278 }
 0x458   : > { %2419 = vst.msk [vmem:[#allocation3 + $0xa8] sm:$0xff] %vm9093_vm13, %v2386_v14  ;;  %v2379_v19 = vadd.f32 %v2279_v36, %v2187_v54  ;;  %v2197_v36 = vmul.f32 %v4532_v31, %v2165_v6 }
 0x459   : > { %v2324_v9 = vpop.xlane.xlu1 %2323 }
 0x45a   : > { %v2388_v15 = vadd.f32 %v2324_v9, %v2196_v63  ;;  %2412 = vst.msk [vmem:[#allocation3 + $0x70] sm:$0xff] %vm9094_vm2, %v2379_v19  ;;  %v2167_v19 = vld [vmem:[#allocation3 + $0xd0] sm:$0xff] }
 0x45b   : > { %2564 = vperm.xlu0 %4185, %v4528_v48   ;;  %v2289_v10 = vpop.xlane.xlu0 %2288  ;;  %v8092_v54 = vpop.eup %4535 }
 0x45c   : > { %2421 = vst.msk [vmem:[#allocation3 + $0xb8] sm:$0xff] %vm9098_vm8, %v2388_v15  ;;  %v2381_v32 = vadd.f32 %v2289_v10, %v2189_v38  ;;  %v8097_v9 = vpop.eup %4537  ;;  %v2199_v15 = vmul.f32 %v4534_v29, %v2167_v19  ;;  %v2432_v38 = vld [vmem:[#allocation4 + $0x10] sm:$0xff] }
 0x45d   : > { %v2334_v24 = vpop.xlane.xlu1 %2333 }
 0x45e   : > { %v2390_v58 = vadd.f32 %v2334_v24, %v2198_v25  ;;  %2414 = vst.msk [vmem:[#allocation3 + $0x80] sm:$0xff] %vm9099_vm12, %v2381_v32  ;;  %v2435_v24 = vld [vmem:[#allocation4 + $0x28] sm:$0xff] }
 0x45f   : > { %2574 = vperm.xlu0 %4185, %v4530_v44   ;;  %v2299_v8 = vpop.xlane.xlu0 %2298 }
 0x460   : > { %2423 = vst.msk [vmem:[#allocation3 + $0xc8] sm:$0xff] %vm9103_vm11, %v2390_v58  ;;  %v2383_v50 = vadd.f32 %v2299_v8, %v2191_v43 }
 0x461   : > { %v2344_v45 = vpop.xlane.xlu1 %2343 }
 0x462   : > { %v2392_v30 = vadd.f32 %v2344_v45, %v2200_v23  ;;  %2416 = vst.msk [vmem:[#allocation3 + $0x90] sm:$0xff] %vm9069_vm0, %v2383_v50  ;;  %v2439_v45 = vld [vmem:[#allocation4 + $0x48] sm:$0xff] }
 0x463   : > { %2584 = vperm.xlu0 %4185, %v4532_v31   ;;  %v2309_v46 = vpop.xlane.xlu0 %2308 }
 0x464   : > { %2425 = vst.msk [vmem:[#allocation3 + $0xd8] sm:$0xff] %vm9104_vm14, %v2392_v30  ;;  %v2385_v17 = vadd.f32 %v2309_v46, %v2193_v47 }
 0x465   : > { %v2354_v11 = vpop.xlane.xlu1 %2353 }
 0x466   : > { %v2394_v59 = vadd.f32 %v2354_v11, %v2202_v61  ;;  %2418 = vst.msk [vmem:[#allocation3 + $0xa0] sm:$0xff] %vm9105_vm1, %v2385_v17  ;;  %v2441_v11 = vld [vmem:[#allocation4 + $0x58] sm:$0xff] }
 0x467   : > { %2594 = vperm.xlu0 %4185, %v4534_v29   ;;  %v2319_v49 = vpop.xlane.xlu0 %2318 }
 0x468   : > { %2427 = vst.msk [vmem:[#allocation3 + $0xe8] sm:$0xff] %vm9106_vm15, %v2394_v59  ;;  %v2387_v14 = vadd.f32 %v2319_v49, %v2195_v35 }
 0x469   : > { %v2364_v18 = vpop.xlane.xlu1 %2363 }
 0x46a   : > { %v2396_v56 = vadd.f32 %v2364_v18, %v2204_v13  ;;  %2420 = vst.msk [vmem:[#allocation3 + $0xb0] sm:$0xff] %vm9107_vm3, %v2387_v14 }
 0x46b   : > { %2604 = vperm.xlu0 %4185, %v8092_v54   ;;  %v2329_v63 = vpop.xlane.xlu0 %2328 }
 0x46c   : > { %2429 = vst.msk [vmem:[#allocation3 + $0xf8] sm:$0xff] %vm9108_vm6, %v2396_v56  ;;  %v2389_v48 = vadd.f32 %v2329_v63, %v2197_v36  ;;  %v2443_v36 = vld [vmem:[#allocation4 + $0x68] sm:$0xff] }
 0x46d   : > { %v2470_v40 = vpop.permute.xlu1 %2469 }
 0x46e   : > { %v2623_v52 = vmul.f32 %v2470_v40, %v2431_v20  ;;  %2422 = vst.msk [vmem:[#allocation3 + $0xc0] sm:$0xff] %vm9109_vm7, %v2389_v48 }
 0x46f   : > { %2614 = vperm.xlu0 %4185, %v8097_v9   ;;  %v2339_v28 = vpop.xlane.xlu0 %2338 }
 0x470   : > { %v3233_v16 = vadd.f32 %v7904_v1, %v2623_v52  ;;  %v2391_v27 = vadd.f32 %v2339_v28, %v2199_v15 }
 0x471   : > { %v2475_v57 = vpop.permute.xlu1 %2474 }
 0x472   : > { %3265 = vst [vmem:[#allocation4 + $0x8] sm:$0xff] %v3233_v16  ;;  %v2624_v10 = vmul.f32 %v2475_v57, %v2432_v38  ;;  %2424 = vst.msk [vmem:[#allocation3 + $0xd0] sm:$0xff] %vm9110_vm4, %v2391_v27  ;;  %v2445_v16 = vld [vmem:[#allocation4 + $0x78] sm:$0xff] }
 0x474   : > { %v3234_v25 = vadd.f32 %v7916_v33, %v2624_v10 }
 0x475   : > { %v2480_v32 = vpop.permute.xlu1 %2479 }
 0x476   : > { %3266 = vst [vmem:[#allocation4 + $0x10] sm:$0xff] %v3234_v25  ;;  %v2625_v44 = vmul.f32 %v2480_v32, %v2433_v7 }
 0x478   : > { %v3235_v51 = vadd.f32 %v7918_v39, %v2625_v44 }
 0x479   : > { %v2490_v58 = vpop.permute.xlu1 %2489 }
 0x47a   : > { %3267 = vst [vmem:[#allocation4 + $0x18] sm:$0xff] %v3235_v51  ;;  %v2627_v43 = vmul.f32 %v2490_v58, %v2435_v24 }
 0x47b   : > { %v3929_v1 = vpop.f32.mrb[24].mxu0 }
 0x47c   : > { %v3237_v5 = vadd.f32 %v7932_v21, %v2627_v43  ;;  %v3930_v62 = vpop.f32.mrb[25].mxu0 }
 0x47d   : > { %v2500_v3 = vpop.permute.xlu1 %2499  ;;  %v4041_v8 = vpop.f32.mrb[24].mxu1  ;;  %v3931_v55 = vadd.f32 %v3930_v62, %v3929_v1  ;;  %v2447_v1 = vld [vmem:[#allocation4 + $0x88] sm:$0xff] }
 0x47e   : > { %3269 = vst [vmem:[#allocation4 + $0x28] sm:$0xff] %v3237_v5  ;;  %v2629_v23 = vmul.f32 %v2500_v3, %v2437_v2  ;;  %v4042_v33 = vpop.f32.mrb[25].mxu1  ;;  %v3932_v50 = vpop.f32.mrb[26].mxu0 }
 0x47f   : > { %v4043_v31 = vadd.f32 %v4042_v33, %v4041_v8  ;;  %v4044_v0 = vpop.f32.mrb[26].mxu1  ;;  %v3933_v30 = vpop.f32.mrb[27].mxu0 }
 0x480   : > { %v3239_v39 = vadd.f32 %v7945_v41, %v2629_v23  ;;  %v3934_v47 = vadd.f32 %v3933_v30, %v3932_v50  ;;  %v4045_v46 = vpop.f32.mrb[27].mxu1 }
 0x481   : > { %v8107_v37 = vadd.f32 %v4043_v31, %v3931_v55  ;;  %v2510_v61 = vpop.permute.xlu1 %2509  ;;  %v4046_v21 = vadd.f32 %v4045_v46, %v4044_v0 }
 0x482   : > { %3271 = vst [vmem:[#allocation4 + $0x38] sm:$0xff] %v3239_v39  ;;  %v2631_v17 = vmul.f32 %v2510_v61, %v2439_v45 }
 0x483   : > { %v3157_v29 = vadd.f32 %v4046_v21, %v3934_v47  ;;  %v3935_v26 = vpop.f32.mrb[28].mxu0 }
 0x484   : > { %v3241_v59 = vadd.f32 %v7955_v12, %v2631_v17  ;;  %v3936_v35 = vpop.f32.mrb[29].mxu0 }
 0x485   : > { %v2520_v49 = vpop.permute.xlu1 %2519  ;;  %v3937_v13 = vadd.f32 %v3936_v35, %v3935_v26  ;;  %v3938_v18 = vpop.f32.mrb[30].mxu0 }
 0x486   : > { %v4047_v6 = vpop.f32.mrb[28].mxu1  ;;  %3273 = vst [vmem:[#allocation4 + $0x48] sm:$0xff] %v3241_v59  ;;  %v2633_v14 = vmul.f32 %v2520_v49, %v2441_v11  ;;  %v3939_v63 = vpop.f32.mrb[31].mxu0 }
 0x487   : > { %v4048_v41 = vpop.f32.mrb[29].mxu1  ;;  %v3940_v48 = vadd.f32 %v3939_v63, %v3938_v18 }
 0x488   : > { %v4049_v56 = vadd.f32 %v4048_v41, %v4047_v6  ;;  %v4050_v20 = vpop.f32.mrb[30].mxu1  ;;  %v3243_v19 = vadd.f32 %v7970_v53, %v2633_v14 }
 0x489   : > { %v4051_v40 = vpop.f32.mrb[31].mxu1  ;;  %v2530_v15 = vpop.permute.xlu1 %2529 }
 0x48a   : > { %v8111_v52 = vadd.f32 %v4049_v56, %v3937_v13  ;;  %v4052_v12 = vadd.f32 %v4051_v40, %v4050_v20  ;;  %3275 = vst [vmem:[#allocation4 + $0x58] sm:$0xff] %v3243_v19  ;;  %v2635_v38 = vmul.f32 %v2530_v15, %v2443_v36  ;;  %v2451_v15 = vld [vmem:[#allocation4 + $0xa8] sm:$0xff] }
 0x48b   : > { %v3941_v27 = vpop.f32.mrb[32].mxu0 }
 0x48c   : > { %v3165_v28 = vadd.f32 %v4052_v12, %v3940_v48  ;;  %v3245_v57 = vadd.f32 %v3157_v29, %v2635_v38  ;;  %v3942_v10 = vpop.f32.mrb[33].mxu0  ;;  %v2449_v29 = vld [vmem:[#allocation4 + $0x98] sm:$0xff] }
 0x48d   : > { %v2540_v7 = vpop.permute.xlu1 %2539  ;;  %v3943_v32 = vadd.f32 %v3942_v10, %v3941_v27  ;;  %v3944_v53 = vpop.f32.mrb[34].mxu0 }
 0x48e   : > { %v4053_v25 = vpop.f32.mrb[32].mxu1  ;;  %3277 = vst [vmem:[#allocation4 + $0x68] sm:$0xff] %v3245_v57  ;;  %v2637_v44 = vmul.f32 %v2540_v7, %v2445_v16  ;;  %v3945_v43 = vpop.f32.mrb[35].mxu0 }
 0x48f   : > { %v4054_v24 = vpop.f32.mrb[33].mxu1  ;;  %v3946_v5 = vadd.f32 %v3945_v43, %v3944_v53 }
 0x490   : > { %v4055_v51 = vadd.f32 %v4054_v24, %v4053_v25  ;;  %v4056_v58 = vpop.f32.mrb[34].mxu1  ;;  %v3247_v2 = vadd.f32 %v3165_v28, %v2637_v44  ;;  %v2169_v25 = vld [vmem:[#allocation3 + $0xe0] sm:$0xff] }
 0x491   : > { %v4057_v62 = vpop.f32.mrb[35].mxu1  ;;  %v2550_v8 = vpop.permute.xlu1 %2549 }
 0x492   : > { %v8113_v3 = vadd.f32 %v4055_v51, %v3943_v32  ;;  %v4058_v55 = vadd.f32 %v4057_v62, %v4056_v58  ;;  %3279 = vst [vmem:[#allocation4 + $0x78] sm:$0xff] %v3247_v2  ;;  %v2639_v23 = vmul.f32 %v2550_v8, %v2447_v1  ;;  %v2453_v62 = vld [vmem:[#allocation4 + $0xb8] sm:$0xff] }
 0x493   : > { %v3947_v50 = vpop.f32.mrb[36].mxu0 }
 0x494   : > { %v3173_v33 = vadd.f32 %v4058_v55, %v3946_v5  ;;  %v3948_v31 = vpop.f32.mrb[37].mxu0  ;;  %v2201_v5 = vmul.f32 %v8092_v54, %v2169_v25 }
 0x495   : > { %v2560_v0 = vpop.permute.xlu1 %2559  ;;  %v3949_v39 = vadd.f32 %v3948_v31, %v3947_v50  ;;  %v3950_v46 = vpop.f32.mrb[38].mxu0 }
 0x496   : > { %v3249_v45 = vadd.f32 %v3173_v33, %v2639_v23  ;;  %v4059_v30 = vpop.f32.mrb[36].mxu1  ;;  %v3951_v17 = vpop.f32.mrb[39].mxu0  ;;  %v2641_v49 = vmul.f32 %v2560_v0, %v2449_v29 }
 0x497   : > { %v4060_v47 = vpop.f32.mrb[37].mxu1  ;;  %v3952_v11 = vadd.f32 %v3951_v17, %v3950_v46 }
 0x498   : > { %3281 = vst [vmem:[#allocation4 + $0x88] sm:$0xff] %v3249_v45  ;;  %v4061_v61 = vadd.f32 %v4060_v47, %v4059_v30  ;;  %v4062_v21 = vpop.f32.mrb[38].mxu1  ;;  %v2171_v47 = vld [vmem:[#allocation3 + $0xf0] sm:$0xff] }
 0x499   : > { %v4063_v26 = vpop.f32.mrb[39].mxu1  ;;  %v2570_v41 = vpop.permute.xlu1 %2569 }
 0x49a   : > { %v8115_v59 = vadd.f32 %v4061_v61, %v3949_v39  ;;  %v4064_v35 = vadd.f32 %v4063_v26, %v4062_v21  ;;  %v2643_v27 = vmul.f32 %v2570_v41, %v2451_v15 }
 0x49b   : > { %v3953_v13 = vpop.f32.mrb[40].mxu0 }
 0x49c   : > { %v3181_v6 = vadd.f32 %v4064_v35, %v3952_v11  ;;  %v3954_v14 = vpop.f32.mrb[41].mxu0 }
 0x49d   : > { %v3955_v36 = vadd.f32 %v3954_v14, %v3953_v13  ;;  %v3956_v63 = vpop.f32.mrb[42].mxu0  ;;  %v2580_v32 = vpop.permute.xlu1 %2579 }
 0x49e   : > { %v3251_v18 = vadd.f32 %v3181_v6, %v2641_v49  ;;  %v4065_v56 = vpop.f32.mrb[40].mxu1  ;;  %v3957_v40 = vpop.f32.mrb[43].mxu0  ;;  %v2645_v45 = vmul.f32 %v2580_v32, %v2453_v62  ;;  %v2203_v49 = vmul.f32 %v8097_v9, %v2171_v47  ;;  %v2455_v6 = vld [vmem:[#allocation4 + $0xc8] sm:$0xff]  ;;  %v2457_v32 = vld [vmem:[#allocation4 + $0xd8] sm:$0xff] }
 0x49f   : > { %v4066_v20 = vpop.f32.mrb[41].mxu1  ;;  %v3958_v12 = vadd.f32 %v3957_v40, %v3956_v63 }
 0x4a0   : > { %3283 = vst [vmem:[#allocation4 + $0x98] sm:$0xff] %v3251_v18  ;;  %v4067_v19 = vadd.f32 %v4066_v20, %v4065_v56  ;;  %v4068_v48 = vpop.f32.mrb[42].mxu1 }
 0x4a1   : > { %v4069_v38 = vpop.f32.mrb[43].mxu1  ;;  %v2590_v46 = vpop.permute.xlu1 %2589 }
 0x4a2   : > { %v8117_v28 = vadd.f32 %v4067_v19, %v3955_v36  ;;  %v4070_v16 = vadd.f32 %v4069_v38, %v4068_v48  ;;  %v2647_v20 = vmul.f32 %v2590_v46, %v2455_v6 }
 0x4a3   : > { %v3959_v10 = vpop.f32.mrb[44].mxu0 }
 0x4a4   : > { %v3189_v57 = vadd.f32 %v4070_v16, %v3958_v12  ;;  %v3960_v7 = vpop.f32.mrb[45].mxu0  ;;  %v2430_v16 = vld [vmem:[#allocation4] sm:$0xff] }
 0x4a5   : > { %v3961_v53 = vadd.f32 %v3960_v7, %v3959_v10  ;;  %v3962_v58 = vpop.f32.mrb[46].mxu0  ;;  %v2349_v23 = vpop.xlane.xlu0 %2348 }
 0x4a6   : > { %v3253_v44 = vadd.f32 %v3189_v57, %v2643_v27  ;;  %v4071_v24 = vpop.f32.mrb[44].mxu1  ;;  %v3963_v1 = vpop.f32.mrb[47].mxu0  ;;  %v2393_v31 = vadd.f32 %v2349_v23, %v2201_v5  ;;  %v2436_v23 = vld [vmem:[#allocation4 + $0x30] sm:$0xff] }
 0x4a7   : > { %v4072_v51 = vpop.f32.mrb[45].mxu1  ;;  %v3964_v8 = vadd.f32 %v3963_v1, %v3962_v58 }
 0x4a8   : > { %3285 = vst [vmem:[#allocation4 + $0xa8] sm:$0xff] %v3253_v44  ;;  %v4073_v43 = vadd.f32 %v4072_v51, %v4071_v24  ;;  %v4074_v2 = vpop.f32.mrb[46].mxu1  ;;  %2426 = vst.msk [vmem:[#allocation3 + $0xe0] sm:$0xff] %vm9111_vm10, %v2393_v31  ;;  %v2600_v44 = vpop.permute.xlu1 %2599 }
 0x4a9   : > { %v4075_v55 = vpop.f32.mrb[47].mxu1  ;;  %v2649_v1 = vmul.f32 %v2600_v44, %v2457_v32  ;;  %v2458_v44 = vld [vmem:[#allocation4 + $0xe0] sm:$0xff] }
 0x4aa   : > { %v8120_v33 = vadd.f32 %v4073_v43, %v3961_v53  ;;  %v4076_v50 = vadd.f32 %v4075_v55, %v4074_v2  ;;  %v2434_v43 = vld [vmem:[#allocation4 + $0x20] sm:$0xff] }
 0x4ab   : > { %v3965_v30 = vpop.f32.mrb[48].mxu0 }
 0x4ac   : > { %v3197_v0 = vadd.f32 %v4076_v50, %v3964_v8  ;;  %v3966_v39 = vpop.f32.mrb[49].mxu0 }
 0x4ad   : > { %v3967_v17 = vadd.f32 %v3966_v39, %v3965_v30  ;;  %v3968_v29 = vpop.f32.mrb[50].mxu0 }
 0x4ae   : > { %v3255_v61 = vadd.f32 %v3197_v0, %v2645_v45  ;;  %v4077_v21 = vpop.f32.mrb[48].mxu1  ;;  %v3969_v35 = vpop.f32.mrb[51].mxu0  ;;  %v2438_v0 = vld [vmem:[#allocation4 + $0x40] sm:$0xff] }
 0x4af   : > { %v4078_v54 = vpop.f32.mrb[49].mxu1  ;;  %v3970_v13 = vadd.f32 %v3969_v35, %v3968_v29  ;;  %v2359_v41 = vpop.xlane.xlu0 %2358 }
 0x4b0   : > { %3287 = vst [vmem:[#allocation4 + $0xb8] sm:$0xff] %v3255_v61  ;;  %v4079_v11 = vadd.f32 %v4078_v54, %v4077_v21  ;;  %v4080_v26 = vpop.f32.mrb[50].mxu1  ;;  %v2395_v36 = vadd.f32 %v2359_v41, %v2203_v49  ;;  %v2446_v49 = vld [vmem:[#allocation4 + $0x80] sm:$0xff] }
 0x4b1   : > { %v4081_v14 = vpop.f32.mrb[51].mxu1 }
 0x4b2   : > { %v8124_v18 = vadd.f32 %v4079_v11, %v3967_v17  ;;  %v4082_v56 = vadd.f32 %v4081_v14, %v4080_v26  ;;  %2428 = vst.msk [vmem:[#allocation3 + $0xf0] sm:$0xff] %vm9112_vm5, %v2395_v36  ;;  %v2442_v17 = vld [vmem:[#allocation4 + $0x60] sm:$0xff]  ;;  %v2444_v11 = vld [vmem:[#allocation4 + $0x70] sm:$0xff] }
 0x4b3   : > { %v3971_v19 = vpop.f32.mrb[52].mxu0  ;;  %v2448_v14 = vld [vmem:[#allocation4 + $0x90] sm:$0xff]  ;;  %v2450_v36 = vld [vmem:[#allocation4 + $0xa0] sm:$0xff] }
 0x4b4   : > { %v3205_v63 = vadd.f32 %v4082_v56, %v3970_v13  ;;  %v3972_v48 = vpop.f32.mrb[53].mxu0 }
 0x4b5   : > { %v3973_v12 = vadd.f32 %v3972_v48, %v3971_v19  ;;  %v3974_v38 = vpop.f32.mrb[54].mxu0  ;;  %v2452_v19 = vld [vmem:[#allocation4 + $0xb0] sm:$0xff] }
 0x4b6   : > { %v3257_v40 = vadd.f32 %v3205_v63, %v2647_v20  ;;  %v4083_v15 = vpop.f32.mrb[52].mxu1  ;;  %v3975_v27 = vpop.f32.mrb[55].mxu0 }
 0x4b7   : > { %v4084_v9 = vpop.f32.mrb[53].mxu1  ;;  %v3976_v7 = vadd.f32 %v3975_v27, %v3974_v38  ;;  %v2465_v25 = vpop.permute.xlu0 %2464 }
 0x4b8   : > { %3289 = vst [vmem:[#allocation4 + $0xc8] sm:$0xff] %v3257_v40  ;;  %v4085_v57 = vadd.f32 %v4084_v9, %v4083_v15  ;;  %v4086_v10 = vpop.f32.mrb[54].mxu1  ;;  %v2622_v53 = vmul.f32 %v2465_v25, %v2430_v16  ;;  %v2454_v15 = vld [vmem:[#allocation4 + $0xc0] sm:$0xff]  ;;  %v2456_v16 = vld [vmem:[#allocation4 + $0xd0] sm:$0xff] }
 0x4b9   : > { %v4087_v24 = vpop.f32.mrb[55].mxu1 }
 0x4ba   : > { %v8127_v51 = vadd.f32 %v4085_v57, %v3973_v12  ;;  %v4088_v58 = vadd.f32 %v4087_v24, %v4086_v10  ;;  %v3232_v2 = vadd.f32 %v7901_v60, %v2622_v53  ;;  %v2440_v60 = vld [vmem:[#allocation4 + $0x50] sm:$0xff] }
 0x4bb   : > { %v2485_v62 = vpop.permute.xlu0 %2484 }
 0x4bc   : > { %v3213_v5 = vadd.f32 %v4088_v58, %v3976_v7  ;;  %3264 = vst [vmem:[#allocation4] sm:$0xff] %v3232_v2  ;;  %v2626_v8 = vmul.f32 %v2485_v62, %v2434_v43  ;;  %v2459_v2 = vld [vmem:[#allocation4 + $0xe8] sm:$0xff] }
 0x4be   : > { %v3259_v55 = vadd.f32 %v3213_v5, %v2649_v1  ;;  %v3236_v50 = vadd.f32 %v7927_v22, %v2626_v8  ;;  %v2610_v1 = vpop.permute.xlu1 %2609 }
 0x4bf   : > { %v2495_v31 = vpop.permute.xlu0 %2494 }
 0x4c0   : > { %3291 = vst [vmem:[#allocation4 + $0xd8] sm:$0xff] %v3259_v55  ;;  %3268 = vst [vmem:[#allocation4 + $0x20] sm:$0xff] %v3236_v50  ;;  %v2628_v45 = vmul.f32 %v2495_v31, %v2436_v23  ;;  %v2651_v23 = vmul.f32 %v2610_v1, %v2459_v2 }
 0x4c2   : > { %v3238_v30 = vadd.f32 %v7940_v34, %v2628_v45 }
 0x4c3   : > { %v2505_v39 = vpop.permute.xlu0 %2504 }
 0x4c4   : > { %3270 = vst [vmem:[#allocation4 + $0x30] sm:$0xff] %v3238_v30  ;;  %v2630_v47 = vmul.f32 %v2505_v39, %v2438_v0 }
 0x4c6   : > { %v3240_v46 = vadd.f32 %v7952_v42, %v2630_v47 }
 0x4c7   : > { %v2515_v61 = vpop.permute.xlu0 %2514 }
 0x4c8   : > { %3272 = vst [vmem:[#allocation4 + $0x40] sm:$0xff] %v3240_v46  ;;  %v2632_v21 = vmul.f32 %v2515_v61, %v2440_v60  ;;  %v2460_v46 = vld [vmem:[#allocation4 + $0xf0] sm:$0xff] }
 0x4ca   : > { %v3242_v54 = vadd.f32 %v7962_v4, %v2632_v21 }
 0x4cb   : > { %v2525_v22 = vpop.permute.xlu0 %2524 }
 0x4cc   : > { %3274 = vst [vmem:[#allocation4 + $0x50] sm:$0xff] %v3242_v54  ;;  %v2634_v29 = vmul.f32 %v2525_v22, %v2442_v17 }
 0x4ce   : > { %v3244_v26 = vadd.f32 %v8107_v37, %v2634_v29  ;;  %v2461_v29 = vld [vmem:[#allocation4 + $0xf8] sm:$0xff] }
 0x4cf   : > { %v2535_v35 = vpop.permute.xlu0 %2534 }
 0x4d0   : > { %3276 = vst [vmem:[#allocation4 + $0x60] sm:$0xff] %v3244_v26  ;;  %v2636_v34 = vmul.f32 %v2535_v35, %v2444_v11  ;;  %v2620_v11 = vpop.permute.xlu1 %2619 }
 0x4d2   : > { %v3246_v6 = vadd.f32 %v8111_v52, %v2636_v34 }
 0x4d3   : > { %v2545_v13 = vpop.permute.xlu0 %2544 }
 0x4d4   : > { %3278 = vst [vmem:[#allocation4 + $0x70] sm:$0xff] %v3246_v6  ;;  %v2638_v42 = vmul.f32 %v2545_v13, %v2446_v49  ;;  %v2653_v6 = vmul.f32 %v2620_v11, %v2461_v29 }
 0x4d6   : > { %v3248_v41 = vadd.f32 %v8113_v3, %v2638_v42 }
 0x4d7   : > { %v2555_v56 = vpop.permute.xlu0 %2554 }
 0x4d8   : > { %3280 = vst [vmem:[#allocation4 + $0x80] sm:$0xff] %v3248_v41  ;;  %v2640_v4 = vmul.f32 %v2555_v56, %v2448_v14 }
 0x4da   : > { %v3250_v20 = vadd.f32 %v8115_v59, %v2640_v4 }
 0x4db   : > { %v2565_v63 = vpop.permute.xlu0 %2564 }
 0x4dc   : > { %3282 = vst [vmem:[#allocation4 + $0x90] sm:$0xff] %v3250_v20  ;;  %v2642_v37 = vmul.f32 %v2565_v63, %v2450_v36 }
 0x4de   : > { %v3252_v48 = vadd.f32 %v8117_v28, %v2642_v37 }
 0x4df   : > { %v2575_v40 = vpop.permute.xlu0 %2574 }
 0x4e0   : > { %3284 = vst [vmem:[#allocation4 + $0xa0] sm:$0xff] %v3252_v48  ;;  %v2644_v52 = vmul.f32 %v2575_v40, %v2452_v19 }
 0x4e2   : > { %v3254_v12 = vadd.f32 %v8120_v33, %v2644_v52 }
 0x4e3   : > { %v2585_v38 = vpop.permute.xlu0 %2584 }
 0x4e4   : > { %3286 = vst [vmem:[#allocation4 + $0xb0] sm:$0xff] %v3254_v12  ;;  %v2646_v3 = vmul.f32 %v2585_v38, %v2454_v15 }
 0x4e6   : > { %v3256_v9 = vadd.f32 %v8124_v18, %v2646_v3 }
 0x4e7   : > { %v2595_v27 = vpop.permute.xlu0 %2594 }
 0x4e8   : > { %3288 = vst [vmem:[#allocation4 + $0xc0] sm:$0xff] %v3256_v9  ;;  %v2648_v59 = vmul.f32 %v2595_v27, %v2456_v16  ;;  %v3977_v57 = vpop.f32.mrb[56].mxu0 }
 0x4e9   : > { %v3978_v10 = vpop.f32.mrb[57].mxu0 }
 0x4ea   : > { %v3258_v7 = vadd.f32 %v8127_v51, %v2648_v59  ;;  %v4089_v28 = vpop.f32.mrb[56].mxu1  ;;  %v3979_v25 = vadd.f32 %v3978_v10, %v3977_v57  ;;  %v3980_v32 = vpop.f32.mrb[58].mxu0 }
 0x4eb   : > { %v2605_v24 = vpop.permute.xlu0 %2604  ;;  %v4090_v53 = vpop.f32.mrb[57].mxu1 }
 0x4ec   : > { %3290 = vst [vmem:[#allocation4 + $0xd0] sm:$0xff] %v3258_v7  ;;  %v4091_v33 = vadd.f32 %v4090_v53, %v4089_v28  ;;  %v4092_v58 = vpop.f32.mrb[58].mxu1  ;;  %v3981_v43 = vpop.f32.mrb[59].mxu0  ;;  %v2650_v62 = vmul.f32 %v2605_v24, %v2458_v44 }
 0x4ed   : > { %v3982_v18 = vadd.f32 %v3981_v43, %v3980_v32  ;;  %v4093_v5 = vpop.f32.mrb[59].mxu1 }
 0x4ee   : > { %v3218_v8 = vadd.f32 %v4091_v33, %v3979_v25  ;;  %v4094_v55 = vadd.f32 %v4093_v5, %v4092_v58 }
 0x4ef   : > { %v2615_v45 = vpop.permute.xlu0 %2614 }
 0x4f0   : > { %v3260_v50 = vadd.f32 %v3218_v8, %v2650_v62  ;;  %v3221_v51 = vadd.f32 %v4094_v55, %v3982_v18  ;;  %v2652_v35 = vmul.f32 %v2615_v45, %v2460_v46 }
 0x4f1   : > { %v3983_v31 = vpop.f32.mrb[60].mxu0 }
 0x4f2   : > { %v3984_v0 = vpop.f32.mrb[61].mxu0  ;;  %3292 = vst [vmem:[#allocation4 + $0xe0] sm:$0xff] %v3260_v50  ;;  %v3261_v30 = vadd.f32 %v3221_v51, %v2651_v23 }
 0x4f3   : > { %v4095_v39 = vpop.f32.mrb[60].mxu1  ;;  %v3985_v47 = vadd.f32 %v3984_v0, %v3983_v31  ;;  %v3986_v60 = vpop.f32.mrb[62].mxu0 }
 0x4f4   : > { %v4096_v61 = vpop.f32.mrb[61].mxu1  ;;  %v3987_v21 = vpop.f32.mrb[63].mxu0  ;;  %3293 = vst [vmem:[#allocation4 + $0xe8] sm:$0xff] %v3261_v30 }
 0x4f5   : > { %v4097_v17 = vadd.f32 %v4096_v61, %v4095_v39  ;;  %v4098_v54 = vpop.f32.mrb[62].mxu1  ;;  %v3988_v22 = vadd.f32 %v3987_v21, %v3986_v60 }
 0x4f6   : > { %v4099_v26 = vpop.f32.mrb[63].mxu1 }
 0x4f7   : > { %v3226_v34 = vadd.f32 %v4097_v17, %v3985_v47  ;;  %v4100_v49 = vadd.f32 %v4099_v26, %v4098_v54 }
 0x4f9   : > { %v3262_v13 = vadd.f32 %v3226_v34, %v2652_v35  ;;  %v3229_v42 = vadd.f32 %v4100_v49, %v3988_v22 }
 0x4fb   : > { %3294 = vst [vmem:[#allocation4 + $0xf0] sm:$0xff] %v3262_v13  ;;  %v3263_v14 = vadd.f32 %v3229_v42, %v2653_v6 }
 0x4fd   : > { %3295 = vst [vmem:[#allocation4 + $0xf8] sm:$0xff] %v3263_v14 }
 0x4fe PF: > { %p3870_p2 = scmp.ne.s32.totalorder %s4709_s29, 1 }
 0x4ff   : > { %v3334_v41 = vld [vmem:[#allocation3 + $0x10] sm:$0xff] (!%p3870_p2)  ;;  %v3332_v56 = vld [vmem:[#allocation3] sm:$0xff] (!%p3870_p2)  ;;  %v3335_v4 = vld [vmem:[#allocation3 + $0x18] sm:$0xff] (!%p3870_p2)  ;;  %v4733_v36 = vmov (!%p3870_p2), 0  }
 0x500   : > { %3331 = sbr.rel (%p3870_p2) target bundleno = 1485 (0x5cd), region = 44  ;;  %4540 = vset.pattern.permute.xlu1 (!%p3870_p2), %v4733_v36  ;;  %4539 = vset.pattern.permute.xlu0 (!%p3870_p2), %v4733_v36  ;;  %vm3366_vm9 = vcmp.gt.f32.partialorder (!%p3870_p2), %v3334_v41, 0.0  ;;  %vm3364_vm13 = vcmp.gt.f32.partialorder (!%p3870_p2), %v3332_v56, 0.0  ;;  %vm3367_vm2 = vcmp.gt.f32.partialorder (!%p3870_p2), %v3335_v4, 0.0  ;;  %v3333_v20 = vld [vmem:[#allocation3 + $0x8] sm:$0xff] (!%p3870_p2)  ;;  %v3336_v48 = vld [vmem:[#allocation3 + $0x20] sm:$0xff] (!%p3870_p2) }
 0x501   : > { %v3398_v63 = vsel (!%p3870_p2), %vm3366_vm9, %v3334_v41, 1.0  ;;  %v3396_v37 = vsel (!%p3870_p2), %vm3364_vm13, %v3332_v56, 1.0  ;;  %vm3365_vm8 = vcmp.gt.f32.partialorder (!%p3870_p2), %v3333_v20, 0.0  ;;  %v3337_v19 = vld [vmem:[#allocation3 + $0x28] sm:$0xff] (!%p3870_p2)  ;;  %v3399_v40 = vsel (!%p3870_p2), %vm3367_vm2, %v3335_v4, 1.0  ;;  %v3339_v15 = vld [vmem:[#allocation3 + $0x38] sm:$0xff] (!%p3870_p2) }
 0x502   : > { %3472 = vperm.xlu1 (!%p3870_p2), %4540, %v3398_v63   ;;  %3462 = vperm.xlu0 (!%p3870_p2), %4539, %v3396_v37   ;;  %v3397_v52 = vsel (!%p3870_p2), %vm3365_vm8, %v3333_v20, 1.0  ;;  %vm3369_vm12 = vcmp.gt.f32.partialorder (!%p3870_p2), %v3337_v19, 0.0  ;;  %vm3368_vm11 = vcmp.gt.f32.partialorder (!%p3870_p2), %v3336_v48, 0.0  ;;  %v3338_v12 = vld [vmem:[#allocation3 + $0x30] sm:$0xff] (!%p3870_p2)  ;;  %vm3371_vm0 = vcmp.gt.f32.partialorder (!%p3870_p2), %v3339_v15, 0.0  ;;  %v3341_v16 = vld [vmem:[#allocation3 + $0x48] sm:$0xff] (!%p3870_p2) }
 0x503   : > { %v3401_v38 = vsel (!%p3870_p2), %vm3369_vm12, %v3337_v19, 1.0  ;;  %v3400_v3 = vsel (!%p3870_p2), %vm3368_vm11, %v3336_v48, 1.0  ;;  %vm3370_vm14 = vcmp.gt.f32.partialorder (!%p3870_p2), %v3338_v12, 0.0  ;;  %v3340_v9 = vld [vmem:[#allocation3 + $0x40] sm:$0xff] (!%p3870_p2)  ;;  %v3403_v27 = vsel (!%p3870_p2), %vm3371_vm0, %v3339_v15, 1.0  ;;  %v3343_v57 = vld [vmem:[#allocation3 + $0x58] sm:$0xff] (!%p3870_p2) }
 0x504   : > { %v3402_v59 = vsel (!%p3870_p2), %vm3370_vm14, %v3338_v12, 1.0  ;;  %vm3373_vm1 = vcmp.gt.f32.partialorder (!%p3870_p2), %v3341_v16, 0.0  ;;  %vm3372_vm15 = vcmp.gt.f32.partialorder (!%p3870_p2), %v3340_v9, 0.0  ;;  %v3342_v10 = vld [vmem:[#allocation3 + $0x50] sm:$0xff] (!%p3870_p2)  ;;  %vm3375_vm3 = vcmp.gt.f32.partialorder (!%p3870_p2), %v3343_v57, 0.0  ;;  %v3345_v25 = vld [vmem:[#allocation3 + $0x68] sm:$0xff] (!%p3870_p2) }
 0x505   : > { %v3405_v7 = vsel (!%p3870_p2), %vm3373_vm1, %v3341_v16, 1.0  ;;  %v3404_v28 = vsel (!%p3870_p2), %vm3372_vm15, %v3340_v9, 1.0  ;;  %vm3374_vm6 = vcmp.gt.f32.partialorder (!%p3870_p2), %v3342_v10, 0.0  ;;  %v3344_v32 = vld [vmem:[#allocation3 + $0x60] sm:$0xff] (!%p3870_p2)  ;;  %v3407_v44 = vsel (!%p3870_p2), %vm3375_vm3, %v3343_v57, 1.0  ;;  %v3347_v53 = vld [vmem:[#allocation3 + $0x78] sm:$0xff] (!%p3870_p2) }
 0x506   : > { %3477 = vperm.xlu1 (!%p3870_p2), %4540, %v3399_v40   ;;  %3467 = vperm.xlu0 (!%p3870_p2), %4539, %v3397_v52   ;;  %v3406_v24 = vsel (!%p3870_p2), %vm3374_vm6, %v3342_v10, 1.0  ;;  %vm3377_vm7 = vcmp.gt.f32.partialorder (!%p3870_p2), %v3345_v25, 0.0  ;;  %vm3376_vm4 = vcmp.gt.f32.partialorder (!%p3870_p2), %v3344_v32, 0.0  ;;  %v3346_v33 = vld [vmem:[#allocation3 + $0x70] sm:$0xff] (!%p3870_p2)  ;;  %vm3379_vm10 = vcmp.gt.f32.partialorder (!%p3870_p2), %v3347_v53, 0.0  ;;  %v3349_v2 = vld [vmem:[#allocation3 + $0x88] sm:$0xff] (!%p3870_p2) }
 0x507   : > { %v3409_v58 = vsel %vm3377_vm7, %v3345_v25, 1.0  ;;  %v3408_v43 = vsel %vm3376_vm4, %v3344_v32, 1.0  ;;  %vm3378_vm5 = vcmp.gt.f32.partialorder %v3346_v33, 0.0  ;;  %v3348_v1 = vld [vmem:[#allocation3 + $0x80] sm:$0xff]  ;;  %v3411_v18 = vsel %vm3379_vm10, %v3347_v53, 1.0  ;;  %v3351_v62 = vld [vmem:[#allocation3 + $0x98] sm:$0xff] }
 0x508   : > { %v3410_v5 = vsel %vm3378_vm5, %v3346_v33, 1.0  ;;  %vm3381_vm9 = vcmp.gt.f32.partialorder %v3349_v2, 0.0  ;;  %vm3380_vm13 = vcmp.gt.f32.partialorder %v3348_v1, 0.0  ;;  %v3350_v8 = vld [vmem:[#allocation3 + $0x90] sm:$0xff]  ;;  %vm3383_vm2 = vcmp.gt.f32.partialorder %v3351_v62, 0.0  ;;  %v3353_v50 = vld [vmem:[#allocation3 + $0xa8] sm:$0xff] }
 0x509   : > { %v3413_v55 = vsel %vm3381_vm9, %v3349_v2, 1.0  ;;  %v3412_v23 = vsel %vm3380_vm13, %v3348_v1, 1.0  ;;  %vm3382_vm8 = vcmp.gt.f32.partialorder %v3350_v8, 0.0  ;;  %v3352_v51 = vld [vmem:[#allocation3 + $0xa0] sm:$0xff]  ;;  %v3415_v31 = vsel %vm3383_vm2, %v3351_v62, 1.0  ;;  %v3355_v0 = vld [vmem:[#allocation3 + $0xb8] sm:$0xff] }
 0x50a   : > { %3487 = vperm.xlu1 %4540, %v3401_v38   ;;  %3482 = vperm.xlu0 %4539, %v3400_v3   ;;  %v3414_v45 = vsel %vm3382_vm8, %v3350_v8, 1.0  ;;  %vm3385_vm12 = vcmp.gt.f32.partialorder %v3353_v50, 0.0  ;;  %vm3384_vm11 = vcmp.gt.f32.partialorder %v3352_v51, 0.0  ;;  %v3354_v30 = vld [vmem:[#allocation3 + $0xb0] sm:$0xff]  ;;  %vm3387_vm0 = vcmp.gt.f32.partialorder %v3355_v0, 0.0  ;;  %v3357_v60 = vld [vmem:[#allocation3 + $0xc8] sm:$0xff] }
 0x50b   : > { %v3417_v39 = vsel %vm3385_vm12, %v3353_v50, 1.0  ;;  %v3416_v47 = vsel %vm3384_vm11, %v3352_v51, 1.0  ;;  %vm3386_vm14 = vcmp.gt.f32.partialorder %v3354_v30, 0.0  ;;  %v3356_v46 = vld [vmem:[#allocation3 + $0xc0] sm:$0xff]  ;;  %v3419_v61 = vsel %vm3387_vm0, %v3355_v0, 1.0  ;;  %v3359_v17 = vld [vmem:[#allocation3 + $0xd8] sm:$0xff] }
 0x50c   : > { %v3418_v21 = vsel %vm3386_vm14, %v3354_v30, 1.0  ;;  %vm3389_vm1 = vcmp.gt.f32.partialorder %v3357_v60, 0.0  ;;  %vm3388_vm15 = vcmp.gt.f32.partialorder %v3356_v46, 0.0  ;;  %v3358_v54 = vld [vmem:[#allocation3 + $0xd0] sm:$0xff]  ;;  %vm3391_vm3 = vcmp.gt.f32.partialorder %v3359_v17, 0.0  ;;  %v3361_v11 = vld [vmem:[#allocation3 + $0xe8] sm:$0xff] }
 0x50d   : > { %v3421_v22 = vsel %vm3389_vm1, %v3357_v60, 1.0  ;;  %v3420_v29 = vsel %vm3388_vm15, %v3356_v46, 1.0  ;;  %vm3390_vm6 = vcmp.gt.f32.partialorder %v3358_v54, 0.0  ;;  %v3360_v26 = vld [vmem:[#allocation3 + $0xe0] sm:$0xff]  ;;  %v3423_v35 = vsel %vm3391_vm3, %v3359_v17, 1.0  ;;  %v3363_v49 = vld [vmem:[#allocation3 + $0xf8] sm:$0xff] }
 0x50e   : > { %3497 = vperm.xlu1 %4540, %v3403_v27   ;;  %3492 = vperm.xlu0 %4539, %v3402_v59   ;;  %v3422_v34 = vsel %vm3390_vm6, %v3358_v54, 1.0  ;;  %vm3393_vm7 = vcmp.gt.f32.partialorder %v3361_v11, 0.0  ;;  %vm3392_vm4 = vcmp.gt.f32.partialorder %v3360_v26, 0.0  ;;  %v3362_v6 = vld [vmem:[#allocation3 + $0xf0] sm:$0xff]  ;;  %vm3395_vm10 = vcmp.gt.f32.partialorder %v3363_v49, 0.0  ;;  %v3428_v48 = vld [vmem:[#allocation4] sm:$0xff] }
 0x50f   : > { %v3425_v13 = vsel %vm3393_vm7, %v3361_v11, 1.0  ;;  %v3424_v42 = vsel %vm3392_vm4, %v3360_v26, 1.0  ;;  %vm3394_vm5 = vcmp.gt.f32.partialorder %v3362_v6, 0.0  ;;  %v3427_v14 = vsel %vm3395_vm10, %v3363_v49, 1.0  ;;  %v3430_v19 = vld [vmem:[#allocation4 + $0x10] sm:$0xff]  ;;  %v3431_v16 = vld [vmem:[#allocation4 + $0x18] sm:$0xff] }
 0x510   : > { %v3426_v41 = vsel %vm3394_vm5, %v3362_v6, 1.0  ;;  %v3429_v9 = vld [vmem:[#allocation4 + $0x8] sm:$0xff]  ;;  %v3432_v32 = vld [vmem:[#allocation4 + $0x20] sm:$0xff]  ;;  %v3435_v2 = vld [vmem:[#allocation4 + $0x38] sm:$0xff] }
 0x511   : > { %v3433_v25 = vld [vmem:[#allocation4 + $0x28] sm:$0xff]  ;;  %v3434_v1 = vld [vmem:[#allocation4 + $0x30] sm:$0xff]  ;;  %v3436_v51 = vld [vmem:[#allocation4 + $0x40] sm:$0xff] }
 0x512   : > { %3507 = vperm.xlu1 %4540, %v3405_v7   ;;  %3502 = vperm.xlu0 %4539, %v3404_v28   ;;  %v3437_v50 = vld [vmem:[#allocation4 + $0x48] sm:$0xff]  ;;  %v3439_v60 = vld [vmem:[#allocation4 + $0x58] sm:$0xff]  ;;  %v3438_v46 = vld [vmem:[#allocation4 + $0x50] sm:$0xff] }
 0x513   : > { %v3441_v11 = vld [vmem:[#allocation4 + $0x68] sm:$0xff]  ;;  %v3440_v26 = vld [vmem:[#allocation4 + $0x60] sm:$0xff] }
 0x516   : > { %3517 = vperm.xlu1 %4540, %v3407_v44   ;;  %3512 = vperm.xlu0 %4539, %v3406_v24  }
 0x51a   : > { %3527 = vperm.xlu1 %4540, %v3409_v58   ;;  %3522 = vperm.xlu0 %4539, %v3408_v43  }
 0x51e   : > { %3537 = vperm.xlu1 %4540, %v3411_v18   ;;  %3532 = vperm.xlu0 %4539, %v3410_v5  }
 0x522   : > { %3547 = vperm.xlu1 %4540, %v3413_v55   ;;  %3542 = vperm.xlu0 %4539, %v3412_v23  }
 0x526   : > { %3557 = vperm.xlu1 %4540, %v3415_v31   ;;  %3552 = vperm.xlu0 %4539, %v3414_v45  }
 0x52a   : > { %3567 = vperm.xlu1 %4540, %v3417_v39   ;;  %3562 = vperm.xlu0 %4539, %v3416_v47  }
 0x52e   : > { %3577 = vperm.xlu1 %4540, %v3419_v61   ;;  %3572 = vperm.xlu0 %4539, %v3418_v21  }
 0x532   : > { %3587 = vperm.xlu1 %4540, %v3421_v22   ;;  %3582 = vperm.xlu0 %4539, %v3420_v29  }
 0x536   : > { %3597 = vperm.xlu1 %4540, %v3423_v35   ;;  %3592 = vperm.xlu0 %4539, %v3422_v34  }
 0x53a   : > { %3607 = vperm.xlu1 %4540, %v3425_v13   ;;  %3602 = vperm.xlu0 %4539, %v3424_v42  }
 0x53e   : > { %3617 = vperm.xlu1 %4540, %v3427_v14   ;;  %3612 = vperm.xlu0 %4539, %v3426_v41   ;;  %v3443_v14 = vld [vmem:[#allocation4 + $0x78] sm:$0xff]  ;;  %v3442_v41 = vld [vmem:[#allocation4 + $0x70] sm:$0xff] }
 0x581   : > { %v3473_v56 = vpop.permute.xlu1 %3472  ;;  %v3463_v4 = vpop.permute.xlu0 %3462 }
 0x582   : > { %4541 = vrcp.f32 %v3473_v56 }
 0x583   : > { %4543 = vrcp.f32 %v3463_v4 }
 0x585   : > { %v3478_v36 = vpop.permute.xlu1 %3477  ;;  %v3468_v20 = vpop.permute.xlu0 %3467 }
 0x586   : > { %4545 = vrcp.f32 %v3478_v36 }
 0x587   : > { %4547 = vrcp.f32 %v3468_v20 }
 0x589   : > { %v3488_v63 = vpop.permute.xlu1 %3487  ;;  %v3483_v37 = vpop.permute.xlu0 %3482 }
 0x58a   : > { %4549 = vrcp.f32 %v3488_v63 }
 0x58b   : > { %4551 = vrcp.f32 %v3483_v37 }
 0x58c   : > { %v4542_v40 = vpop.eup %4541 }
 0x58d   : > { %v4544_v52 = vpop.eup %4543  ;;  %v3625_v15 = vmul.f32 %v4542_v40, %v3430_v19  ;;  %v3498_v12 = vpop.permute.xlu1 %3497  ;;  %v3445_v19 = vld [vmem:[#allocation4 + $0x88] sm:$0xff] }
 0x58e   : > { %v3493_v38 = vpop.permute.xlu0 %3492  ;;  %v3621_v3 = vmul.f32 %v4544_v52, %v3428_v48  ;;  %4553 = vrcp.f32 %v3498_v12  ;;  %v3444_v48 = vld [vmem:[#allocation4 + $0x80] sm:$0xff] }
 0x58f   : > { %3686 = vst [vmem:[%s4868_s25 + $0x10] sm:$0xff] %v3625_v15  ;;  %4555 = vrcp.f32 %v3493_v38 }
 0x590   : > { %v4546_v27 = vpop.eup %4545  ;;  %3684 = vst [vmem:[%s4868_s25] sm:$0xff] %v3621_v3 }
 0x591   : > { %v4548_v59 = vpop.eup %4547  ;;  %v3627_v57 = vmul.f32 %v4546_v27, %v3431_v16  ;;  %v3508_v10 = vpop.permute.xlu1 %3507  ;;  %v3447_v16 = vld [vmem:[#allocation4 + $0x98] sm:$0xff] }
 0x592   : > { %v3503_v7 = vpop.permute.xlu0 %3502  ;;  %v3623_v28 = vmul.f32 %v4548_v59, %v3429_v9  ;;  %4557 = vrcp.f32 %v3508_v10  ;;  %v3446_v9 = vld [vmem:[#allocation4 + $0x90] sm:$0xff] }
 0x593   : > { %3687 = vst [vmem:[%s4868_s25 + $0x18] sm:$0xff] %v3627_v57  ;;  %4559 = vrcp.f32 %v3503_v7 }
 0x594   : > { %v4550_v44 = vpop.eup %4549  ;;  %3685 = vst [vmem:[%s4868_s25 + $0x8] sm:$0xff] %v3623_v28 }
 0x595   : > { %v4552_v24 = vpop.eup %4551  ;;  %v3631_v53 = vmul.f32 %v4550_v44, %v3433_v25  ;;  %v3518_v33 = vpop.permute.xlu1 %3517  ;;  %v3449_v25 = vld [vmem:[#allocation4 + $0xa8] sm:$0xff] }
 0x596   : > { %v3513_v58 = vpop.permute.xlu0 %3512  ;;  %v3629_v43 = vmul.f32 %v4552_v24, %v3432_v32  ;;  %4561 = vrcp.f32 %v3518_v33  ;;  %v3448_v32 = vld [vmem:[#allocation4 + $0xa0] sm:$0xff] }
 0x597   : > { %3689 = vst [vmem:[%s4868_s25 + $0x28] sm:$0xff] %v3631_v53  ;;  %4563 = vrcp.f32 %v3513_v58 }
 0x598   : > { %v4554_v18 = vpop.eup %4553  ;;  %3688 = vst [vmem:[%s4868_s25 + $0x20] sm:$0xff] %v3629_v43 }
 0x599   : > { %v4556_v5 = vpop.eup %4555  ;;  %v3635_v62 = vmul.f32 %v4554_v18, %v3435_v2  ;;  %v3528_v8 = vpop.permute.xlu1 %3527  ;;  %v3451_v2 = vld [vmem:[#allocation4 + $0xb8] sm:$0xff] }
 0x59a   : > { %v3523_v55 = vpop.permute.xlu0 %3522  ;;  %v3633_v23 = vmul.f32 %v4556_v5, %v3434_v1  ;;  %4565 = vrcp.f32 %v3528_v8  ;;  %v3450_v1 = vld [vmem:[#allocation4 + $0xb0] sm:$0xff] }
 0x59b   : > { %3691 = vst [vmem:[%s4868_s25 + $0x38] sm:$0xff] %v3635_v62  ;;  %4567 = vrcp.f32 %v3523_v55 }
 0x59c   : > { %v4558_v31 = vpop.eup %4557  ;;  %3690 = vst [vmem:[%s4868_s25 + $0x30] sm:$0xff] %v3633_v23 }
 0x59d   : > { %v4560_v45 = vpop.eup %4559  ;;  %v3639_v0 = vmul.f32 %v4558_v31, %v3437_v50  ;;  %v3538_v30 = vpop.permute.xlu1 %3537  ;;  %v3453_v50 = vld [vmem:[#allocation4 + $0xc8] sm:$0xff] }
 0x59e   : > { %v3533_v39 = vpop.permute.xlu0 %3532  ;;  %v3637_v47 = vmul.f32 %v4560_v45, %v3436_v51  ;;  %4569 = vrcp.f32 %v3538_v30  ;;  %v3452_v51 = vld [vmem:[#allocation4 + $0xc0] sm:$0xff] }
 0x59f   : > { %3693 = vst [vmem:[%s4868_s25 + $0x48] sm:$0xff] %v3639_v0  ;;  %4571 = vrcp.f32 %v3533_v39 }
 0x5a0   : > { %v4562_v61 = vpop.eup %4561  ;;  %3692 = vst [vmem:[%s4868_s25 + $0x40] sm:$0xff] %v3637_v47 }
 0x5a1   : > { %v4564_v21 = vpop.eup %4563  ;;  %v3643_v17 = vmul.f32 %v4562_v61, %v3439_v60  ;;  %v3548_v54 = vpop.permute.xlu1 %3547  ;;  %v3455_v60 = vld [vmem:[#allocation4 + $0xd8] sm:$0xff] }
 0x5a2   : > { %v3543_v22 = vpop.permute.xlu0 %3542  ;;  %v3641_v29 = vmul.f32 %v4564_v21, %v3438_v46  ;;  %4573 = vrcp.f32 %v3548_v54  ;;  %v3454_v46 = vld [vmem:[#allocation4 + $0xd0] sm:$0xff] }
 0x5a3   : > { %3695 = vst [vmem:[%s4868_s25 + $0x58] sm:$0xff] %v3643_v17  ;;  %4575 = vrcp.f32 %v3543_v22  ;;  %v3457_v22 = vld [vmem:[#allocation4 + $0xe8] sm:$0xff] }
 0x5a4   : > { %v4566_v35 = vpop.eup %4565  ;;  %3694 = vst [vmem:[%s4868_s25 + $0x50] sm:$0xff] %v3641_v29  ;;  %v3456_v29 = vld [vmem:[#allocation4 + $0xe0] sm:$0xff] }
 0x5a5   : > { %v4568_v34 = vpop.eup %4567  ;;  %v3647_v49 = vmul.f32 %v4566_v35, %v3441_v11  ;;  %v3558_v6 = vpop.permute.xlu1 %3557 }
 0x5a6   : > { %v3553_v13 = vpop.permute.xlu0 %3552  ;;  %v3645_v42 = vmul.f32 %v4568_v34, %v3440_v26  ;;  %4577 = vrcp.f32 %v3558_v6  ;;  %v3458_v6 = vld [vmem:[#allocation4 + $0xf0] sm:$0xff] }
 0x5a7   : > { %3697 = vst [vmem:[%s4868_s25 + $0x68] sm:$0xff] %v3647_v49  ;;  %4579 = vrcp.f32 %v3553_v13  ;;  %v3459_v49 = vld [vmem:[#allocation4 + $0xf8] sm:$0xff] }
 0x5a8   : > { %v4570_v56 = vpop.eup %4569  ;;  %3696 = vst [vmem:[%s4868_s25 + $0x60] sm:$0xff] %v3645_v42 }
 0x5a9   : > { %v4572_v4 = vpop.eup %4571  ;;  %v3651_v36 = vmul.f32 %v4570_v56, %v3443_v14  ;;  %v3568_v20 = vpop.permute.xlu1 %3567 }
 0x5aa   : > { %v3563_v63 = vpop.permute.xlu0 %3562  ;;  %v3649_v37 = vmul.f32 %v4572_v4, %v3442_v41  ;;  %4581 = vrcp.f32 %v3568_v20 }
 0x5ab   : > { %3699 = vst [vmem:[%s4868_s25 + $0x78] sm:$0xff] %v3651_v36  ;;  %4583 = vrcp.f32 %v3563_v63 }
 0x5ac   : > { %v4574_v40 = vpop.eup %4573  ;;  %3698 = vst [vmem:[%s4868_s25 + $0x70] sm:$0xff] %v3649_v37 }
 0x5ad   : > { %v4576_v52 = vpop.eup %4575  ;;  %v3655_v15 = vmul.f32 %v4574_v40, %v3445_v19  ;;  %v3578_v12 = vpop.permute.xlu1 %3577 }
 0x5ae   : > { %v3573_v38 = vpop.permute.xlu0 %3572  ;;  %v3653_v3 = vmul.f32 %v4576_v52, %v3444_v48  ;;  %4585 = vrcp.f32 %v3578_v12 }
 0x5af   : > { %3701 = vst [vmem:[%s4868_s25 + $0x88] sm:$0xff] %v3655_v15  ;;  %4587 = vrcp.f32 %v3573_v38 }
 0x5b0   : > { %v4578_v27 = vpop.eup %4577  ;;  %3700 = vst [vmem:[%s4868_s25 + $0x80] sm:$0xff] %v3653_v3 }
 0x5b1   : > { %v4580_v59 = vpop.eup %4579  ;;  %v3659_v57 = vmul.f32 %v4578_v27, %v3447_v16  ;;  %v3588_v10 = vpop.permute.xlu1 %3587 }
 0x5b2   : > { %v3583_v7 = vpop.permute.xlu0 %3582  ;;  %v3657_v28 = vmul.f32 %v4580_v59, %v3446_v9  ;;  %4589 = vrcp.f32 %v3588_v10 }
 0x5b3   : > { %3703 = vst [vmem:[%s4868_s25 + $0x98] sm:$0xff] %v3659_v57  ;;  %4591 = vrcp.f32 %v3583_v7 }
 0x5b4   : > { %v4582_v44 = vpop.eup %4581  ;;  %3702 = vst [vmem:[%s4868_s25 + $0x90] sm:$0xff] %v3657_v28 }
 0x5b5   : > { %v4584_v24 = vpop.eup %4583  ;;  %v3663_v53 = vmul.f32 %v4582_v44, %v3449_v25  ;;  %v3598_v33 = vpop.permute.xlu1 %3597 }
 0x5b6   : > { %v3593_v58 = vpop.permute.xlu0 %3592  ;;  %v3661_v43 = vmul.f32 %v4584_v24, %v3448_v32  ;;  %4593 = vrcp.f32 %v3598_v33 }
 0x5b7   : > { %3705 = vst [vmem:[%s4868_s25 + $0xa8] sm:$0xff] %v3663_v53  ;;  %4595 = vrcp.f32 %v3593_v58 }
 0x5b8   : > { %v4586_v18 = vpop.eup %4585  ;;  %3704 = vst [vmem:[%s4868_s25 + $0xa0] sm:$0xff] %v3661_v43 }
 0x5b9   : > { %v4588_v5 = vpop.eup %4587  ;;  %v3667_v62 = vmul.f32 %v4586_v18, %v3451_v2  ;;  %v3608_v8 = vpop.permute.xlu1 %3607 }
 0x5ba   : > { %v3603_v55 = vpop.permute.xlu0 %3602  ;;  %v3665_v23 = vmul.f32 %v4588_v5, %v3450_v1  ;;  %4597 = vrcp.f32 %v3608_v8 }
 0x5bb   : > { %3707 = vst [vmem:[%s4868_s25 + $0xb8] sm:$0xff] %v3667_v62  ;;  %4599 = vrcp.f32 %v3603_v55 }
 0x5bc   : > { %v4590_v31 = vpop.eup %4589  ;;  %3706 = vst [vmem:[%s4868_s25 + $0xb0] sm:$0xff] %v3665_v23 }
 0x5bd   : > { %v4592_v45 = vpop.eup %4591  ;;  %v3671_v0 = vmul.f32 %v4590_v31, %v3453_v50  ;;  %v3618_v30 = vpop.permute.xlu1 %3617 }
 0x5be   : > { %v3613_v39 = vpop.permute.xlu0 %3612  ;;  %v3669_v47 = vmul.f32 %v4592_v45, %v3452_v51  ;;  %4601 = vrcp.f32 %v3618_v30 }
 0x5bf   : > { %3709 = vst [vmem:[%s4868_s25 + $0xc8] sm:$0xff] %v3671_v0  ;;  %4603 = vrcp.f32 %v3613_v39 }
 0x5c0   : > { %v4594_v61 = vpop.eup %4593  ;;  %3708 = vst [vmem:[%s4868_s25 + $0xc0] sm:$0xff] %v3669_v47 }
 0x5c1   : > { %v4596_v21 = vpop.eup %4595  ;;  %v3675_v17 = vmul.f32 %v4594_v61, %v3455_v60 }
 0x5c2   : > { %v3673_v54 = vmul.f32 %v4596_v21, %v3454_v46 }
 0x5c3   : > { %3711 = vst [vmem:[%s4868_s25 + $0xd8] sm:$0xff] %v3675_v17 }
 0x5c4   : > { %v4598_v11 = vpop.eup %4597  ;;  %3710 = vst [vmem:[%s4868_s25 + $0xd0] sm:$0xff] %v3673_v54 }
 0x5c5   : > { %v4600_v26 = vpop.eup %4599  ;;  %v3679_v35 = vmul.f32 %v4598_v11, %v3457_v22 }
 0x5c6   : > { %v3677_v34 = vmul.f32 %v4600_v26, %v3456_v29 }
 0x5c7   : > { %3713 = vst [vmem:[%s4868_s25 + $0xe8] sm:$0xff] %v3679_v35 }
 0x5c8   : > { %v4602_v13 = vpop.eup %4601  ;;  %3712 = vst [vmem:[%s4868_s25 + $0xe0] sm:$0xff] %v3677_v34 }
 0x5c9   : > { %v4604_v42 = vpop.eup %4603  ;;  %v3683_v14 = vmul.f32 %v4602_v13, %v3459_v49 }
 0x5ca   : > { %v3681_v41 = vmul.f32 %v4604_v42, %v3458_v6 }
 0x5cb   : > { %3715 = vst [vmem:[%s4868_s25 + $0xf8] sm:$0xff] %v3683_v14 }
 0x5cc   : > { %3714 = vst [vmem:[%s4868_s25 + $0xf0] sm:$0xff] %v3681_v41 }
 0x5cd PF: > { %s3876_s29 = sshll.u32 %s4713_s30, 12  ;;  %s3730_s16 = sshll.u32 %s4868_s25, 4  ;;  %s8182_s16 = int_to_ptr.vmem [resolvable:$true] %s3730_s16 }
 0x5ce   : > { %s8179_s15 = scalar_lea.hbm %s8242_s5, %s3876_s29  ;;  %s9113_s19 = sand.u32 1, %s4701_s27  }
 0x5cf   : > { %s8186_s22 = scalar_lea.sflag [#allocation9], %s9113_s19  ;;  %s4629_s21 = scalar_lea.vmem %s8182_s16, 4096 }
 0x5d0   : > { %p4630_p3 = scmp.ne.s32.totalorder %s8182_s16, %s4629_s21  ;;  %s4734_s30 = smov [#allocation8]  }
 0x5d1   : > { %s4633_s24 = sshll.u32 %s4734_s30, 4  ;;  %s4634_s24 = int_to_ptr.vmem [resolvable:$false] %s4633_s24 }
 0x5d2   : > { %p4631_p4 = pnand %p4630_p3, %p4822_p13  ;;  %s4635_s23 = scalar_lea.vmem %s4634_s24, 8192 }
 0x5d3   : > { %p4636_p7 = scmp.lt.s32.totalorder %s8182_s16, %s4634_s24  ;;  %p4637_p8 = scmp.lt.s32.totalorder %s4635_s23, %s4629_s21 }
 0x5d4   : > { %p4632_p6 = pneg %p4631_p4 }
 0x5d5   : > { %p4638_p9 = por %p4637_p8, %p4636_p7 }
 0x5d7   : > { %p4639_p10 = pnand %p4638_p9, %p4632_p6 }
 0x5d9   : > { %4642 = shalt.err (!%p4639_p10)
}
 0x5da   : > { %s4643_s25 = scalar_lea.hbm %s8179_s15, 4096  ;;  %s4647_s20 = scalar_lea.hbm %s8242_s5, 8192 }
 0x5db   : > { %p4644_p11 = scmp.ne.s32.totalorder %s8179_s15, %s4643_s25  ;;  %p4648_p1 = scmp.lt.u32.totalorder %s8179_s15, %s8242_s5 }
 0x5dc   : > { %p4649_p2 = scmp.lt.u32.totalorder %s4647_s20, %s4643_s25  ;;  %p4651_p4 = scmp.lt.u32.totalorder %s4643_s25, %s8179_s15 }
 0x5dd   : > { %p4645_p12 = pnand %p4644_p11, %p4822_p13 }
 0x5de   : > { %p4650_p3 = por %p4649_p2, %p4648_p1 }
 0x5df   : > { %p4646_p0 = pneg %p4645_p12 }
 0x5e0   : > { %p4652_p6 = por %p4651_p4, %p4650_p3 }
 0x5e2   : > { %p4653_p7 = pnand %p4652_p6, %p4646_p0 }
 0x5e4   : > { %4656 = shalt.err (!%p4653_p7)
}
 0x5e5   : > { %s4735_s10 = smov 128   ;;  %s4736_s29 = smov 8  }
 0x5e6   : > { %4101 = dma.vmem_to_hbm [thread:$0]  (%p4822_p13), %s8182_s16, 4096, %s8179_s15, %s8186_s22, %s4735_s10, %s4735_s10, %s4736_s29  }
 0x5e7 PF: > { %p4107_p8 = scmp.ge.s32.totalorder %s4725_s8, 2  ;;  %s3745_s11 = sand.u32 1, %s4697_s1  }
 0x5e8   : > { %s3746_s0 = scalar_lea.sflag [#allocation9], %s3745_s11 }
 0x5e9   : > { %p4104_p9 = pnand %p4107_p8, %p4832_p5 }
 0x5eb   : > { %4692 = dma.done.wait (!%p4104_p9), %s3746_s0, 4096  }
 0x5ec   : > { %4694 = vsyncadd (!%p4104_p9), %s3746_s0, 4294963200  ;;  %s28_s8 = sadd.s32 1, %s4725_s8   ;;  %s9114_s13 = sld [smem:[#allocation12_spill]] }
 0x5ed   : > { %p25_p10 = scmp.ge.s32.totalorder %s28_s8, 6   ;;  %s9115_s15 = sld [smem:[#allocation13_spill]] }
 0x5ee   : > { %s9116_s1 = smov %s4701_s27  ;;  %s9117_s27 = smov %s4705_s28 }
 0x5ef   : > { %s9118_s28 = smov %s4840_s17  ;;  %s9119_s29 = smov %s4717_s6 }
 0x5f0   : > { %s9120_s30 = smov %s4721_s7  ;;  %27 = sbr.rel (!%p25_p10) target bundleno = 30 (0x1e), region = 85 }
 0x5f2   : > { %s9121_s6 = smov %s9114_s13 }
 0x5f3   : > { %s9122_s7 = smov %s9115_s15 }
 0x5f7   :  { %3751 = vsyncpa [#allocation9], 1 }
 0x5f8   :  { %3753 = vsyncpa [#allocation9 + $0x1], 1 }

</bundles_post_ra>
